<compile_context>
chip_gen: v7x
topology: tpu7x:2x2x1
jax: 0.10.0
libtpu: 0.0.40
codegen_flags: <defaults>
</compile_context>

<pallas_src>
import math

import jax
import jax.numpy as jnp
from jax.experimental import pallas as pl
from jax.experimental.pallas import tpu as pltpu

# ----------------------------- model dims ------------------------------
BATCH = 2
SEQ = 8
INPUT_DIM = 16
HIDDEN = 32
NUM_LAYERS = 3
NUM_HEADS = 4
HEAD_DIM = HIDDEN // NUM_HEADS
FFN_DIM = 64
LN_EPS = 1e-5
SQRT_H = math.sqrt(HIDDEN)
ATTN_SCALE = 1.0 / math.sqrt(HEAD_DIM)

BT = BATCH * SEQ            # fused batch*seq rows handled in one grid step
LANE = 128                  # lane-dense width for output + weight slab

# ------------------- row layout of the packed (496, 128) slab -----------------
# Every block starts on a multiple of 8 rows (sublane tile aligned).
R_WIN = 0                                   # (16, :32)  w_in * sqrt(H)
R_ATTN = R_WIN + INPUT_DIM                  # per layer (32, 128): Wq*s | Wk | Wv | Wo
R_W1 = R_ATTN + NUM_LAYERS * HIDDEN         # per layer (32, :64)  w1
R_W2 = R_W1 + NUM_LAYERS * HIDDEN           # per layer (64, :32)  w2
R_WOUT = R_W2 + NUM_LAYERS * FFN_DIM        # (32, 128)  w_out zero-padded to 128 lanes
R_VEC = R_WOUT + HIDDEN                     # per layer 8 rows of vectors (see below)
ROWS_PER_LAYER = 8                          # ln1_g, ln1_b, ln2_g, ln2_b, b1, b2, bo, bqkv
R_FIN = R_VEC + NUM_LAYERS * ROWS_PER_LAYER  # lnf_g, lnf_b, b_out (+ pad to 8)
R_MASK = R_FIN + 8                          # (16, :16) block-diagonal additive mask
R_PE = R_MASK + BT                          # (16, :32) pos-enc tiled over batch
TOTAL_ROWS = R_PE + BT                      # 496


def _layernorm(x, g, b):
    # PyTorch LayerNorm: biased variance over last dim, eps inside rsqrt.
    mu = jnp.mean(x, axis=-1, keepdims=True)
    var = jnp.mean((x - mu) ** 2, axis=-1, keepdims=True)
    return (x - mu) * jax.lax.rsqrt(var + LN_EPS) * g + b


# ----------------------------- the kernel ------------------------------
def ndt_kernel(x_ref, w_ref, o_ref):
    f32 = jnp.float32

    # precomputed block-diagonal additive mask and positional encoding
    neg_mask = w_ref[R_MASK:R_MASK + BT, :BT]              # (16, 16)
    pe = w_ref[R_PE:R_PE + BT, :HIDDEN]                    # (16, 32)

    # input projection (sqrt(H) pre-folded into w_in) + positional encoding
    # TODO(synk): nn.Dropout has no inference-time effect; omitted (eval semantics).
    h = jnp.dot(x_ref[...], w_ref[R_WIN:R_WIN + INPUT_DIM, :HIDDEN],
                preferred_element_type=f32) + pe

    for l in range(NUM_LAYERS):
        vb = R_VEC + l * ROWS_PER_LAYER
        ln1_g = w_ref[vb + 0:vb + 1, :HIDDEN]
        ln1_b = w_ref[vb + 1:vb + 2, :HIDDEN]
        ln2_g = w_ref[vb + 2:vb + 3, :HIDDEN]
        ln2_b = w_ref[vb + 3:vb + 4, :HIDDEN]
        b1 = w_ref[vb + 4:vb + 5, :FFN_DIM]
        b2 = w_ref[vb + 5:vb + 6, :HIDDEN]
        bo = w_ref[vb + 6:vb + 7, :HIDDEN]
        bqkv = w_ref[vb + 7:vb + 8, :3 * HIDDEN]           # Q part pre-scaled

        a_base = R_ATTN + l * HIDDEN

        # -------- self-attention block (pre-LN), fused QKV + fused out-proj ---
        y = _layernorm(h, ln1_g, ln1_b)
        qkv = jnp.dot(y, w_ref[a_base:a_base + HIDDEN, 0:3 * HIDDEN],
                      preferred_element_type=f32) + bqkv   # (16, 96)

        ctx_heads = []
        for hh in range(NUM_HEADS):
            o = hh * HEAD_DIM
            q = qkv[:, o:o + HEAD_DIM]                                   # (16, 8)
            k = qkv[:, HIDDEN + o:HIDDEN + o + HEAD_DIM]
            v = qkv[:, 2 * HIDDEN + o:2 * HIDDEN + o + HEAD_DIM]
            # scores = q @ k^T  (attention scale pre-folded into Wq/bq)
            s = jax.lax.dot_general(q, k, (((1,), (1,)), ((), ())),
                                    preferred_element_type=f32) + neg_mask
            s = s - jnp.max(s, axis=-1, keepdims=True)
            e = jnp.exp(s)
            p = e * pl.reciprocal(jnp.sum(e, axis=-1, keepdims=True), approx=True)
            ctx_heads.append(jnp.dot(p, v, preferred_element_type=f32))  # (16, 8)
        ctx = jnp.concatenate(ctx_heads, axis=-1)                        # (16, 32)

        attn = jnp.dot(ctx, w_ref[a_base:a_base + HIDDEN, 3 * HIDDEN:4 * HIDDEN],
                       preferred_element_type=f32)                       # (16, 32)
        h = h + attn + bo

        # -------- feed-forward block (pre-LN) --------------------------------
        y = _layernorm(h, ln2_g, ln2_b)
        w1 = w_ref[R_W1 + l * HIDDEN:R_W1 + (l + 1) * HIDDEN, :FFN_DIM]
        w2 = w_ref[R_W2 + l * FFN_DIM:R_W2 + (l + 1) * FFN_DIM, :HIDDEN]
        f = jnp.maximum(jnp.dot(y, w1, preferred_element_type=f32) + b1, 0.0)  # ReLU
        h = h + jnp.dot(f, w2, preferred_element_type=f32) + b2

    # -------- final LayerNorm + lane-dense (128-wide, zero-padded) out-proj ---
    h = _layernorm(h, w_ref[R_FIN + 0:R_FIN + 1, :HIDDEN],
                   w_ref[R_FIN + 1:R_FIN + 2, :HIDDEN])
    o_ref[...] = (jnp.dot(h, w_ref[R_WOUT:R_WOUT + HIDDEN, :],
                          preferred_element_type=f32)
                  + w_ref[R_FIN + 2:R_FIN + 3, :])


# ----------------------------- wrapper ---------------------------------
def transformer_autoencoder_forward(x, w_slab):
    B, T, Din = x.shape
    x2 = x.reshape(B * T, Din)                 # layout-trivial flatten of leading dims

    out = pl.pallas_call(
        ndt_kernel,
        out_shape=jax.ShapeDtypeStruct((B * T, LANE), jnp.float32),
        grid=(1,),                             # single fused step (no per-step overhead)
        in_specs=[pl.BlockSpec((B * T, Din), lambda i: (0, 0)),
                  pl.BlockSpec((TOTAL_ROWS, LANE), lambda i: (0, 0))],
        out_specs=pl.BlockSpec((B * T, LANE), lambda i: (0, 0)),
        compiler_params=pltpu.CompilerParams(dimension_semantics=("arbitrary",)),
    )(x2, w_slab)
    return out[:, :Din].reshape(B, T, Din)     # drop lane padding, restore (B, T, Din)


# -------------------- one-time parameter repacking ----------------------
def prepare_packed(p):
    """Fold scales and pack every parameter into ONE lane-dense (496, 128) slab."""
    L, H, F, Din = NUM_LAYERS, HIDDEN, FFN_DIM, INPUT_DIM
    W = jnp.zeros((TOTAL_ROWS, LANE), jnp.float32)

    # input projection (sqrt(H) folded in)
    W = W.at[R_WIN:R_WIN + Din, :H].set(SQRT_H * p["w_in"])

    for l in range(L):
        # per-layer attention slab: Wq*scale | Wk | Wv | Wo  (32 rows x 128 lanes)
        r = R_ATTN + l * H
        wqkv = p["wqkv"][l]                                  # (H, 3H)
        W = W.at[r:r + H, 0:H].set(wqkv[:, 0:H] * ATTN_SCALE)
        W = W.at[r:r + H, H:2 * H].set(wqkv[:, H:2 * H])
        W = W.at[r:r + H, 2 * H:3 * H].set(wqkv[:, 2 * H:3 * H])
        W = W.at[r:r + H, 3 * H:4 * H].set(p["wo"][l])

        # FFN weights
        W = W.at[R_W1 + l * H:R_W1 + (l + 1) * H, :F].set(p["w1"][l])
        W = W.at[R_W2 + l * F:R_W2 + (l + 1) * F, :H].set(p["w2"][l])

        # per-layer vector rows
        vb = R_VEC + l * ROWS_PER_LAYER
        W = W.at[vb + 0, :H].set(p["ln1_g"][l, 0])
        W = W.at[vb + 1, :H].set(p["ln1_b"][l, 0])
        W = W.at[vb + 2, :H].set(p["ln2_g"][l, 0])
        W = W.at[vb + 3, :H].set(p["ln2_b"][l, 0])
        W = W.at[vb + 4, :F].set(p["b1"][l, 0])
        W = W.at[vb + 5, :H].set(p["b2"][l, 0])
        W = W.at[vb + 6, :H].set(p["bo"][l, 0])
        bqkv = p["bqkv"][l, 0]                               # (3H,)
        W = W.at[vb + 7, :3 * H].set(
            jnp.concatenate([bqkv[:H] * ATTN_SCALE, bqkv[H:]]))

    # final LN, output bias; out-proj zero-padded to 128 lanes
    W = W.at[R_FIN + 0, :H].set(p["lnf_g"][0])
    W = W.at[R_FIN + 1, :H].set(p["lnf_b"][0])
    W = W.at[R_FIN + 2, :Din].set(p["b_out"][0])
    W = W.at[R_WOUT:R_WOUT + H, :Din].set(p["w_out"])

    # block-diagonal additive mask (attention stays within each batch element)
    row_b = jnp.arange(BT)[:, None] // SEQ
    col_b = jnp.arange(BT)[None, :] // SEQ
    W = W.at[R_MASK:R_MASK + BT, :BT].set(
        jnp.where(row_b == col_b, 0.0, -1e30).astype(jnp.float32))

    # positional encoding tiled over batch
    W = W.at[R_PE:R_PE + BT, :H].set(jnp.tile(p["pe"], (BATCH, 1)))
    return W


# ----------------------- deterministic params --------------------------
def make_params(key):
    ks = jax.random.split(key, 16)
    u = lambda k, shape, s=0.1: jax.random.uniform(k, shape, jnp.float32, -s, s)

    # sinusoidal positional encoding (matches _SinusoidalPositionEmb, even d_model)
    position = jnp.arange(SEQ, dtype=jnp.float32)[:, None]
    div_term = jnp.exp(jnp.arange(0, HIDDEN, 2, dtype=jnp.float32)
                       * (-math.log(10000.0) / HIDDEN))
    pe = jnp.zeros((SEQ, HIDDEN), jnp.float32)
    pe = pe.at[:, 0::2].set(jnp.sin(position * div_term))
    pe = pe.at[:, 1::2].set(jnp.cos(position * div_term))

    L, H, F, Din = NUM_LAYERS, HIDDEN, FFN_DIM, INPUT_DIM
    return {
        "pe": pe,
        "w_in": u(ks[0], (Din, H)),                        # input_projection (no bias)
        "ln1_g": 1.0 + u(ks[1], (L, 1, H)), "ln1_b": u(ks[2], (L, 1, H)),
        "wqkv": u(ks[3], (L, H, 3 * H)),  "bqkv": u(ks[4], (L, 1, 3 * H)),
        "wo":   u(ks[5], (L, H, H)),      "bo":   u(ks[6], (L, 1, H)),
        "ln2_g": 1.0 + u(ks[7], (L, 1, H)), "ln2_b": u(ks[8], (L, 1, H)),
        "w1": u(ks[9], (L, H, F)),  "b1": u(ks[10], (L, 1, F)),
        "w2": u(ks[11], (L, F, H)), "b2": u(ks[12], (L, 1, H)),
        "lnf_g": 1.0 + u(ks[13], (1, H)), "lnf_b": jnp.zeros((1, H), jnp.float32),
        "w_out": u(ks[14], (H, Din)), "b_out": u(ks[15], (1, Din)),
    }


# ----------------------- pure-JAX reference ----------------------------
def reference_forward(x, p):
    def body(xb):  # (T, Din)
        h = SQRT_H * xb @ p["w_in"] + p["pe"]
        for l in range(NUM_LAYERS):
            y = _layernorm(h, p["ln1_g"][l], p["ln1_b"][l])
            qkv = y @ p["wqkv"][l] + p["bqkv"][l]
            q, k, v = qkv[:, :HIDDEN], qkv[:, HIDDEN:2 * HIDDEN], qkv[:, 2 * HIDDEN:]
            qh = q.reshape(SEQ, NUM_HEADS, HEAD_DIM)
            kh = k.reshape(SEQ, NUM_HEADS, HEAD_DIM)
            vh = v.reshape(SEQ, NUM_HEADS, HEAD_DIM)
            s = jnp.einsum("qnd,knd->nqk", qh, kh) * ATTN_SCALE
            pr = jax.nn.softmax(s, axis=-1)
            ctx = jnp.einsum("nqk,knd->qnd", pr, vh).reshape(SEQ, HIDDEN)
            h = h + (ctx @ p["wo"][l] + p["bo"][l])
            y = _layernorm(h, p["ln2_g"][l], p["ln2_b"][l])
            f = jnp.maximum(y @ p["w1"][l] + p["b1"][l], 0.0) @ p["w2"][l] + p["b2"][l]
            h = h + f
        h = _layernorm(h, p["lnf_g"], p["lnf_b"])
        return h @ p["w_out"] + p["b_out"]
    return jax.vmap(body)(x)


# ------------------------------- main -----------------------------------
if __name__ == "__main__":
    key = jax.random.PRNGKey(0)
    k_x, k_p = jax.random.split(key)
    x = jax.random.normal(k_x, (BATCH, SEQ, INPUT_DIM), jnp.float32)
    params = make_params(k_p)
    w_slab = prepare_packed(params)      # one-time fold/pack (not per-call wrapper work)

    out = jax.block_until_ready(transformer_autoencoder_forward(x, w_slab))

    ref = jax.block_until_ready(reference_forward(x, params))
    assert out.shape == (BATCH, SEQ, INPUT_DIM)
    assert jnp.allclose(out, ref, atol=2e-3, rtol=2e-3), (
        f"max abs diff {jnp.max(jnp.abs(out - ref))}")

    print("KERNEL_OK")
</pallas_src>

<mosaic_0001>
module attributes {stable_mosaic.version = 11 : i64} {
  func.func @ndt_kernel(%arg0: i32, %arg1: memref<16x16xf32, #tpu.memory_space<vmem>>, %arg2: memref<496x128xf32, #tpu.memory_space<vmem>>, %arg3: memref<16x128xf32, #tpu.memory_space<vmem>>) attributes {dimension_semantics = [#tpu.dimension_semantics<arbitrary>], iteration_bounds = array<i64: 1>, scalar_prefetch = 0 : i64, scratch_operands = 0 : i64, tpu.core_type = #tpu.core_type<tc>, window_params = [{pipeline_mode = #tpu.pipeline_mode<synchronous>, transform_indices = @transform_0, window_bounds = array<i64: 16, 16>}, {pipeline_mode = #tpu.pipeline_mode<synchronous>, transform_indices = @transform_1, window_bounds = array<i64: 496, 128>}, {pipeline_mode = #tpu.pipeline_mode<synchronous>, transform_indices = @transform_2, window_bounds = array<i64: 16, 128>}]} {
    %c464 = arith.constant 464 : index
    %c0 = arith.constant 0 : index
    %0 = vector.load %arg2[%c464, %c0] : memref<496x128xf32, #tpu.memory_space<vmem>>, vector<16x16xf32>
    %c480 = arith.constant 480 : index
    %c0_0 = arith.constant 0 : index
    %1 = vector.load %arg2[%c480, %c0_0] : memref<496x128xf32, #tpu.memory_space<vmem>>, vector<16x32xf32>
    %c0_1 = arith.constant 0 : index
    %c0_2 = arith.constant 0 : index
    %2 = vector.load %arg1[%c0_1, %c0_2] : memref<16x16xf32, #tpu.memory_space<vmem>>, vector<16x16xf32>
    %c0_3 = arith.constant 0 : index
    %c0_4 = arith.constant 0 : index
    %3 = vector.load %arg2[%c0_3, %c0_4] : memref<496x128xf32, #tpu.memory_space<vmem>>, vector<16x32xf32>
    %cst = arith.constant dense<0.000000e+00> : vector<16x32xf32>
    %4 = tpu.matmul %2, %3, %cst {dimension_numbers = #tpu.dot_dimension_numbers<[1], [0], [0], [1], [0, 0, 1, 1], [], []>} : vector<16x16xf32>, vector<16x32xf32>, vector<16x32xf32> -> vector<16x32xf32>
    %5 = arith.addf %4, %1 : vector<16x32xf32>
    %c432 = arith.constant 432 : index
    %c0_5 = arith.constant 0 : index
    %6 = vector.load %arg2[%c432, %c0_5] : memref<496x128xf32, #tpu.memory_space<vmem>>, vector<1x32xf32>
    %c433 = arith.constant 433 : index
    %c0_6 = arith.constant 0 : index
    %7 = vector.load %arg2[%c433, %c0_6] : memref<496x128xf32, #tpu.memory_space<vmem>>, vector<1x32xf32>
    %c434 = arith.constant 434 : index
    %c0_7 = arith.constant 0 : index
    %8 = vector.load %arg2[%c434, %c0_7] : memref<496x128xf32, #tpu.memory_space<vmem>>, vector<1x32xf32>
    %c435 = arith.constant 435 : index
    %c0_8 = arith.constant 0 : index
    %9 = vector.load %arg2[%c435, %c0_8] : memref<496x128xf32, #tpu.memory_space<vmem>>, vector<1x32xf32>
    %c436 = arith.constant 436 : index
    %c0_9 = arith.constant 0 : index
    %10 = vector.load %arg2[%c436, %c0_9] : memref<496x128xf32, #tpu.memory_space<vmem>>, vector<1x64xf32>
    %c437 = arith.constant 437 : index
    %c0_10 = arith.constant 0 : index
    %11 = vector.load %arg2[%c437, %c0_10] : memref<496x128xf32, #tpu.memory_space<vmem>>, vector<1x32xf32>
    %c438 = arith.constant 438 : index
    %c0_11 = arith.constant 0 : index
    %12 = vector.load %arg2[%c438, %c0_11] : memref<496x128xf32, #tpu.memory_space<vmem>>, vector<1x32xf32>
    %c439 = arith.constant 439 : index
    %c0_12 = arith.constant 0 : index
    %13 = vector.load %arg2[%c439, %c0_12] : memref<496x128xf32, #tpu.memory_space<vmem>>, vector<1x96xf32>
    %cst_13 = arith.constant dense<0.000000e+00> : vector<16xf32>
    %14 = vector.multi_reduction <add>, %5, %cst_13 [1] : vector<16x32xf32> to vector<16xf32>
    %15 = vector.shape_cast %14 : vector<16xf32> to vector<16x1xf32>
    %cst_14 = arith.constant 3.200000e+01 : f32
    %16 = vector.broadcast %cst_14 : f32 to vector<16x1xf32>
    %17 = arith.divf %15, %16 : vector<16x1xf32>
    %18 = vector.broadcast %17 : vector<16x1xf32> to vector<16x32xf32>
    %19 = arith.subf %5, %18 : vector<16x32xf32>
    %20 = arith.mulf %19, %19 : vector<16x32xf32>
    %cst_15 = arith.constant dense<0.000000e+00> : vector<16xf32>
    %21 = vector.multi_reduction <add>, %20, %cst_15 [1] : vector<16x32xf32> to vector<16xf32>
    %22 = vector.shape_cast %21 : vector<16xf32> to vector<16x1xf32>
    %cst_16 = arith.constant 3.200000e+01 : f32
    %23 = vector.broadcast %cst_16 : f32 to vector<16x1xf32>
    %24 = arith.divf %22, %23 : vector<16x1xf32>
    %25 = vector.broadcast %17 : vector<16x1xf32> to vector<16x32xf32>
    %26 = arith.subf %5, %25 : vector<16x32xf32>
    %cst_17 = arith.constant 9.99999974E-6 : f32
    %27 = vector.broadcast %cst_17 : f32 to vector<16x1xf32>
    %28 = arith.addf %24, %27 : vector<16x1xf32>
    %29 = math.rsqrt %28 : vector<16x1xf32>
    %30 = vector.broadcast %29 : vector<16x1xf32> to vector<16x32xf32>
    %31 = arith.mulf %26, %30 : vector<16x32xf32>
    %32 = vector.broadcast %6 : vector<1x32xf32> to vector<16x32xf32>
    %33 = arith.mulf %31, %32 : vector<16x32xf32>
    %34 = vector.broadcast %7 : vector<1x32xf32> to vector<16x32xf32>
    %35 = arith.addf %33, %34 : vector<16x32xf32>
    %c16 = arith.constant 16 : index
    %c0_18 = arith.constant 0 : index
    %36 = vector.load %arg2[%c16, %c0_18] : memref<496x128xf32, #tpu.memory_space<vmem>>, vector<32x96xf32>
    %cst_19 = arith.constant dense<0.000000e+00> : vector<16x96xf32>
    %37 = tpu.matmul %35, %36, %cst_19 {dimension_numbers = #tpu.dot_dimension_numbers<[1], [0], [0], [1], [0, 0, 1, 1], [], []>} : vector<16x32xf32>, vector<32x96xf32>, vector<16x96xf32> -> vector<16x96xf32>
    %38 = vector.broadcast %13 : vector<1x96xf32> to vector<16x96xf32>
    %39 = arith.addf %37, %38 : vector<16x96xf32>
    %40 = vector.extract_strided_slice %39 {offsets = [0, 0], sizes = [16, 8], strides = [1, 1]} : vector<16x96xf32> to vector<16x8xf32>
    %41 = vector.extract_strided_slice %39 {offsets = [0, 32], sizes = [16, 8], strides = [1, 1]} : vector<16x96xf32> to vector<16x8xf32>
    %42 = vector.extract_strided_slice %39 {offsets = [0, 64], sizes = [16, 8], strides = [1, 1]} : vector<16x96xf32> to vector<16x8xf32>
    %cst_20 = arith.constant dense<0.000000e+00> : vector<16x16xf32>
    %43 = tpu.matmul %40, %41, %cst_20 {dimension_numbers = #tpu.dot_dimension_numbers<[1], [1], [0], [0], [0, 0, 1, 0], [], []>} : vector<16x8xf32>, vector<16x8xf32>, vector<16x16xf32> -> vector<16x16xf32>
    %44 = arith.addf %43, %0 : vector<16x16xf32>
    %cst_21 = arith.constant dense<0xFF800000> : vector<16xf32>
    %45 = vector.multi_reduction <maximumf>, %44, %cst_21 [1] : vector<16x16xf32> to vector<16xf32>
    %46 = vector.shape_cast %45 : vector<16xf32> to vector<16x1xf32>
    %47 = vector.broadcast %46 : vector<16x1xf32> to vector<16x16xf32>
    %48 = arith.subf %44, %47 : vector<16x16xf32>
    %49 = math.exp %48 : vector<16x16xf32>
    %cst_22 = arith.constant dense<0.000000e+00> : vector<16xf32>
    %50 = vector.multi_reduction <add>, %49, %cst_22 [1] : vector<16x16xf32> to vector<16xf32>
    %51 = vector.shape_cast %50 : vector<16xf32> to vector<16x1xf32>
    %52 = tpu.reciprocal %51 {approx = true} : vector<16x1xf32> -> vector<16x1xf32>
    %53 = vector.broadcast %52 : vector<16x1xf32> to vector<16x16xf32>
    %54 = arith.mulf %49, %53 : vector<16x16xf32>
    %cst_23 = arith.constant dense<0.000000e+00> : vector<16x8xf32>
    %55 = tpu.matmul %54, %42, %cst_23 {dimension_numbers = #tpu.dot_dimension_numbers<[1], [0], [0], [1], [0, 0, 1, 1], [], []>} : vector<16x16xf32>, vector<16x8xf32>, vector<16x8xf32> -> vector<16x8xf32>
    %56 = vector.extract_strided_slice %39 {offsets = [0, 8], sizes = [16, 8], strides = [1, 1]} : vector<16x96xf32> to vector<16x8xf32>
    %57 = vector.extract_strided_slice %39 {offsets = [0, 40], sizes = [16, 8], strides = [1, 1]} : vector<16x96xf32> to vector<16x8xf32>
    %58 = vector.extract_strided_slice %39 {offsets = [0, 72], sizes = [16, 8], strides = [1, 1]} : vector<16x96xf32> to vector<16x8xf32>
    %cst_24 = arith.constant dense<0.000000e+00> : vector<16x16xf32>
    %59 = tpu.matmul %56, %57, %cst_24 {dimension_numbers = #tpu.dot_dimension_numbers<[1], [1], [0], [0], [0, 0, 1, 0], [], []>} : vector<16x8xf32>, vector<16x8xf32>, vector<16x16xf32> -> vector<16x16xf32>
    %60 = arith.addf %59, %0 : vector<16x16xf32>
    %cst_25 = arith.constant dense<0xFF800000> : vector<16xf32>
    %61 = vector.multi_reduction <maximumf>, %60, %cst_25 [1] : vector<16x16xf32> to vector<16xf32>
    %62 = vector.shape_cast %61 : vector<16xf32> to vector<16x1xf32>
    %63 = vector.broadcast %62 : vector<16x1xf32> to vector<16x16xf32>
    %64 = arith.subf %60, %63 : vector<16x16xf32>
    %65 = math.exp %64 : vector<16x16xf32>
    %cst_26 = arith.constant dense<0.000000e+00> : vector<16xf32>
    %66 = vector.multi_reduction <add>, %65, %cst_26 [1] : vector<16x16xf32> to vector<16xf32>
    %67 = vector.shape_cast %66 : vector<16xf32> to vector<16x1xf32>
    %68 = tpu.reciprocal %67 {approx = true} : vector<16x1xf32> -> vector<16x1xf32>
    %69 = vector.broadcast %68 : vector<16x1xf32> to vector<16x16xf32>
    %70 = arith.mulf %65, %69 : vector<16x16xf32>
    %cst_27 = arith.constant dense<0.000000e+00> : vector<16x8xf32>
    %71 = tpu.matmul %70, %58, %cst_27 {dimension_numbers = #tpu.dot_dimension_numbers<[1], [0], [0], [1], [0, 0, 1, 1], [], []>} : vector<16x16xf32>, vector<16x8xf32>, vector<16x8xf32> -> vector<16x8xf32>
    %72 = vector.extract_strided_slice %39 {offsets = [0, 16], sizes = [16, 8], strides = [1, 1]} : vector<16x96xf32> to vector<16x8xf32>
    %73 = vector.extract_strided_slice %39 {offsets = [0, 48], sizes = [16, 8], strides = [1, 1]} : vector<16x96xf32> to vector<16x8xf32>
    %74 = vector.extract_strided_slice %39 {offsets = [0, 80], sizes = [16, 8], strides = [1, 1]} : vector<16x96xf32> to vector<16x8xf32>
    %cst_28 = arith.constant dense<0.000000e+00> : vector<16x16xf32>
    %75 = tpu.matmul %72, %73, %cst_28 {dimension_numbers = #tpu.dot_dimension_numbers<[1], [1], [0], [0], [0, 0, 1, 0], [], []>} : vector<16x8xf32>, vector<16x8xf32>, vector<16x16xf32> -> vector<16x16xf32>
    %76 = arith.addf %75, %0 : vector<16x16xf32>
    %cst_29 = arith.constant dense<0xFF800000> : vector<16xf32>
    %77 = vector.multi_reduction <maximumf>, %76, %cst_29 [1] : vector<16x16xf32> to vector<16xf32>
    %78 = vector.shape_cast %77 : vector<16xf32> to vector<16x1xf32>
    %79 = vector.broadcast %78 : vector<16x1xf32> to vector<16x16xf32>
    %80 = arith.subf %76, %79 : vector<16x16xf32>
    %81 = math.exp %80 : vector<16x16xf32>
    %cst_30 = arith.constant dense<0.000000e+00> : vector<16xf32>
    %82 = vector.multi_reduction <add>, %81, %cst_30 [1] : vector<16x16xf32> to vector<16xf32>
    %83 = vector.shape_cast %82 : vector<16xf32> to vector<16x1xf32>
    %84 = tpu.reciprocal %83 {approx = true} : vector<16x1xf32> -> vector<16x1xf32>
    %85 = vector.broadcast %84 : vector<16x1xf32> to vector<16x16xf32>
    %86 = arith.mulf %81, %85 : vector<16x16xf32>
    %cst_31 = arith.constant dense<0.000000e+00> : vector<16x8xf32>
    %87 = tpu.matmul %86, %74, %cst_31 {dimension_numbers = #tpu.dot_dimension_numbers<[1], [0], [0], [1], [0, 0, 1, 1], [], []>} : vector<16x16xf32>, vector<16x8xf32>, vector<16x8xf32> -> vector<16x8xf32>
    %88 = vector.extract_strided_slice %39 {offsets = [0, 24], sizes = [16, 8], strides = [1, 1]} : vector<16x96xf32> to vector<16x8xf32>
    %89 = vector.extract_strided_slice %39 {offsets = [0, 56], sizes = [16, 8], strides = [1, 1]} : vector<16x96xf32> to vector<16x8xf32>
    %90 = vector.extract_strided_slice %39 {offsets = [0, 88], sizes = [16, 8], strides = [1, 1]} : vector<16x96xf32> to vector<16x8xf32>
    %cst_32 = arith.constant dense<0.000000e+00> : vector<16x16xf32>
    %91 = tpu.matmul %88, %89, %cst_32 {dimension_numbers = #tpu.dot_dimension_numbers<[1], [1], [0], [0], [0, 0, 1, 0], [], []>} : vector<16x8xf32>, vector<16x8xf32>, vector<16x16xf32> -> vector<16x16xf32>
    %92 = arith.addf %91, %0 : vector<16x16xf32>
    %cst_33 = arith.constant dense<0xFF800000> : vector<16xf32>
    %93 = vector.multi_reduction <maximumf>, %92, %cst_33 [1] : vector<16x16xf32> to vector<16xf32>
    %94 = vector.shape_cast %93 : vector<16xf32> to vector<16x1xf32>
    %95 = vector.broadcast %94 : vector<16x1xf32> to vector<16x16xf32>
    %96 = arith.subf %92, %95 : vector<16x16xf32>
    %97 = math.exp %96 : vector<16x16xf32>
    %cst_34 = arith.constant dense<0.000000e+00> : vector<16xf32>
    %98 = vector.multi_reduction <add>, %97, %cst_34 [1] : vector<16x16xf32> to vector<16xf32>
    %99 = vector.shape_cast %98 : vector<16xf32> to vector<16x1xf32>
    %100 = tpu.reciprocal %99 {approx = true} : vector<16x1xf32> -> vector<16x1xf32>
    %101 = vector.broadcast %100 : vector<16x1xf32> to vector<16x16xf32>
    %102 = arith.mulf %97, %101 : vector<16x16xf32>
    %cst_35 = arith.constant dense<0.000000e+00> : vector<16x8xf32>
    %103 = tpu.matmul %102, %90, %cst_35 {dimension_numbers = #tpu.dot_dimension_numbers<[1], [0], [0], [1], [0, 0, 1, 1], [], []>} : vector<16x16xf32>, vector<16x8xf32>, vector<16x8xf32> -> vector<16x8xf32>
    %104 = tpu.concatenate %55, %71, %87, %103 in 1 : vector<16x8xf32>, vector<16x8xf32>, vector<16x8xf32>, vector<16x8xf32> -> vector<16x32xf32>
    %c16_36 = arith.constant 16 : index
    %c96 = arith.constant 96 : index
    %105 = vector.load %arg2[%c16_36, %c96] : memref<496x128xf32, #tpu.memory_space<vmem>>, vector<32x32xf32>
    %cst_37 = arith.constant dense<0.000000e+00> : vector<16x32xf32>
    %106 = tpu.matmul %104, %105, %cst_37 {dimension_numbers = #tpu.dot_dimension_numbers<[1], [0], [0], [1], [0, 0, 1, 1], [], []>} : vector<16x32xf32>, vector<32x32xf32>, vector<16x32xf32> -> vector<16x32xf32>
    %107 = arith.addf %5, %106 : vector<16x32xf32>
    %108 = vector.broadcast %12 : vector<1x32xf32> to vector<16x32xf32>
    %109 = arith.addf %107, %108 : vector<16x32xf32>
    %cst_38 = arith.constant dense<0.000000e+00> : vector<16xf32>
    %110 = vector.multi_reduction <add>, %109, %cst_38 [1] : vector<16x32xf32> to vector<16xf32>
    %111 = vector.shape_cast %110 : vector<16xf32> to vector<16x1xf32>
    %cst_39 = arith.constant 3.200000e+01 : f32
    %112 = vector.broadcast %cst_39 : f32 to vector<16x1xf32>
    %113 = arith.divf %111, %112 : vector<16x1xf32>
    %114 = vector.broadcast %113 : vector<16x1xf32> to vector<16x32xf32>
    %115 = arith.subf %109, %114 : vector<16x32xf32>
    %116 = arith.mulf %115, %115 : vector<16x32xf32>
    %cst_40 = arith.constant dense<0.000000e+00> : vector<16xf32>
    %117 = vector.multi_reduction <add>, %116, %cst_40 [1] : vector<16x32xf32> to vector<16xf32>
    %118 = vector.shape_cast %117 : vector<16xf32> to vector<16x1xf32>
    %cst_41 = arith.constant 3.200000e+01 : f32
    %119 = vector.broadcast %cst_41 : f32 to vector<16x1xf32>
    %120 = arith.divf %118, %119 : vector<16x1xf32>
    %121 = vector.broadcast %113 : vector<16x1xf32> to vector<16x32xf32>
    %122 = arith.subf %109, %121 : vector<16x32xf32>
    %cst_42 = arith.constant 9.99999974E-6 : f32
    %123 = vector.broadcast %cst_42 : f32 to vector<16x1xf32>
    %124 = arith.addf %120, %123 : vector<16x1xf32>
    %125 = math.rsqrt %124 : vector<16x1xf32>
    %126 = vector.broadcast %125 : vector<16x1xf32> to vector<16x32xf32>
    %127 = arith.mulf %122, %126 : vector<16x32xf32>
    %128 = vector.broadcast %8 : vector<1x32xf32> to vector<16x32xf32>
    %129 = arith.mulf %127, %128 : vector<16x32xf32>
    %130 = vector.broadcast %9 : vector<1x32xf32> to vector<16x32xf32>
    %131 = arith.addf %129, %130 : vector<16x32xf32>
    %c112 = arith.constant 112 : index
    %c0_43 = arith.constant 0 : index
    %132 = vector.load %arg2[%c112, %c0_43] : memref<496x128xf32, #tpu.memory_space<vmem>>, vector<32x64xf32>
    %c208 = arith.constant 208 : index
    %c0_44 = arith.constant 0 : index
    %133 = vector.load %arg2[%c208, %c0_44] : memref<496x128xf32, #tpu.memory_space<vmem>>, vector<64x32xf32>
    %cst_45 = arith.constant dense<0.000000e+00> : vector<16x64xf32>
    %134 = tpu.matmul %131, %132, %cst_45 {dimension_numbers = #tpu.dot_dimension_numbers<[1], [0], [0], [1], [0, 0, 1, 1], [], []>} : vector<16x32xf32>, vector<32x64xf32>, vector<16x64xf32> -> vector<16x64xf32>
    %135 = vector.broadcast %10 : vector<1x64xf32> to vector<16x64xf32>
    %136 = arith.addf %134, %135 : vector<16x64xf32>
    %cst_46 = arith.constant 0.000000e+00 : f32
    %137 = vector.broadcast %cst_46 : f32 to vector<16x64xf32>
    %138 = arith.maximumf %136, %137 : vector<16x64xf32>
    %cst_47 = arith.constant dense<0.000000e+00> : vector<16x32xf32>
    %139 = tpu.matmul %138, %133, %cst_47 {dimension_numbers = #tpu.dot_dimension_numbers<[1], [0], [0], [1], [0, 0, 1, 1], [], []>} : vector<16x64xf32>, vector<64x32xf32>, vector<16x32xf32> -> vector<16x32xf32>
    %140 = arith.addf %109, %139 : vector<16x32xf32>
    %141 = vector.broadcast %11 : vector<1x32xf32> to vector<16x32xf32>
    %142 = arith.addf %140, %141 : vector<16x32xf32>
    %c440 = arith.constant 440 : index
    %c0_48 = arith.constant 0 : index
    %143 = vector.load %arg2[%c440, %c0_48] : memref<496x128xf32, #tpu.memory_space<vmem>>, vector<1x32xf32>
    %c441 = arith.constant 441 : index
    %c0_49 = arith.constant 0 : index
    %144 = vector.load %arg2[%c441, %c0_49] : memref<496x128xf32, #tpu.memory_space<vmem>>, vector<1x32xf32>
    %c442 = arith.constant 442 : index
    %c0_50 = arith.constant 0 : index
    %145 = vector.load %arg2[%c442, %c0_50] : memref<496x128xf32, #tpu.memory_space<vmem>>, vector<1x32xf32>
    %c443 = arith.constant 443 : index
    %c0_51 = arith.constant 0 : index
    %146 = vector.load %arg2[%c443, %c0_51] : memref<496x128xf32, #tpu.memory_space<vmem>>, vector<1x32xf32>
    %c444 = arith.constant 444 : index
    %c0_52 = arith.constant 0 : index
    %147 = vector.load %arg2[%c444, %c0_52] : memref<496x128xf32, #tpu.memory_space<vmem>>, vector<1x64xf32>
    %c445 = arith.constant 445 : index
    %c0_53 = arith.constant 0 : index
    %148 = vector.load %arg2[%c445, %c0_53] : memref<496x128xf32, #tpu.memory_space<vmem>>, vector<1x32xf32>
    %c446 = arith.constant 446 : index
    %c0_54 = arith.constant 0 : index
    %149 = vector.load %arg2[%c446, %c0_54] : memref<496x128xf32, #tpu.memory_space<vmem>>, vector<1x32xf32>
    %c447 = arith.constant 447 : index
    %c0_55 = arith.constant 0 : index
    %150 = vector.load %arg2[%c447, %c0_55] : memref<496x128xf32, #tpu.memory_space<vmem>>, vector<1x96xf32>
    %cst_56 = arith.constant dense<0.000000e+00> : vector<16xf32>
    %151 = vector.multi_reduction <add>, %142, %cst_56 [1] : vector<16x32xf32> to vector<16xf32>
    %152 = vector.shape_cast %151 : vector<16xf32> to vector<16x1xf32>
    %cst_57 = arith.constant 3.200000e+01 : f32
    %153 = vector.broadcast %cst_57 : f32 to vector<16x1xf32>
    %154 = arith.divf %152, %153 : vector<16x1xf32>
    %155 = vector.broadcast %154 : vector<16x1xf32> to vector<16x32xf32>
    %156 = arith.subf %142, %155 : vector<16x32xf32>
    %157 = arith.mulf %156, %156 : vector<16x32xf32>
    %cst_58 = arith.constant dense<0.000000e+00> : vector<16xf32>
    %158 = vector.multi_reduction <add>, %157, %cst_58 [1] : vector<16x32xf32> to vector<16xf32>
    %159 = vector.shape_cast %158 : vector<16xf32> to vector<16x1xf32>
    %cst_59 = arith.constant 3.200000e+01 : f32
    %160 = vector.broadcast %cst_59 : f32 to vector<16x1xf32>
    %161 = arith.divf %159, %160 : vector<16x1xf32>
    %162 = vector.broadcast %154 : vector<16x1xf32> to vector<16x32xf32>
    %163 = arith.subf %142, %162 : vector<16x32xf32>
    %cst_60 = arith.constant 9.99999974E-6 : f32
    %164 = vector.broadcast %cst_60 : f32 to vector<16x1xf32>
    %165 = arith.addf %161, %164 : vector<16x1xf32>
    %166 = math.rsqrt %165 : vector<16x1xf32>
    %167 = vector.broadcast %166 : vector<16x1xf32> to vector<16x32xf32>
    %168 = arith.mulf %163, %167 : vector<16x32xf32>
    %169 = vector.broadcast %143 : vector<1x32xf32> to vector<16x32xf32>
    %170 = arith.mulf %168, %169 : vector<16x32xf32>
    %171 = vector.broadcast %144 : vector<1x32xf32> to vector<16x32xf32>
    %172 = arith.addf %170, %171 : vector<16x32xf32>
    %c48 = arith.constant 48 : index
    %c0_61 = arith.constant 0 : index
    %173 = vector.load %arg2[%c48, %c0_61] : memref<496x128xf32, #tpu.memory_space<vmem>>, vector<32x96xf32>
    %cst_62 = arith.constant dense<0.000000e+00> : vector<16x96xf32>
    %174 = tpu.matmul %172, %173, %cst_62 {dimension_numbers = #tpu.dot_dimension_numbers<[1], [0], [0], [1], [0, 0, 1, 1], [], []>} : vector<16x32xf32>, vector<32x96xf32>, vector<16x96xf32> -> vector<16x96xf32>
    %175 = vector.broadcast %150 : vector<1x96xf32> to vector<16x96xf32>
    %176 = arith.addf %174, %175 : vector<16x96xf32>
    %177 = vector.extract_strided_slice %176 {offsets = [0, 0], sizes = [16, 8], strides = [1, 1]} : vector<16x96xf32> to vector<16x8xf32>
    %178 = vector.extract_strided_slice %176 {offsets = [0, 32], sizes = [16, 8], strides = [1, 1]} : vector<16x96xf32> to vector<16x8xf32>
    %179 = vector.extract_strided_slice %176 {offsets = [0, 64], sizes = [16, 8], strides = [1, 1]} : vector<16x96xf32> to vector<16x8xf32>
    %cst_63 = arith.constant dense<0.000000e+00> : vector<16x16xf32>
    %180 = tpu.matmul %177, %178, %cst_63 {dimension_numbers = #tpu.dot_dimension_numbers<[1], [1], [0], [0], [0, 0, 1, 0], [], []>} : vector<16x8xf32>, vector<16x8xf32>, vector<16x16xf32> -> vector<16x16xf32>
    %181 = arith.addf %180, %0 : vector<16x16xf32>
    %cst_64 = arith.constant dense<0xFF800000> : vector<16xf32>
    %182 = vector.multi_reduction <maximumf>, %181, %cst_64 [1] : vector<16x16xf32> to vector<16xf32>
    %183 = vector.shape_cast %182 : vector<16xf32> to vector<16x1xf32>
    %184 = vector.broadcast %183 : vector<16x1xf32> to vector<16x16xf32>
    %185 = arith.subf %181, %184 : vector<16x16xf32>
    %186 = math.exp %185 : vector<16x16xf32>
    %cst_65 = arith.constant dense<0.000000e+00> : vector<16xf32>
    %187 = vector.multi_reduction <add>, %186, %cst_65 [1] : vector<16x16xf32> to vector<16xf32>
    %188 = vector.shape_cast %187 : vector<16xf32> to vector<16x1xf32>
    %189 = tpu.reciprocal %188 {approx = true} : vector<16x1xf32> -> vector<16x1xf32>
    %190 = vector.broadcast %189 : vector<16x1xf32> to vector<16x16xf32>
    %191 = arith.mulf %186, %190 : vector<16x16xf32>
    %cst_66 = arith.constant dense<0.000000e+00> : vector<16x8xf32>
    %192 = tpu.matmul %191, %179, %cst_66 {dimension_numbers = #tpu.dot_dimension_numbers<[1], [0], [0], [1], [0, 0, 1, 1], [], []>} : vector<16x16xf32>, vector<16x8xf32>, vector<16x8xf32> -> vector<16x8xf32>
    %193 = vector.extract_strided_slice %176 {offsets = [0, 8], sizes = [16, 8], strides = [1, 1]} : vector<16x96xf32> to vector<16x8xf32>
    %194 = vector.extract_strided_slice %176 {offsets = [0, 40], sizes = [16, 8], strides = [1, 1]} : vector<16x96xf32> to vector<16x8xf32>
    %195 = vector.extract_strided_slice %176 {offsets = [0, 72], sizes = [16, 8], strides = [1, 1]} : vector<16x96xf32> to vector<16x8xf32>
    %cst_67 = arith.constant dense<0.000000e+00> : vector<16x16xf32>
    %196 = tpu.matmul %193, %194, %cst_67 {dimension_numbers = #tpu.dot_dimension_numbers<[1], [1], [0], [0], [0, 0, 1, 0], [], []>} : vector<16x8xf32>, vector<16x8xf32>, vector<16x16xf32> -> vector<16x16xf32>
    %197 = arith.addf %196, %0 : vector<16x16xf32>
    %cst_68 = arith.constant dense<0xFF800000> : vector<16xf32>
    %198 = vector.multi_reduction <maximumf>, %197, %cst_68 [1] : vector<16x16xf32> to vector<16xf32>
    %199 = vector.shape_cast %198 : vector<16xf32> to vector<16x1xf32>
    %200 = vector.broadcast %199 : vector<16x1xf32> to vector<16x16xf32>
    %201 = arith.subf %197, %200 : vector<16x16xf32>
    %202 = math.exp %201 : vector<16x16xf32>
    %cst_69 = arith.constant dense<0.000000e+00> : vector<16xf32>
    %203 = vector.multi_reduction <add>, %202, %cst_69 [1] : vector<16x16xf32> to vector<16xf32>
    %204 = vector.shape_cast %203 : vector<16xf32> to vector<16x1xf32>
    %205 = tpu.reciprocal %204 {approx = true} : vector<16x1xf32> -> vector<16x1xf32>
    %206 = vector.broadcast %205 : vector<16x1xf32> to vector<16x16xf32>
    %207 = arith.mulf %202, %206 : vector<16x16xf32>
    %cst_70 = arith.constant dense<0.000000e+00> : vector<16x8xf32>
    %208 = tpu.matmul %207, %195, %cst_70 {dimension_numbers = #tpu.dot_dimension_numbers<[1], [0], [0], [1], [0, 0, 1, 1], [], []>} : vector<16x16xf32>, vector<16x8xf32>, vector<16x8xf32> -> vector<16x8xf32>
    %209 = vector.extract_strided_slice %176 {offsets = [0, 16], sizes = [16, 8], strides = [1, 1]} : vector<16x96xf32> to vector<16x8xf32>
    %210 = vector.extract_strided_slice %176 {offsets = [0, 48], sizes = [16, 8], strides = [1, 1]} : vector<16x96xf32> to vector<16x8xf32>
    %211 = vector.extract_strided_slice %176 {offsets = [0, 80], sizes = [16, 8], strides = [1, 1]} : vector<16x96xf32> to vector<16x8xf32>
    %cst_71 = arith.constant dense<0.000000e+00> : vector<16x16xf32>
    %212 = tpu.matmul %209, %210, %cst_71 {dimension_numbers = #tpu.dot_dimension_numbers<[1], [1], [0], [0], [0, 0, 1, 0], [], []>} : vector<16x8xf32>, vector<16x8xf32>, vector<16x16xf32> -> vector<16x16xf32>
    %213 = arith.addf %212, %0 : vector<16x16xf32>
    %cst_72 = arith.constant dense<0xFF800000> : vector<16xf32>
    %214 = vector.multi_reduction <maximumf>, %213, %cst_72 [1] : vector<16x16xf32> to vector<16xf32>
    %215 = vector.shape_cast %214 : vector<16xf32> to vector<16x1xf32>
    %216 = vector.broadcast %215 : vector<16x1xf32> to vector<16x16xf32>
    %217 = arith.subf %213, %216 : vector<16x16xf32>
    %218 = math.exp %217 : vector<16x16xf32>
    %cst_73 = arith.constant dense<0.000000e+00> : vector<16xf32>
    %219 = vector.multi_reduction <add>, %218, %cst_73 [1] : vector<16x16xf32> to vector<16xf32>
    %220 = vector.shape_cast %219 : vector<16xf32> to vector<16x1xf32>
    %221 = tpu.reciprocal %220 {approx = true} : vector<16x1xf32> -> vector<16x1xf32>
    %222 = vector.broadcast %221 : vector<16x1xf32> to vector<16x16xf32>
    %223 = arith.mulf %218, %222 : vector<16x16xf32>
    %cst_74 = arith.constant dense<0.000000e+00> : vector<16x8xf32>
    %224 = tpu.matmul %223, %211, %cst_74 {dimension_numbers = #tpu.dot_dimension_numbers<[1], [0], [0], [1], [0, 0, 1, 1], [], []>} : vector<16x16xf32>, vector<16x8xf32>, vector<16x8xf32> -> vector<16x8xf32>
    %225 = vector.extract_strided_slice %176 {offsets = [0, 24], sizes = [16, 8], strides = [1, 1]} : vector<16x96xf32> to vector<16x8xf32>
    %226 = vector.extract_strided_slice %176 {offsets = [0, 56], sizes = [16, 8], strides = [1, 1]} : vector<16x96xf32> to vector<16x8xf32>
    %227 = vector.extract_strided_slice %176 {offsets = [0, 88], sizes = [16, 8], strides = [1, 1]} : vector<16x96xf32> to vector<16x8xf32>
    %cst_75 = arith.constant dense<0.000000e+00> : vector<16x16xf32>
    %228 = tpu.matmul %225, %226, %cst_75 {dimension_numbers = #tpu.dot_dimension_numbers<[1], [1], [0], [0], [0, 0, 1, 0], [], []>} : vector<16x8xf32>, vector<16x8xf32>, vector<16x16xf32> -> vector<16x16xf32>
    %229 = arith.addf %228, %0 : vector<16x16xf32>
    %cst_76 = arith.constant dense<0xFF800000> : vector<16xf32>
    %230 = vector.multi_reduction <maximumf>, %229, %cst_76 [1] : vector<16x16xf32> to vector<16xf32>
    %231 = vector.shape_cast %230 : vector<16xf32> to vector<16x1xf32>
    %232 = vector.broadcast %231 : vector<16x1xf32> to vector<16x16xf32>
    %233 = arith.subf %229, %232 : vector<16x16xf32>
    %234 = math.exp %233 : vector<16x16xf32>
    %cst_77 = arith.constant dense<0.000000e+00> : vector<16xf32>
    %235 = vector.multi_reduction <add>, %234, %cst_77 [1] : vector<16x16xf32> to vector<16xf32>
    %236 = vector.shape_cast %235 : vector<16xf32> to vector<16x1xf32>
    %237 = tpu.reciprocal %236 {approx = true} : vector<16x1xf32> -> vector<16x1xf32>
    %238 = vector.broadcast %237 : vector<16x1xf32> to vector<16x16xf32>
    %239 = arith.mulf %234, %238 : vector<16x16xf32>
    %cst_78 = arith.constant dense<0.000000e+00> : vector<16x8xf32>
    %240 = tpu.matmul %239, %227, %cst_78 {dimension_numbers = #tpu.dot_dimension_numbers<[1], [0], [0], [1], [0, 0, 1, 1], [], []>} : vector<16x16xf32>, vector<16x8xf32>, vector<16x8xf32> -> vector<16x8xf32>
    %241 = tpu.concatenate %192, %208, %224, %240 in 1 : vector<16x8xf32>, vector<16x8xf32>, vector<16x8xf32>, vector<16x8xf32> -> vector<16x32xf32>
    %c48_79 = arith.constant 48 : index
    %c96_80 = arith.constant 96 : index
    %242 = vector.load %arg2[%c48_79, %c96_80] : memref<496x128xf32, #tpu.memory_space<vmem>>, vector<32x32xf32>
    %cst_81 = arith.constant dense<0.000000e+00> : vector<16x32xf32>
    %243 = tpu.matmul %241, %242, %cst_81 {dimension_numbers = #tpu.dot_dimension_numbers<[1], [0], [0], [1], [0, 0, 1, 1], [], []>} : vector<16x32xf32>, vector<32x32xf32>, vector<16x32xf32> -> vector<16x32xf32>
    %244 = arith.addf %142, %243 : vector<16x32xf32>
    %245 = vector.broadcast %149 : vector<1x32xf32> to vector<16x32xf32>
    %246 = arith.addf %244, %245 : vector<16x32xf32>
    %cst_82 = arith.constant dense<0.000000e+00> : vector<16xf32>
    %247 = vector.multi_reduction <add>, %246, %cst_82 [1] : vector<16x32xf32> to vector<16xf32>
    %248 = vector.shape_cast %247 : vector<16xf32> to vector<16x1xf32>
    %cst_83 = arith.constant 3.200000e+01 : f32
    %249 = vector.broadcast %cst_83 : f32 to vector<16x1xf32>
    %250 = arith.divf %248, %249 : vector<16x1xf32>
    %251 = vector.broadcast %250 : vector<16x1xf32> to vector<16x32xf32>
    %252 = arith.subf %246, %251 : vector<16x32xf32>
    %253 = arith.mulf %252, %252 : vector<16x32xf32>
    %cst_84 = arith.constant dense<0.000000e+00> : vector<16xf32>
    %254 = vector.multi_reduction <add>, %253, %cst_84 [1] : vector<16x32xf32> to vector<16xf32>
    %255 = vector.shape_cast %254 : vector<16xf32> to vector<16x1xf32>
    %cst_85 = arith.constant 3.200000e+01 : f32
    %256 = vector.broadcast %cst_85 : f32 to vector<16x1xf32>
    %257 = arith.divf %255, %256 : vector<16x1xf32>
    %258 = vector.broadcast %250 : vector<16x1xf32> to vector<16x32xf32>
    %259 = arith.subf %246, %258 : vector<16x32xf32>
    %cst_86 = arith.constant 9.99999974E-6 : f32
    %260 = vector.broadcast %cst_86 : f32 to vector<16x1xf32>
    %261 = arith.addf %257, %260 : vector<16x1xf32>
    %262 = math.rsqrt %261 : vector<16x1xf32>
    %263 = vector.broadcast %262 : vector<16x1xf32> to vector<16x32xf32>
    %264 = arith.mulf %259, %263 : vector<16x32xf32>
    %265 = vector.broadcast %145 : vector<1x32xf32> to vector<16x32xf32>
    %266 = arith.mulf %264, %265 : vector<16x32xf32>
    %267 = vector.broadcast %146 : vector<1x32xf32> to vector<16x32xf32>
    %268 = arith.addf %266, %267 : vector<16x32xf32>
    %c144 = arith.constant 144 : index
    %c0_87 = arith.constant 0 : index
    %269 = vector.load %arg2[%c144, %c0_87] : memref<496x128xf32, #tpu.memory_space<vmem>>, vector<32x64xf32>
    %c272 = arith.constant 272 : index
    %c0_88 = arith.constant 0 : index
    %270 = vector.load %arg2[%c272, %c0_88] : memref<496x128xf32, #tpu.memory_space<vmem>>, vector<64x32xf32>
    %cst_89 = arith.constant dense<0.000000e+00> : vector<16x64xf32>
    %271 = tpu.matmul %268, %269, %cst_89 {dimension_numbers = #tpu.dot_dimension_numbers<[1], [0], [0], [1], [0, 0, 1, 1], [], []>} : vector<16x32xf32>, vector<32x64xf32>, vector<16x64xf32> -> vector<16x64xf32>
    %272 = vector.broadcast %147 : vector<1x64xf32> to vector<16x64xf32>
    %273 = arith.addf %271, %272 : vector<16x64xf32>
    %cst_90 = arith.constant 0.000000e+00 : f32
    %274 = vector.broadcast %cst_90 : f32 to vector<16x64xf32>
    %275 = arith.maximumf %273, %274 : vector<16x64xf32>
    %cst_91 = arith.constant dense<0.000000e+00> : vector<16x32xf32>
    %276 = tpu.matmul %275, %270, %cst_91 {dimension_numbers = #tpu.dot_dimension_numbers<[1], [0], [0], [1], [0, 0, 1, 1], [], []>} : vector<16x64xf32>, vector<64x32xf32>, vector<16x32xf32> -> vector<16x32xf32>
    %277 = arith.addf %246, %276 : vector<16x32xf32>
    %278 = vector.broadcast %148 : vector<1x32xf32> to vector<16x32xf32>
    %279 = arith.addf %277, %278 : vector<16x32xf32>
    %c448 = arith.constant 448 : index
    %c0_92 = arith.constant 0 : index
    %280 = vector.load %arg2[%c448, %c0_92] : memref<496x128xf32, #tpu.memory_space<vmem>>, vector<1x32xf32>
    %c449 = arith.constant 449 : index
    %c0_93 = arith.constant 0 : index
    %281 = vector.load %arg2[%c449, %c0_93] : memref<496x128xf32, #tpu.memory_space<vmem>>, vector<1x32xf32>
    %c450 = arith.constant 450 : index
    %c0_94 = arith.constant 0 : index
    %282 = vector.load %arg2[%c450, %c0_94] : memref<496x128xf32, #tpu.memory_space<vmem>>, vector<1x32xf32>
    %c451 = arith.constant 451 : index
    %c0_95 = arith.constant 0 : index
    %283 = vector.load %arg2[%c451, %c0_95] : memref<496x128xf32, #tpu.memory_space<vmem>>, vector<1x32xf32>
    %c452 = arith.constant 452 : index
    %c0_96 = arith.constant 0 : index
    %284 = vector.load %arg2[%c452, %c0_96] : memref<496x128xf32, #tpu.memory_space<vmem>>, vector<1x64xf32>
    %c453 = arith.constant 453 : index
    %c0_97 = arith.constant 0 : index
    %285 = vector.load %arg2[%c453, %c0_97] : memref<496x128xf32, #tpu.memory_space<vmem>>, vector<1x32xf32>
    %c454 = arith.constant 454 : index
    %c0_98 = arith.constant 0 : index
    %286 = vector.load %arg2[%c454, %c0_98] : memref<496x128xf32, #tpu.memory_space<vmem>>, vector<1x32xf32>
    %c455 = arith.constant 455 : index
    %c0_99 = arith.constant 0 : index
    %287 = vector.load %arg2[%c455, %c0_99] : memref<496x128xf32, #tpu.memory_space<vmem>>, vector<1x96xf32>
    %cst_100 = arith.constant dense<0.000000e+00> : vector<16xf32>
    %288 = vector.multi_reduction <add>, %279, %cst_100 [1] : vector<16x32xf32> to vector<16xf32>
    %289 = vector.shape_cast %288 : vector<16xf32> to vector<16x1xf32>
    %cst_101 = arith.constant 3.200000e+01 : f32
    %290 = vector.broadcast %cst_101 : f32 to vector<16x1xf32>
    %291 = arith.divf %289, %290 : vector<16x1xf32>
    %292 = vector.broadcast %291 : vector<16x1xf32> to vector<16x32xf32>
    %293 = arith.subf %279, %292 : vector<16x32xf32>
    %294 = arith.mulf %293, %293 : vector<16x32xf32>
    %cst_102 = arith.constant dense<0.000000e+00> : vector<16xf32>
    %295 = vector.multi_reduction <add>, %294, %cst_102 [1] : vector<16x32xf32> to vector<16xf32>
    %296 = vector.shape_cast %295 : vector<16xf32> to vector<16x1xf32>
    %cst_103 = arith.constant 3.200000e+01 : f32
    %297 = vector.broadcast %cst_103 : f32 to vector<16x1xf32>
    %298 = arith.divf %296, %297 : vector<16x1xf32>
    %299 = vector.broadcast %291 : vector<16x1xf32> to vector<16x32xf32>
    %300 = arith.subf %279, %299 : vector<16x32xf32>
    %cst_104 = arith.constant 9.99999974E-6 : f32
    %301 = vector.broadcast %cst_104 : f32 to vector<16x1xf32>
    %302 = arith.addf %298, %301 : vector<16x1xf32>
    %303 = math.rsqrt %302 : vector<16x1xf32>
    %304 = vector.broadcast %303 : vector<16x1xf32> to vector<16x32xf32>
    %305 = arith.mulf %300, %304 : vector<16x32xf32>
    %306 = vector.broadcast %280 : vector<1x32xf32> to vector<16x32xf32>
    %307 = arith.mulf %305, %306 : vector<16x32xf32>
    %308 = vector.broadcast %281 : vector<1x32xf32> to vector<16x32xf32>
    %309 = arith.addf %307, %308 : vector<16x32xf32>
    %c80 = arith.constant 80 : index
    %c0_105 = arith.constant 0 : index
    %310 = vector.load %arg2[%c80, %c0_105] : memref<496x128xf32, #tpu.memory_space<vmem>>, vector<32x96xf32>
    %cst_106 = arith.constant dense<0.000000e+00> : vector<16x96xf32>
    %311 = tpu.matmul %309, %310, %cst_106 {dimension_numbers = #tpu.dot_dimension_numbers<[1], [0], [0], [1], [0, 0, 1, 1], [], []>} : vector<16x32xf32>, vector<32x96xf32>, vector<16x96xf32> -> vector<16x96xf32>
    %312 = vector.broadcast %287 : vector<1x96xf32> to vector<16x96xf32>
    %313 = arith.addf %311, %312 : vector<16x96xf32>
    %314 = vector.extract_strided_slice %313 {offsets = [0, 0], sizes = [16, 8], strides = [1, 1]} : vector<16x96xf32> to vector<16x8xf32>
    %315 = vector.extract_strided_slice %313 {offsets = [0, 32], sizes = [16, 8], strides = [1, 1]} : vector<16x96xf32> to vector<16x8xf32>
    %316 = vector.extract_strided_slice %313 {offsets = [0, 64], sizes = [16, 8], strides = [1, 1]} : vector<16x96xf32> to vector<16x8xf32>
    %cst_107 = arith.constant dense<0.000000e+00> : vector<16x16xf32>
    %317 = tpu.matmul %314, %315, %cst_107 {dimension_numbers = #tpu.dot_dimension_numbers<[1], [1], [0], [0], [0, 0, 1, 0], [], []>} : vector<16x8xf32>, vector<16x8xf32>, vector<16x16xf32> -> vector<16x16xf32>
    %318 = arith.addf %317, %0 : vector<16x16xf32>
    %cst_108 = arith.constant dense<0xFF800000> : vector<16xf32>
    %319 = vector.multi_reduction <maximumf>, %318, %cst_108 [1] : vector<16x16xf32> to vector<16xf32>
    %320 = vector.shape_cast %319 : vector<16xf32> to vector<16x1xf32>
    %321 = vector.broadcast %320 : vector<16x1xf32> to vector<16x16xf32>
    %322 = arith.subf %318, %321 : vector<16x16xf32>
    %323 = math.exp %322 : vector<16x16xf32>
    %cst_109 = arith.constant dense<0.000000e+00> : vector<16xf32>
    %324 = vector.multi_reduction <add>, %323, %cst_109 [1] : vector<16x16xf32> to vector<16xf32>
    %325 = vector.shape_cast %324 : vector<16xf32> to vector<16x1xf32>
    %326 = tpu.reciprocal %325 {approx = true} : vector<16x1xf32> -> vector<16x1xf32>
    %327 = vector.broadcast %326 : vector<16x1xf32> to vector<16x16xf32>
    %328 = arith.mulf %323, %327 : vector<16x16xf32>
    %cst_110 = arith.constant dense<0.000000e+00> : vector<16x8xf32>
    %329 = tpu.matmul %328, %316, %cst_110 {dimension_numbers = #tpu.dot_dimension_numbers<[1], [0], [0], [1], [0, 0, 1, 1], [], []>} : vector<16x16xf32>, vector<16x8xf32>, vector<16x8xf32> -> vector<16x8xf32>
    %330 = vector.extract_strided_slice %313 {offsets = [0, 8], sizes = [16, 8], strides = [1, 1]} : vector<16x96xf32> to vector<16x8xf32>
    %331 = vector.extract_strided_slice %313 {offsets = [0, 40], sizes = [16, 8], strides = [1, 1]} : vector<16x96xf32> to vector<16x8xf32>
    %332 = vector.extract_strided_slice %313 {offsets = [0, 72], sizes = [16, 8], strides = [1, 1]} : vector<16x96xf32> to vector<16x8xf32>
    %cst_111 = arith.constant dense<0.000000e+00> : vector<16x16xf32>
    %333 = tpu.matmul %330, %331, %cst_111 {dimension_numbers = #tpu.dot_dimension_numbers<[1], [1], [0], [0], [0, 0, 1, 0], [], []>} : vector<16x8xf32>, vector<16x8xf32>, vector<16x16xf32> -> vector<16x16xf32>
    %334 = arith.addf %333, %0 : vector<16x16xf32>
    %cst_112 = arith.constant dense<0xFF800000> : vector<16xf32>
    %335 = vector.multi_reduction <maximumf>, %334, %cst_112 [1] : vector<16x16xf32> to vector<16xf32>
    %336 = vector.shape_cast %335 : vector<16xf32> to vector<16x1xf32>
    %337 = vector.broadcast %336 : vector<16x1xf32> to vector<16x16xf32>
    %338 = arith.subf %334, %337 : vector<16x16xf32>
    %339 = math.exp %338 : vector<16x16xf32>
    %cst_113 = arith.constant dense<0.000000e+00> : vector<16xf32>
    %340 = vector.multi_reduction <add>, %339, %cst_113 [1] : vector<16x16xf32> to vector<16xf32>
    %341 = vector.shape_cast %340 : vector<16xf32> to vector<16x1xf32>
    %342 = tpu.reciprocal %341 {approx = true} : vector<16x1xf32> -> vector<16x1xf32>
    %343 = vector.broadcast %342 : vector<16x1xf32> to vector<16x16xf32>
    %344 = arith.mulf %339, %343 : vector<16x16xf32>
    %cst_114 = arith.constant dense<0.000000e+00> : vector<16x8xf32>
    %345 = tpu.matmul %344, %332, %cst_114 {dimension_numbers = #tpu.dot_dimension_numbers<[1], [0], [0], [1], [0, 0, 1, 1], [], []>} : vector<16x16xf32>, vector<16x8xf32>, vector<16x8xf32> -> vector<16x8xf32>
    %346 = vector.extract_strided_slice %313 {offsets = [0, 16], sizes = [16, 8], strides = [1, 1]} : vector<16x96xf32> to vector<16x8xf32>
    %347 = vector.extract_strided_slice %313 {offsets = [0, 48], sizes = [16, 8], strides = [1, 1]} : vector<16x96xf32> to vector<16x8xf32>
    %348 = vector.extract_strided_slice %313 {offsets = [0, 80], sizes = [16, 8], strides = [1, 1]} : vector<16x96xf32> to vector<16x8xf32>
    %cst_115 = arith.constant dense<0.000000e+00> : vector<16x16xf32>
    %349 = tpu.matmul %346, %347, %cst_115 {dimension_numbers = #tpu.dot_dimension_numbers<[1], [1], [0], [0], [0, 0, 1, 0], [], []>} : vector<16x8xf32>, vector<16x8xf32>, vector<16x16xf32> -> vector<16x16xf32>
    %350 = arith.addf %349, %0 : vector<16x16xf32>
    %cst_116 = arith.constant dense<0xFF800000> : vector<16xf32>
    %351 = vector.multi_reduction <maximumf>, %350, %cst_116 [1] : vector<16x16xf32> to vector<16xf32>
    %352 = vector.shape_cast %351 : vector<16xf32> to vector<16x1xf32>
    %353 = vector.broadcast %352 : vector<16x1xf32> to vector<16x16xf32>
    %354 = arith.subf %350, %353 : vector<16x16xf32>
    %355 = math.exp %354 : vector<16x16xf32>
    %cst_117 = arith.constant dense<0.000000e+00> : vector<16xf32>
    %356 = vector.multi_reduction <add>, %355, %cst_117 [1] : vector<16x16xf32> to vector<16xf32>
    %357 = vector.shape_cast %356 : vector<16xf32> to vector<16x1xf32>
    %358 = tpu.reciprocal %357 {approx = true} : vector<16x1xf32> -> vector<16x1xf32>
    %359 = vector.broadcast %358 : vector<16x1xf32> to vector<16x16xf32>
    %360 = arith.mulf %355, %359 : vector<16x16xf32>
    %cst_118 = arith.constant dense<0.000000e+00> : vector<16x8xf32>
    %361 = tpu.matmul %360, %348, %cst_118 {dimension_numbers = #tpu.dot_dimension_numbers<[1], [0], [0], [1], [0, 0, 1, 1], [], []>} : vector<16x16xf32>, vector<16x8xf32>, vector<16x8xf32> -> vector<16x8xf32>
    %362 = vector.extract_strided_slice %313 {offsets = [0, 24], sizes = [16, 8], strides = [1, 1]} : vector<16x96xf32> to vector<16x8xf32>
    %363 = vector.extract_strided_slice %313 {offsets = [0, 56], sizes = [16, 8], strides = [1, 1]} : vector<16x96xf32> to vector<16x8xf32>
    %364 = vector.extract_strided_slice %313 {offsets = [0, 88], sizes = [16, 8], strides = [1, 1]} : vector<16x96xf32> to vector<16x8xf32>
    %cst_119 = arith.constant dense<0.000000e+00> : vector<16x16xf32>
    %365 = tpu.matmul %362, %363, %cst_119 {dimension_numbers = #tpu.dot_dimension_numbers<[1], [1], [0], [0], [0, 0, 1, 0], [], []>} : vector<16x8xf32>, vector<16x8xf32>, vector<16x16xf32> -> vector<16x16xf32>
    %366 = arith.addf %365, %0 : vector<16x16xf32>
    %cst_120 = arith.constant dense<0xFF800000> : vector<16xf32>
    %367 = vector.multi_reduction <maximumf>, %366, %cst_120 [1] : vector<16x16xf32> to vector<16xf32>
    %368 = vector.shape_cast %367 : vector<16xf32> to vector<16x1xf32>
    %369 = vector.broadcast %368 : vector<16x1xf32> to vector<16x16xf32>
    %370 = arith.subf %366, %369 : vector<16x16xf32>
    %371 = math.exp %370 : vector<16x16xf32>
    %cst_121 = arith.constant dense<0.000000e+00> : vector<16xf32>
    %372 = vector.multi_reduction <add>, %371, %cst_121 [1] : vector<16x16xf32> to vector<16xf32>
    %373 = vector.shape_cast %372 : vector<16xf32> to vector<16x1xf32>
    %374 = tpu.reciprocal %373 {approx = true} : vector<16x1xf32> -> vector<16x1xf32>
    %375 = vector.broadcast %374 : vector<16x1xf32> to vector<16x16xf32>
    %376 = arith.mulf %371, %375 : vector<16x16xf32>
    %cst_122 = arith.constant dense<0.000000e+00> : vector<16x8xf32>
    %377 = tpu.matmul %376, %364, %cst_122 {dimension_numbers = #tpu.dot_dimension_numbers<[1], [0], [0], [1], [0, 0, 1, 1], [], []>} : vector<16x16xf32>, vector<16x8xf32>, vector<16x8xf32> -> vector<16x8xf32>
    %378 = tpu.concatenate %329, %345, %361, %377 in 1 : vector<16x8xf32>, vector<16x8xf32>, vector<16x8xf32>, vector<16x8xf32> -> vector<16x32xf32>
    %c80_123 = arith.constant 80 : index
    %c96_124 = arith.constant 96 : index
    %379 = vector.load %arg2[%c80_123, %c96_124] : memref<496x128xf32, #tpu.memory_space<vmem>>, vector<32x32xf32>
    %cst_125 = arith.constant dense<0.000000e+00> : vector<16x32xf32>
    %380 = tpu.matmul %378, %379, %cst_125 {dimension_numbers = #tpu.dot_dimension_numbers<[1], [0], [0], [1], [0, 0, 1, 1], [], []>} : vector<16x32xf32>, vector<32x32xf32>, vector<16x32xf32> -> vector<16x32xf32>
    %381 = arith.addf %279, %380 : vector<16x32xf32>
    %382 = vector.broadcast %286 : vector<1x32xf32> to vector<16x32xf32>
    %383 = arith.addf %381, %382 : vector<16x32xf32>
    %cst_126 = arith.constant dense<0.000000e+00> : vector<16xf32>
    %384 = vector.multi_reduction <add>, %383, %cst_126 [1] : vector<16x32xf32> to vector<16xf32>
    %385 = vector.shape_cast %384 : vector<16xf32> to vector<16x1xf32>
    %cst_127 = arith.constant 3.200000e+01 : f32
    %386 = vector.broadcast %cst_127 : f32 to vector<16x1xf32>
    %387 = arith.divf %385, %386 : vector<16x1xf32>
    %388 = vector.broadcast %387 : vector<16x1xf32> to vector<16x32xf32>
    %389 = arith.subf %383, %388 : vector<16x32xf32>
    %390 = arith.mulf %389, %389 : vector<16x32xf32>
    %cst_128 = arith.constant dense<0.000000e+00> : vector<16xf32>
    %391 = vector.multi_reduction <add>, %390, %cst_128 [1] : vector<16x32xf32> to vector<16xf32>
    %392 = vector.shape_cast %391 : vector<16xf32> to vector<16x1xf32>
    %cst_129 = arith.constant 3.200000e+01 : f32
    %393 = vector.broadcast %cst_129 : f32 to vector<16x1xf32>
    %394 = arith.divf %392, %393 : vector<16x1xf32>
    %395 = vector.broadcast %387 : vector<16x1xf32> to vector<16x32xf32>
    %396 = arith.subf %383, %395 : vector<16x32xf32>
    %cst_130 = arith.constant 9.99999974E-6 : f32
    %397 = vector.broadcast %cst_130 : f32 to vector<16x1xf32>
    %398 = arith.addf %394, %397 : vector<16x1xf32>
    %399 = math.rsqrt %398 : vector<16x1xf32>
    %400 = vector.broadcast %399 : vector<16x1xf32> to vector<16x32xf32>
    %401 = arith.mulf %396, %400 : vector<16x32xf32>
    %402 = vector.broadcast %282 : vector<1x32xf32> to vector<16x32xf32>
    %403 = arith.mulf %401, %402 : vector<16x32xf32>
    %404 = vector.broadcast %283 : vector<1x32xf32> to vector<16x32xf32>
    %405 = arith.addf %403, %404 : vector<16x32xf32>
    %c176 = arith.constant 176 : index
    %c0_131 = arith.constant 0 : index
    %406 = vector.load %arg2[%c176, %c0_131] : memref<496x128xf32, #tpu.memory_space<vmem>>, vector<32x64xf32>
    %c336 = arith.constant 336 : index
    %c0_132 = arith.constant 0 : index
    %407 = vector.load %arg2[%c336, %c0_132] : memref<496x128xf32, #tpu.memory_space<vmem>>, vector<64x32xf32>
    %cst_133 = arith.constant dense<0.000000e+00> : vector<16x64xf32>
    %408 = tpu.matmul %405, %406, %cst_133 {dimension_numbers = #tpu.dot_dimension_numbers<[1], [0], [0], [1], [0, 0, 1, 1], [], []>} : vector<16x32xf32>, vector<32x64xf32>, vector<16x64xf32> -> vector<16x64xf32>
    %409 = vector.broadcast %284 : vector<1x64xf32> to vector<16x64xf32>
    %410 = arith.addf %408, %409 : vector<16x64xf32>
    %cst_134 = arith.constant 0.000000e+00 : f32
    %411 = vector.broadcast %cst_134 : f32 to vector<16x64xf32>
    %412 = arith.maximumf %410, %411 : vector<16x64xf32>
    %cst_135 = arith.constant dense<0.000000e+00> : vector<16x32xf32>
    %413 = tpu.matmul %412, %407, %cst_135 {dimension_numbers = #tpu.dot_dimension_numbers<[1], [0], [0], [1], [0, 0, 1, 1], [], []>} : vector<16x64xf32>, vector<64x32xf32>, vector<16x32xf32> -> vector<16x32xf32>
    %414 = arith.addf %383, %413 : vector<16x32xf32>
    %415 = vector.broadcast %285 : vector<1x32xf32> to vector<16x32xf32>
    %416 = arith.addf %414, %415 : vector<16x32xf32>
    %c456 = arith.constant 456 : index
    %c0_136 = arith.constant 0 : index
    %417 = vector.load %arg2[%c456, %c0_136] : memref<496x128xf32, #tpu.memory_space<vmem>>, vector<1x32xf32>
    %c457 = arith.constant 457 : index
    %c0_137 = arith.constant 0 : index
    %418 = vector.load %arg2[%c457, %c0_137] : memref<496x128xf32, #tpu.memory_space<vmem>>, vector<1x32xf32>
    %cst_138 = arith.constant dense<0.000000e+00> : vector<16xf32>
    %419 = vector.multi_reduction <add>, %416, %cst_138 [1] : vector<16x32xf32> to vector<16xf32>
    %420 = vector.shape_cast %419 : vector<16xf32> to vector<16x1xf32>
    %cst_139 = arith.constant 3.200000e+01 : f32
    %421 = vector.broadcast %cst_139 : f32 to vector<16x1xf32>
    %422 = arith.divf %420, %421 : vector<16x1xf32>
    %423 = vector.broadcast %422 : vector<16x1xf32> to vector<16x32xf32>
    %424 = arith.subf %416, %423 : vector<16x32xf32>
    %425 = arith.mulf %424, %424 : vector<16x32xf32>
    %cst_140 = arith.constant dense<0.000000e+00> : vector<16xf32>
    %426 = vector.multi_reduction <add>, %425, %cst_140 [1] : vector<16x32xf32> to vector<16xf32>
    %427 = vector.shape_cast %426 : vector<16xf32> to vector<16x1xf32>
    %cst_141 = arith.constant 3.200000e+01 : f32
    %428 = vector.broadcast %cst_141 : f32 to vector<16x1xf32>
    %429 = arith.divf %427, %428 : vector<16x1xf32>
    %430 = vector.broadcast %422 : vector<16x1xf32> to vector<16x32xf32>
    %431 = arith.subf %416, %430 : vector<16x32xf32>
    %cst_142 = arith.constant 9.99999974E-6 : f32
    %432 = vector.broadcast %cst_142 : f32 to vector<16x1xf32>
    %433 = arith.addf %429, %432 : vector<16x1xf32>
    %434 = math.rsqrt %433 : vector<16x1xf32>
    %435 = vector.broadcast %434 : vector<16x1xf32> to vector<16x32xf32>
    %436 = arith.mulf %431, %435 : vector<16x32xf32>
    %437 = vector.broadcast %417 : vector<1x32xf32> to vector<16x32xf32>
    %438 = arith.mulf %436, %437 : vector<16x32xf32>
    %439 = vector.broadcast %418 : vector<1x32xf32> to vector<16x32xf32>
    %440 = arith.addf %438, %439 : vector<16x32xf32>
    %c400 = arith.constant 400 : index
    %c0_143 = arith.constant 0 : index
    %441 = vector.load %arg2[%c400, %c0_143] : memref<496x128xf32, #tpu.memory_space<vmem>>, vector<32x128xf32>
    %cst_144 = arith.constant dense<0.000000e+00> : vector<16x128xf32>
    %442 = tpu.matmul %440, %441, %cst_144 {dimension_numbers = #tpu.dot_dimension_numbers<[1], [0], [0], [1], [0, 0, 1, 1], [], []>} : vector<16x32xf32>, vector<32x128xf32>, vector<16x128xf32> -> vector<16x128xf32>
    %c458 = arith.constant 458 : index
    %c0_145 = arith.constant 0 : index
    %443 = vector.load %arg2[%c458, %c0_145] : memref<496x128xf32, #tpu.memory_space<vmem>>, vector<1x128xf32>
    %444 = vector.broadcast %443 : vector<1x128xf32> to vector<16x128xf32>
    %445 = arith.addf %442, %444 : vector<16x128xf32>
    %c0_146 = arith.constant 0 : index
    %c0_147 = arith.constant 0 : index
    %446 = vector.load %arg3[%c0_146, %c0_147] : memref<16x128xf32, #tpu.memory_space<vmem>>, vector<16x128xf32>
    tpu.vector_store %arg3[%c0_146, %c0_147], %445 {strides = array<i32>} : memref<16x128xf32, #tpu.memory_space<vmem>>, vector<16x128xf32>,
    return
  }
  func.func @transform_0(%arg0: i32) -> (i32, i32) {
    %c0_i32 = arith.constant 0 : i32
    %c0_i32_0 = arith.constant 0 : i32
    %c0_i32_1 = arith.constant 0 : i32
    return %c0_i32, %c0_i32_0 : i32, i32
  }
  func.func @transform_1(%arg0: i32) -> (i32, i32) {
    %c0_i32 = arith.constant 0 : i32
    %c0_i32_0 = arith.constant 0 : i32
    %c0_i32_1 = arith.constant 0 : i32
    return %c0_i32, %c0_i32_0 : i32, i32
  }
  func.func @transform_2(%arg0: i32) -> (i32, i32) {
    %c0_i32 = arith.constant 0 : i32
    %c0_i32_0 = arith.constant 0 : i32
    %c0_i32_1 = arith.constant 0 : i32
    return %c0_i32, %c0_i32_0 : i32, i32
  }
}

</mosaic_0001>

<bundles_post_ra>
// kernel: tpu_custom_call.1
= control target key start
LH: loop header
LB: loop body
LE: loop exit
PB: predicated region body
PF: predicated region fallthrough
CT: control target
= control target key end

     0   :  { %7 = vsyncpa [#allocation3], 0  ;;  %s6071_s0 = inlined_call_operand.hbm [shape: f32[16,16], index: 0, kind: input, shape index: {}]   ;;  %s6072_s1 = inlined_call_operand.hbm [shape: f32[496,128], index: 1, kind: input, shape index: {}]   ;;  %s6073_s2 = inlined_call_operand.hbm [shape: f32[16,128], index: 2, kind: output, shape index: {}]  }
   0x1   :  { %8 = vsyncpa [#allocation6], 0 }
   0x2   :  { %9 = vsyncpa [#allocation4], 0  ;;  %s5445_s9 = smov [#allocation2]   ;;  %s5373_s13 = scalar_lea.hbm %s6071_s0, 256 }
   0x3   :  { %s15_s10 = sshll.u32 %s5445_s9, 4  ;;  %p5374_p0 = scmp.ne.s32.totalorder %s6071_s0, %s5373_s13  ;;  %s16_s10 = int_to_ptr.vmem [resolvable:$true] %s15_s10 }
   0x4   :  { %p5377_p1 = scmp.lt.u32.totalorder %s5373_s13, %s6071_s0 }
   0x6   :  { %p5379_p2 = pnand %p5377_p1, %p5374_p0 }
   0x8   :  { %5382 = shalt.err (!%p5379_p2)
}
   0x9   :  { %s5383_s18 = scalar_lea.vmem %s16_s10, 256  ;;  %p5388_p4 = scmp.lt.s32.totalorder %s16_s10, %s16_s10 }
   0xa   :  { %p5384_p3 = scmp.ne.s32.totalorder %s16_s10, %s5383_s18  ;;  %p5389_p5 = scmp.lt.s32.totalorder %s5383_s18, %s5383_s18 }
   0xc   :  { %p5390_p6 = por %p5389_p5, %p5388_p4 }
   0xe   :  { %p5391_p7 = pnand %p5390_p6, %p5384_p3 }
  0x10   :  { %5394 = shalt.err (!%p5391_p7)
}
  0x11   :  { %s5446_s19 = smov 128   ;;  %s5447_s20 = smov 8  }
  0x12   :  { %21 = dma.hbm_to_vmem [thread:$0]  %s6071_s0, 256, %s16_s10, [#allocation3], %s5446_s19, %s5446_s19, %s5447_s20  }
  0x13   :  { %s5448_s23 = smov [#allocation5]   ;;  %s5395_s27 = scalar_lea.hbm %s6072_s1, 7936 }
  0x14   :  { %s27_s24 = sshll.u32 %s5448_s23, 4  ;;  %p5396_p8 = scmp.ne.s32.totalorder %s6072_s1, %s5395_s27  ;;  %s28_s24 = int_to_ptr.vmem [resolvable:$true] %s27_s24 }
  0x15   :  { %p5399_p9 = scmp.lt.u32.totalorder %s5395_s27, %s6072_s1 }
  0x17   :  { %p5401_p10 = pnand %p5399_p9, %p5396_p8 }
  0x19   :  { %5404 = shalt.err (!%p5401_p10)
}
  0x1a   :  { %s5405_s4 = scalar_lea.vmem %s28_s24, 7936  ;;  %p5410_p12 = scmp.lt.s32.totalorder %s28_s24, %s28_s24 }
  0x1b   :  { %p5406_p11 = scmp.ne.s32.totalorder %s28_s24, %s5405_s4  ;;  %p5411_p13 = scmp.lt.s32.totalorder %s5405_s4, %s5405_s4 }
  0x1d   :  { %p5412_p0 = por %p5411_p13, %p5410_p12 }
  0x1f   :  { %p5413_p1 = pnand %p5412_p0, %p5406_p11 }
  0x21   :  { %5416 = shalt.err (!%p5413_p1)
}
  0x22   :  { %33 = dma.hbm_to_vmem [thread:$0]  %s6072_s1, 7936, %s28_s24, [#allocation6], %s5446_s19, %s5446_s19, %s5447_s20  }
  0x23   :  { %5439 = dma.done.wait [#allocation3], 256  }
  0x24   :  { %5440 = vsyncadd [#allocation3], 4294967040 }
  0x25   :  { %5441 = dma.done.wait [#allocation6], 7936  }
  0x26   :  { %5442 = vsyncadd [#allocation6], 4294959360  ;;  %vm48_vm0 = vcmask 130048   ;;  %v46_v0 = vld [vmem:[#allocation5] sm:$0xff]  ;;  %v47_v1 = vld [vmem:[#allocation5 + $0x8] sm:$0xff]  ;;  %vm138_vm1 = vcmask 261120  }
  0x27   :  { %v44_v2 = vld [vmem:[#allocation2] sm:$0xff]  ;;  %v4826_v3 = vpack.c.bf16 %v47_v1, %v46_v0  ;;  %v45_v4 = vld [vmem:[#allocation2 + $0x8] sm:$0xff]  ;;  %v42_v5 = vld [vmem:[#allocation5 + $0x1e0] sm:$0xff]  ;;  %vm273_vm2 = vcmask 64512   ;;  %s5449_s1 = smov 88   ;;  %s5450_s6 = smov 96  }
  0x28   :  { %4488 = vmatprep.mubr.msk.f32.mxu0 %vm48_vm0, %v44_v2  ;;  %v43_v7 = vld [vmem:[#allocation5 + $0x1e8] sm:$0xff]  ;;  %v5523_v23 = vld [vmem:[#allocation5 + $0x10] sm:$0xff]  ;;  %v5525_v24 = vld [vmem:[#allocation5 + $0x18] sm:$0xff]  ;;  %s5451_s7 = smov 120   ;;  %s5452_s8 = smov 56   ;;  %vm1094_vm4 = vcmask 195584  }
  0x29   :  { %4827 = vmatprep.subr.bf16.mxu0 %v4826_v3  ;;  %v5527_v25 = vld [vmem:[#allocation5 + $0x20] sm:$0xff]  ;;  %v5137_v26 = vpack.i.bf16 %v5525_v24, %v5523_v23  ;;  %v4830_v27 = vpack.c.bf16 %v5525_v24, %v5523_v23  ;;  %v5533_v28 = vld [vmem:[#allocation5 + $0x28] sm:$0xff]  ;;  %v4169_v37 = vld [vmem:[#allocation5 + $0x1b0] ss:$0 sm:$0xff]  ;;  %s5453_s9 = smov 64   ;;  %s5454_s10 = smov 80  }
  0x2a   :  { %4829 = vmatpush3.bf16.msra.mxu0 %v4826_v3  ;;  %v4834_v29 = vpack.c.bf16 %v5533_v28, %v5527_v25  ;;  %v4170_v39 = vld [vmem:[#allocation5 + $0x1b1] ss:$0 sm:$0xff]  ;;  %v4171_v46 = vld [vmem:[#allocation5 + $0x1b7] ss:$0 sm:$0xff]  ;;  %vm5559_vm3 = vmpackc.low %vm273_vm2, %vm273_vm2  ;;  %s5455_s11 = smov 112   ;;  %s5456_s12 = smov 48  }
  0x2b   :  { %4831 = vmatprep.subr.bf16.mxu1 %v4830_v27  ;;  %v5575_v63 = vld [vmem:[#allocation5 + $0x1d8] sm:$0xff]  ;;  %v5577_v0 = vld [vmem:[#allocation5 + $0x1d0] sm:$0xff]  ;;  %s5457_s13 = smov 104   ;;  %s5458_s14 = smov 72   ;;  %vm1339_vm5 = vcmask 523264  }
  0x2c   :  { %4833 = vmatpush3.bf16.msra.mxu1 %v4830_v27  ;;  %s5459_s15 = smov 40   ;;  %s5460_s16 = smov 32  }
  0x2d   :  { %4489 = vmatmul.mubr.msk.f32.vlgmr.msra.gmra.mrb[0].mxu0 %vm48_vm0, %v45_v4  ;;  %4835 = vmatprep.subr.bf16.mxu1 %v4834_v29  ;;  %s5461_s17 = smov 16   ;;  %s5462_s18 = smov 24  }
  0x2e   :  { %s5463_s21 = smov [#allocation7]  }
  0x2f   :  { %s4154_s22 = sshll.u32 %s5463_s21, 4  ;;  %s4155_s22 = int_to_ptr.vmem [resolvable:$true] %s4154_s22 }
  0x30   :  { %4837 = vmatpush3.bf16.msra.mxu1 %v4834_v29  ;;  %s5417_s23 = scalar_lea.vmem %s4155_s22, 256  ;;  %p5422_p3 = scmp.lt.s32.totalorder %s4155_s22, %s4155_s22 }
  0x31   :  { %p5418_p2 = scmp.ne.s32.totalorder %s4155_s22, %s5417_s23  ;;  %p5423_p4 = scmp.lt.s32.totalorder %s5417_s23, %s5417_s23 }
  0x33   :  { %p5424_p5 = por %p5423_p4, %p5422_p3 }
  0x35   :  { %p5425_p6 = pnand %p5424_p5, %p5418_p2 }
 0x100   :  { %v4490_v6 = vpop.f32.mrb[0].mxu0 }
 0x101   :  { %v121_v8 = vpop.f32.mrb[1].mxu0  ;;  %v5513_v10 = vadd.f32 %v4490_v6, %v43_v7 }
 0x102   :  { %v5511_v9 = vadd.f32 %v121_v8, %v42_v5 }
 0x103   :  { %v142_v12 = vsel %vm138_vm1, %v5513_v10, 0.0 }
 0x104   :  { %v139_v11 = vsel %vm138_vm1, %v5511_v9, 0.0 }
 0x105   :  { %140 = vadd.xlane.f32.xlu0 %v139_v11 }
 0x109   :  { %143 = vadd.xlane.f32.xlu0 %v142_v12 }
 0x192   :  { %v141_v13 = vpop.xlane.xlu0 %140 }
 0x193   :  { %v146_v14 = vmul.f32 0.03125, %v141_v13 }
 0x195   :  { %v148_v15 = vsub.f32 %v5511_v9, %v146_v14 }
 0x196   :  { %v144_v16 = vpop.xlane.xlu0 %143 }
 0x197   :  { %v147_v17 = vmul.f32 0.03125, %v144_v16  ;;  %v150_v18 = vmul.f32 %v148_v15, %v148_v15 }
 0x199   :  { %v149_v19 = vsub.f32 %v5513_v10, %v147_v17  ;;  %v152_v20 = vsel %vm138_vm1, %v150_v18, 0.0 }
 0x19a   :  { %153 = vadd.xlane.f32.xlu1 %v152_v20 }
 0x19b   :  { %v151_v21 = vmul.f32 %v149_v19, %v149_v19 }
 0x19d   :  { %v155_v22 = vsel %vm138_vm1, %v151_v21, 0.0 }
 0x19e   :  { %156 = vadd.xlane.f32.xlu1 %v155_v22 }
 0x227   :  { %v154_v30 = vpop.xlane.xlu1 %153 }
 0x228   :  { %v158_v31 = vmul.f32 0.03125, %v154_v30 }
 0x22a   :  { %v160_v32 = vadd.f32 1e-05, %v158_v31 }
 0x22b   :  { %v157_v33 = vpop.xlane.xlu1 %156 }
 0x22c   :  { %5247 = vrsqrt.f32 %v160_v32  ;;  %v159_v34 = vmul.f32 0.03125, %v157_v33 }
 0x22e   :  { %v161_v35 = vadd.f32 1e-05, %v159_v34 }
 0x230   :  { %5249 = vrsqrt.f32 %v161_v35 }
 0x236   :  { %v5248_v36 = vpop.eup %5247 }
 0x237   :  { %v164_v38 = vmul.f32 %v5248_v36, %v148_v15 }
 0x239   :  { %v170_v40 = vmul.f32 %v4169_v37, %v164_v38 }
 0x23a   :  { %v5250_v41 = vpop.eup %5249 }
 0x23b   :  { %v165_v42 = vmul.f32 %v5250_v41, %v149_v19  ;;  %v176_v43 = vadd.f32 %v4170_v39, %v170_v40 }
 0x23d   :  { %v171_v44 = vmul.f32 %v4169_v37, %v165_v42  ;;  %4499 = vmatprep.mubr.msk.f32.mxu1 %vm138_vm1, %v176_v43 }
 0x23f   :  { %v177_v45 = vadd.f32 %v4170_v39, %v171_v44 }
 0x241   :  { %4500 = vmatmul.mubr.msk.f32.vlgmr.msra.gmra.mrb[0].mxu1 %vm138_vm1, %v177_v45 }
 0x314   :  { %v4501_v47 = vpop.f32.mrb[0].mxu1 }
 0x315   :  { %v5539_v48 = vadd.f32 %v4501_v47, %v4171_v46  ;;  %v258_v49 = vpop.f32.mrb[1].mxu1 }
 0x316   :  { %v5541_v50 = vadd.f32 %v4171_v46, %v258_v49 }
 0x318   :  { %4506 = vmatprep.mubr.msk.f32.mxu0 %vm273_vm2, %v5541_v50  ;;  %v5547_v51 = vpack.i.bf16 %v5539_v48, %v5541_v50 }
 0x31a   :  { %5103 = vrot.lane.b32.xlu1 %v5547_v51, %s5449_s1  ;;  %5098 = vrot.lane.b32.xlu0 %v5547_v51, %s5450_s6 }
 0x31e   :  { %466 = vrot.lane.b32.xlu1 %v5541_v50, %s5451_s7 }
 0x322   :  { %468 = vrot.lane.b32.xlu1 %v5539_v48, %s5451_s7 }
 0x38c   :  { %v5104_v52 = vpop.permute.xlu1 %5103  ;;  %v5099_v53 = vpop.permute.xlu0 %5098 }
 0x38d   :  { %v5106_v54 = vunpack.i.h.bf16 %v5104_v52  ;;  %v5105_v55 = vunpack.i.l.bf16 %v5104_v52  ;;  %v5101_v56 = vunpack.i.h.bf16 %v5099_v53  ;;  %v5100_v57 = vunpack.i.l.bf16 %v5099_v53 }
 0x38f   :  { %v4838_v59 = vpack.c.bf16 %v5101_v56, %v5100_v57  ;;  %v4848_v60 = vpack.c.bf16 %v5106_v54, %v5105_v55 }
 0x390   :  { %v467_v61 = vpop.permute.xlu1 %466 }
 0x391   :  { %4840 = vmatprep.subr.msk.bf16.mxu0 %vm5559_vm3, %v4838_v59 }
 0x392   :  { %4843 = vmatpush3.bf16.xpose.msk.msra.mxu0 %vm5559_vm3, %v4838_v59 }
 0x393   :  { %4850 = vmatprep.subr.msk.bf16.mxu0 %vm5559_vm3, %v4848_v60 }
 0x394   :  { %v469_v62 = vpop.permute.xlu1 %468 }
 0x399   :  { %4507 = vmatmul.mubr.msk.f32.vlgmr.msra.gmra.mrb[2].mxu0 %vm273_vm2, %v5539_v48 }
 0x39a   :  { %4853 = vmatpush3.bf16.xpose.msk.msra.mxu0 %vm5559_vm3, %v4848_v60  ;;  %4520 = vmatprep.mubr.msk.f32.mxu0 %vm273_vm2, %v467_v61 }
 0x3a1   :  { %4521 = vmatmul.mubr.msk.f32.vlgmr.msra.gmra.mrb[4].mxu0 %vm273_vm2, %v469_v62 }
 0x46c   :  { %v4508_v1 = vpop.f32.mrb[2].mxu0 }
 0x46d   :  { %v354_v2 = vadd.f32 %v4508_v1, %v5575_v63  ;;  %v348_v3 = vpop.f32.mrb[3].mxu0 }
 0x46e   :  { %v349_v4 = vadd.f32 %v348_v3, %v5577_v0 }
 0x46f   :  { %v360_v5 = vsel %vm48_vm0, %v354_v2, -inf }
 0x470   :  { %361 = vmax.xlane.f32.xlu1 %v360_v5  ;;  %v357_v6 = vsel %vm48_vm0, %v349_v4, -inf }
 0x471   :  { %358 = vmax.xlane.f32.xlu0 %v357_v6 }
 0x474   :  { %v4522_v7 = vpop.f32.mrb[4].mxu0 }
 0x475   :  { %v548_v8 = vpop.f32.mrb[5].mxu0  ;;  %v554_v12 = vadd.f32 %v4522_v7, %v5575_v63 }
 0x476   :  { %v549_v11 = vadd.f32 %v548_v8, %v5577_v0 }
 0x477   :  { %v560_v14 = vsel %vm48_vm0, %v554_v12, -inf }
 0x478   :  { %v557_v13 = vsel %vm48_vm0, %v549_v11, -inf }
 0x479   :  { %558 = vmax.xlane.f32.xlu0 %v557_v13 }
 0x47d   :  { %561 = vmax.xlane.f32.xlu0 %v560_v14 }
 0x4fd   :  { %v362_v15 = vpop.xlane.xlu1 %361 }
 0x4fe   :  { %v364_v16 = vsub.f32 %v354_v2, %v362_v15  ;;  %v359_v17 = vpop.xlane.xlu0 %358 }
 0x4ff   :  { %v363_v18 = vsub.f32 %v349_v4, %v359_v17 }
 0x500   :  { %v367_v19 = vmul.f32 1.442695, %v364_v16 }
 0x501   :  { %v365_v20 = vmul.f32 1.442695, %v363_v18 }
 0x502   :  { %5251 = vpow2.f32 %v367_v19 }
 0x503   :  { %5253 = vpow2.f32 %v365_v20 }
 0x506   :  { %v559_v21 = vpop.xlane.xlu0 %558 }
 0x507   :  { %v563_v22 = vsub.f32 %v549_v11, %v559_v21 }
 0x509   :  { %v565_v27 = vmul.f32 1.442695, %v563_v22 }
 0x50a   :  { %v562_v29 = vpop.xlane.xlu0 %561 }
 0x50b   :  { %5255 = vpow2.f32 %v565_v27  ;;  %v564_v30 = vsub.f32 %v554_v12, %v562_v29 }
 0x50c   :  { %v5252_v31 = vpop.eup %5251 }
 0x50d   :  { %v5254_v32 = vpop.eup %5253  ;;  %v567_v33 = vmul.f32 1.442695, %v564_v30  ;;  %v372_v34 = vsel %vm48_vm0, %v5252_v31, 0.0 }
 0x50e   :  { %373 = vadd.xlane.f32.xlu1 %v372_v34  ;;  %v369_v35 = vsel %vm48_vm0, %v5254_v32, 0.0 }
 0x50f   :  { %5257 = vpow2.f32 %v567_v33  ;;  %370 = vadd.xlane.f32.xlu0 %v369_v35 }
 0x515   :  { %v5256_v36 = vpop.eup %5255 }
 0x516   :  { %v569_v37 = vsel %vm48_vm0, %v5256_v36, 0.0 }
 0x517   :  { %570 = vadd.xlane.f32.xlu0 %v569_v37 }
 0x519   :  { %v5258_v38 = vpop.eup %5257 }
 0x51a   :  { %v572_v39 = vsel %vm48_vm0, %v5258_v38, 0.0 }
 0x51b   :  { %573 = vadd.xlane.f32.xlu1 %v572_v39 }
 0x52c   :  { %5113 = vrot.lane.b32.xlu1 %v5547_v51, %s5452_s8 }
 0x52d   :  { %5108 = vrot.lane.b32.xlu0 %v5547_v51, %s5453_s9 }
 0x530   :  { %5118 = vrot.lane.b32.xlu1 %v5547_v51, %s5454_s10 }
 0x531   :  { %668 = vrot.lane.b32.xlu0 %v5539_v48, %s5455_s11 }
 0x534   :  { %666 = vrot.lane.b32.xlu1 %v5541_v50, %s5455_s11 }
 0x59b   :  { %v374_v41 = vpop.xlane.xlu1 %373 }
 0x59c   :  { %v371_v40 = vpop.xlane.xlu0 %370 }
 0x59d   :  { %5259 = vrcp.f32 %v371_v40 }
 0x59e   :  { %5261 = vrcp.f32 %v374_v41 }
 0x5a4   :  { %v571_v42 = vpop.xlane.xlu0 %570 }
 0x5a5   :  { %5263 = vrcp.f32 %v571_v42 }
 0x5a7   :  { %v5260_v43 = vpop.eup %5259 }
 0x5a8   :  { %v5109_v44 = vpop.permute.xlu0 %5108  ;;  %v574_v45 = vpop.xlane.xlu1 %573  ;;  %v377_v46 = vmul.f32 %v5260_v43, %v5254_v32 }
 0x5a9   :  { %v5111_v47 = vunpack.i.h.bf16 %v5109_v44  ;;  %v5110_v49 = vunpack.i.l.bf16 %v5109_v44  ;;  %5265 = vrcp.f32 %v574_v45  ;;  %v5262_v53 = vpop.eup %5261 }
 0x5aa   :  { %4513 = vmatprep.mubr.msk.f32.mxu1 %vm48_vm0, %v377_v46  ;;  %v378_v59 = vmul.f32 %v5262_v53, %v5252_v31 }
 0x5ab   :  { %v4844_v52 = vpack.c.bf16 %v5111_v47, %v5110_v49 }
 0x5ac   :  { %v5114_v54 = vpop.permute.xlu1 %5113  ;;  %v669_v7 = vpop.permute.xlu0 %668 }
 0x5ad   :  { %v5116_v55 = vunpack.i.h.bf16 %v5114_v54  ;;  %v5115_v56 = vunpack.i.l.bf16 %v5114_v54  ;;  %4845 = vmatprep.subr.bf16.mxu1 %v4844_v52 }
 0x5ae   :  { %4847 = vmatpush3.bf16.msra.mxu1 %v4844_v52 }
 0x5af   :  { %v5264_v57 = vpop.eup %5263  ;;  %v4854_v60 = vpack.c.bf16 %v5116_v55, %v5115_v56 }
 0x5b0   :  { %v5119_v61 = vpop.permute.xlu1 %5118  ;;  %v577_v62 = vmul.f32 %v5264_v57, %v5256_v36 }
 0x5b1   :  { %v5121_v1 = vunpack.i.h.bf16 %v5119_v61  ;;  %v5120_v2 = vunpack.i.l.bf16 %v5119_v61  ;;  %4514 = vmatmul.mubr.msk.f32.vlgmr.msra.gmra.mrb[2].mxu1 %vm48_vm0, %v378_v59  ;;  %4855 = vmatprep.subr.bf16.mxu1 %v4854_v60  ;;  %v5142_v61 = vpack.i.bf16 %v5533_v28, %v5527_v25 }
 0x5b2   :  { %4857 = vmatpush3.bf16.msra.mxu1 %v4854_v60  ;;  %4527 = vmatprep.mubr.msk.f32.mxu1 %vm48_vm0, %v577_v62 }
 0x5b3   :  { %v5266_v3 = vpop.eup %5265  ;;  %v4858_v4 = vpack.c.bf16 %v5121_v1, %v5120_v2 }
 0x5b4   :  { %v578_v5 = vmul.f32 %v5266_v3, %v5258_v38  ;;  %v667_v6 = vpop.permute.xlu1 %666 }
 0x5b5   :  { %4860 = vmatprep.subr.msk.bf16.mxu1 %vm5559_vm3, %v4858_v4 }
 0x5b6   :  { %4528 = vmatmul.mubr.msk.f32.vlgmr.msra.gmra.mrb[4].mxu1 %vm48_vm0, %v578_v5 }
 0x5b7   :  { %4534 = vmatprep.mubr.msk.f32.mxu1 %vm273_vm2, %v667_v6 }
 0x5bb   :  { %4863 = vmatpush3.bf16.xpose.msk.msra.mxu1 %vm5559_vm3, %v4858_v4 }
 0x5c2   :  { %4535 = vmatmul.mubr.msk.f32.vlgmr.msra.gmra.mrb[6].mxu1 %vm273_vm2, %v669_v7 }
 0x684   :  { %v5611_v8 = vpop.f32.mrb[2].mxu1 }
 0x685   :  { %v5613_v11 = vpop.f32.mrb[3].mxu1 }
 0x689   :  { %v5615_v12 = vpop.f32.mrb[4].mxu1 }
 0x68a   :  { %v5617_v13 = vpop.f32.mrb[5].mxu1 }
 0x695   :  { %v4536_v14 = vpop.f32.mrb[6].mxu1 }
 0x696   :  { %v754_v15 = vadd.f32 %v4536_v14, %v5575_v63  ;;  %v748_v16 = vpop.f32.mrb[7].mxu1 }
 0x697   :  { %v749_v17 = vadd.f32 %v748_v16, %v5577_v0 }
 0x698   :  { %v760_v18 = vsel %vm48_vm0, %v754_v15, -inf }
 0x699   :  { %761 = vmax.xlane.f32.xlu0 %v760_v18  ;;  %v757_v19 = vsel %vm48_vm0, %v749_v17, -inf }
 0x69a   :  { %758 = vmax.xlane.f32.xlu1 %v757_v19 }
 0x6ab   :  { %5123 = vrot.lane.b32.xlu1 %v5547_v51, %s5456_s12 }
 0x6af   :  { %866 = vrot.lane.b32.xlu1 %v5541_v50, %s5457_s13 }
 0x6b3   :  { %868 = vrot.lane.b32.xlu1 %v5539_v48, %s5457_s13 }
 0x726   :  { %v762_v20 = vpop.xlane.xlu0 %761 }
 0x727   :  { %v764_v21 = vsub.f32 %v754_v15, %v762_v20  ;;  %v759_v22 = vpop.xlane.xlu1 %758 }
 0x728   :  { %v763_v27 = vsub.f32 %v749_v17, %v759_v22 }
 0x729   :  { %v767_v29 = vmul.f32 1.442695, %v764_v21 }
 0x72a   :  { %v765_v30 = vmul.f32 1.442695, %v763_v27 }
 0x72b   :  { %5267 = vpow2.f32 %v767_v29  ;;  %v5124_v31 = vpop.permute.xlu1 %5123 }
 0x72c   :  { %v5126_v32 = vunpack.i.h.bf16 %v5124_v31  ;;  %v5125_v33 = vunpack.i.l.bf16 %v5124_v31  ;;  %5269 = vpow2.f32 %v765_v30 }
 0x72e   :  { %v4864_v34 = vpack.c.bf16 %v5126_v32, %v5125_v33 }
 0x72f   :  { %v867_v47 = vpop.permute.xlu1 %866 }
 0x730   :  { %4865 = vmatprep.subr.bf16.mxu0 %v4864_v34 }
 0x731   :  { %4867 = vmatpush3.bf16.msra.mxu0 %v4864_v34 }
 0x733   :  { %v869_v49 = vpop.permute.xlu1 %868 }
 0x735   :  { %v5268_v35 = vpop.eup %5267 }
 0x736   :  { %v772_v50 = vsel %vm48_vm0, %v5268_v35, 0.0  ;;  %v5270_v36 = vpop.eup %5269 }
 0x737   :  { %773 = vadd.xlane.f32.xlu0 %v772_v50  ;;  %v769_v48 = vsel %vm48_vm0, %v5270_v36, 0.0 }
 0x73b   :  { %770 = vadd.xlane.f32.xlu0 %v769_v48 }
 0x751   :  { %5128 = vrot.lane.b32.xlu0 %v5547_v51, %s5458_s14 }
 0x7c4   :  { %v774_v37 = vpop.xlane.xlu0 %773 }
 0x7c5   :  { %5271 = vrcp.f32 %v774_v37 }
 0x7c8   :  { %v771_v38 = vpop.xlane.xlu0 %770 }
 0x7c9   :  { %5273 = vrcp.f32 %v771_v38 }
 0x7cc   :  { %v5129_v39 = vpop.permute.xlu0 %5128 }
 0x7cd   :  { %v5131_v40 = vunpack.i.h.bf16 %v5129_v39  ;;  %v5130_v41 = vunpack.i.l.bf16 %v5129_v39 }
 0x7cf   :  { %v4868_v42 = vpack.c.bf16 %v5131_v40, %v5130_v41  ;;  %v5272_v43 = vpop.eup %5271 }
 0x7d0   :  { %v778_v46 = vmul.f32 %v5272_v43, %v5268_v35  ;;  %v4200_v43 = vld [vmem:[#allocation5 + $0x1b6] ss:$0 sm:$0xff] }
 0x7d1   :  { %4870 = vmatprep.subr.msk.bf16.mxu0 %vm5559_vm3, %v4868_v42 }
 0x7d3   :  { %v5274_v44 = vpop.eup %5273 }
 0x7d4   :  { %v777_v45 = vmul.f32 %v5274_v44, %v5270_v36 }
 0x7d6   :  { %4541 = vmatprep.mubr.msk.f32.mxu0 %vm48_vm0, %v777_v45 }
 0x7d7   :  { %4542 = vmatmul.mubr.msk.f32.vlgmr.msra.gmra.mrb[6].mxu0 %vm48_vm0, %v778_v46 }
 0x7d8   :  { %4873 = vmatpush3.bf16.xpose.msk.msra.mxu0 %vm5559_vm3, %v4868_v42  ;;  %4548 = vmatprep.mubr.msk.f32.mxu0 %vm273_vm2, %v867_v47 }
 0x7df   :  { %4549 = vmatmul.mubr.msk.f32.vlgmr.msra.gmra.mrb[8].mxu0 %vm273_vm2, %v869_v49 }
 0x8aa   :  { %v4543_v52 = vpop.f32.mrb[6].mxu0 }
 0x8ab   :  { %v857_v53 = vpop.f32.mrb[7].mxu0 }
 0x8b2   :  { %v4550_v54 = vpop.f32.mrb[8].mxu0 }
 0x8b3   :  { %v954_v55 = vadd.f32 %v4550_v54, %v5575_v63  ;;  %v948_v56 = vpop.f32.mrb[9].mxu0 }
 0x8b4   :  { %v949_v57 = vadd.f32 %v948_v56, %v5577_v0 }
 0x8b5   :  { %v960_v59 = vsel %vm48_vm0, %v954_v55, -inf }
 0x8b6   :  { %961 = vmax.xlane.f32.xlu0 %v960_v59  ;;  %v957_v60 = vsel %vm48_vm0, %v949_v57, -inf }
 0x8b7   :  { %958 = vmax.xlane.f32.xlu1 %v957_v60 }
 0x8c8   :  { %5133 = vrot.lane.b32.xlu1 %v5547_v51, %s5459_s15 }
 0x8cc   :  { %5143 = vrot.lane.b32.xlu1 %v5142_v61, %s5460_s16 }
 0x8d0   :  { %1068 = vrot.lane.b32.xlu1 %v5617_v13, %s5447_s20 }
 0x8d4   :  { %1070 = vrot.lane.b32.xlu1 %v5615_v12, %s5447_s20 }
 0x8d8   :  { %1078 = vrot.lane.b32.xlu1 %v4543_v52, %s5461_s17 }
 0x943   :  { %v962_v62 = vpop.xlane.xlu0 %961 }
 0x944   :  { %v964_v1 = vsub.f32 %v954_v55, %v962_v62  ;;  %v959_v2 = vpop.xlane.xlu1 %958  ;;  %v1240_v62 = vld [vmem:[#allocation5 + $0x70] sm:$0xff] }
 0x945   :  { %v963_v3 = vsub.f32 %v949_v57, %v959_v2 }
 0x946   :  { %v967_v51 = vmul.f32 1.442695, %v964_v1  ;;  %v1241_v1 = vld [vmem:[#allocation5 + $0x78] sm:$0xff] }
 0x947   :  { %v965_v4 = vmul.f32 1.442695, %v963_v3  ;;  %v4886_v2 = vpack.c.bf16 %v1241_v1, %v1240_v62  ;;  %v1242_v3 = vld [vmem:[#allocation5 + $0x80] sm:$0xff]  ;;  %v5710_v62 = vld [vmem:[#allocation5 + $0x38] sm:$0xff] }
 0x948   :  { %v5134_v5 = vpop.permute.xlu1 %5133 }
 0x949   :  { %5275 = vpow2.f32 %v965_v4  ;;  %v5136_v25 = vunpack.i.h.bf16 %v5134_v5  ;;  %v5135_v28 = vunpack.i.l.bf16 %v5134_v5  ;;  %4887 = vmatprep.subr.bf16.mxu0 %v4886_v2  ;;  %v1244_v5 = vld [vmem:[#allocation5 + $0xd0] sm:$0xff] }
 0x94a   :  { %5277 = vpow2.f32 %v967_v51  ;;  %4889 = vmatpush3.bf16.msra.mxu0 %v4886_v2  ;;  %v1243_v51 = vld [vmem:[#allocation5 + $0x88] sm:$0xff]  ;;  %v5714_v2 = vld [vmem:[#allocation5 + $0x40] sm:$0xff] }
 0x94b   :  { %v4874_v6 = vpack.c.bf16 %v5136_v25, %v5135_v28  ;;  %v4890_v4 = vpack.c.bf16 %v1243_v51, %v1242_v3  ;;  %v1245_v25 = vld [vmem:[#allocation5 + $0xd8] sm:$0xff]  ;;  %v1246_v28 = vld [vmem:[#allocation5 + $0xe0] sm:$0xff]  ;;  %v5716_v3 = vld [vmem:[#allocation5 + $0x48] sm:$0xff] }
 0x94c   :  { %v5144_v21 = vpop.permute.xlu1 %5143  ;;  %v4914_v51 = vpack.c.bf16 %v5716_v3, %v5714_v2 }
 0x94d   :  { %4875 = vmatprep.subr.bf16.mxu1 %v4874_v6  ;;  %v5146_v27 = vunpack.i.h.bf16 %v5144_v21  ;;  %v5145_v29 = vunpack.i.l.bf16 %v5144_v21  ;;  %4891 = vmatprep.subr.bf16.mxu0 %v4890_v4 }
 0x94e   :  { %4877 = vmatpush3.bf16.msra.mxu1 %v4874_v6  ;;  %4893 = vmatpush3.bf16.msra.mxu0 %v4890_v4  ;;  %v4894_v6 = vpack.c.bf16 %v1245_v25, %v1244_v5 }
 0x94f   :  { %v4882_v30 = vpack.c.bf16 %v5146_v27, %v5145_v29  ;;  %v4201_v27 = vld [vmem:[#allocation5 + $0x1b2] ss:$0 sm:$0xff] }
 0x950   :  { %v1069_v33 = vpop.permute.xlu1 %1068 }
 0x951   :  { %v1090_v36 = vsel %vm273_vm2, %v5613_v11, %v1069_v33 }
 0x953   :  { %v5276_v7 = vpop.eup %5275 }
 0x954   :  { %v969_v12 = vsel %vm48_vm0, %v5276_v7, 0.0  ;;  %v5278_v13 = vpop.eup %5277  ;;  %v1071_v34 = vpop.permute.xlu1 %1070 }
 0x955   :  { %970 = vadd.xlane.f32.xlu0 %v969_v12  ;;  %v972_v14 = vsel %vm48_vm0, %v5278_v13, 0.0  ;;  %v1091_v37 = vsel %vm273_vm2, %v5611_v8, %v1071_v34  ;;  %v1250_v34 = vld [vmem:[#allocation5 + $0x100] sm:$0xff] }
 0x958   :  { %v1079_v35 = vpop.permute.xlu1 %1078 }
 0x959   :  { %973 = vadd.xlane.f32.xlu0 %v972_v14  ;;  %v1093_v40 = vsel %vm48_vm0, %v1091_v37, %v1079_v35  ;;  %v1249_v14 = vld [vmem:[#allocation5 + $0xf8] sm:$0xff]  ;;  %v1251_v35 = vld [vmem:[#allocation5 + $0x108] sm:$0xff] }
 0x96f   :  { %5138 = vrot.lane.b32.xlu0 %v5137_v26, %s5460_s16 }
 0x973   :  { %1076 = vrot.lane.b32.xlu0 %v857_v53, %s5461_s17 }
 0x9e2   :  { %v971_v15 = vpop.xlane.xlu0 %970 }
 0x9e3   :  { %5279 = vrcp.f32 %v971_v15 }
 0x9e6   :  { %v974_v16 = vpop.xlane.xlu0 %973 }
 0x9e7   :  { %5281 = vrcp.f32 %v974_v16 }
 0x9ea   :  { %v5139_v22 = vpop.permute.xlu0 %5138 }
 0x9eb   :  { %v5141_v23 = vunpack.i.h.bf16 %v5139_v22  ;;  %v5140_v24 = vunpack.i.l.bf16 %v5139_v22 }
 0x9ed   :  { %v5280_v17 = vpop.eup %5279  ;;  %v4878_v26 = vpack.c.bf16 %v5141_v23, %v5140_v24  ;;  %v4202_v23 = vld [vmem:[#allocation5 + $0x1b3] ss:$0 sm:$0xff] }
 0x9ee   :  { %v977_v18 = vmul.f32 %v5280_v17, %v5276_v7  ;;  %v1077_v50 = vpop.permute.xlu0 %1076  ;;  %v1247_v7 = vld [vmem:[#allocation5 + $0xe8] sm:$0xff] }
 0x9ef   :  { %4879 = vmatprep.subr.bf16.mxu1 %v4878_v26  ;;  %v1092_v38 = vsel %vm48_vm0, %v1090_v36, %v1077_v50  ;;  %v4898_v12 = vpack.c.bf16 %v1247_v7, %v1246_v28  ;;  %v4906_v50 = vpack.c.bf16 %v1251_v35, %v1250_v34  ;;  %v4203_v36 = vld [vmem:[#allocation5 + $0x1b4] ss:$0 sm:$0xff] }
 0x9f0   :  { %4555 = vmatprep.mubr.msk.f32.mxu1 %vm48_vm0, %v977_v18 }
 0x9f1   :  { %v5282_v19 = vpop.eup %5281 }
 0x9f2   :  { %v978_v20 = vmul.f32 %v5282_v19, %v5278_v13  ;;  %v1248_v13 = vld [vmem:[#allocation5 + $0xf0] sm:$0xff] }
 0x9f3   :  { %v4902_v15 = vpack.c.bf16 %v1249_v14, %v1248_v13  ;;  %v4209_v13 = vld [vmem:[#allocation5 + $0x1b8] ss:$0 sm:$0xff] }
 0x9f4   :  { %4556 = vmatmul.mubr.msk.f32.vlgmr.msra.gmra.mrb[8].mxu1 %vm48_vm0, %v978_v20 }
 0x9f5   :  { %4881 = vmatpush3.bf16.msra.mxu1 %v4878_v26 }
 0x9f6   :  { %4883 = vmatprep.subr.bf16.mxu1 %v4882_v30 }
 0x9f9   :  { %4885 = vmatpush3.bf16.msra.mxu1 %v4882_v30 }
 0x9fa   :  { %4895 = vmatprep.subr.bf16.mxu1 %v4894_v6 }
 0xac7   :  { %v4557_v31 = vpop.f32.mrb[8].mxu1 }
 0xac8   :  { %1086 = vrot.lane.b32.xlu1 %v4557_v31, %s5462_s18  ;;  %v1057_v32 = vpop.f32.mrb[9].mxu1 }
 0xac9   :  { %1084 = vrot.lane.b32.xlu0 %v1057_v32, %s5462_s18 }
 0xb3a   :  { %v1087_v48 = vpop.permute.xlu1 %1086 }
 0xb3b   :  { %v1085_v39 = vpop.permute.xlu0 %1084  ;;  %v1096_v42 = vsel %vm1094_vm4, %v1093_v40, %v1087_v48 }
 0xb3c   :  { %v1095_v41 = vsel %vm1094_vm4, %v1092_v38, %v1085_v39 }
 0xb3d   :  { %4566 = vmatprep.mubr.msk.f32.mxu1 %vm138_vm1, %v1095_v41 }
 0xb3e   :  { %4567 = vmatmul.mubr.msk.f32.vlgmr.msra.gmra.mrb[10].mxu1 %vm138_vm1, %v1096_v42  ;;  %v4208_v42 = vld [vmem:[#allocation5 + $0x1b5] ss:$0 sm:$0xff] }
 0xb3f   :  { %4897 = vmatpush3.bf16.msra.mxu1 %v4894_v6 }
 0xb40   :  { %4899 = vmatprep.subr.bf16.mxu1 %v4898_v12 }
 0xb43   :  { %4901 = vmatpush3.bf16.msra.mxu1 %v4898_v12 }
 0xb44   :  { %4903 = vmatprep.subr.bf16.mxu1 %v4902_v15 }
 0xb47   :  { %4905 = vmatpush3.bf16.msra.mxu1 %v4902_v15 }
 0xb48   :  { %4907 = vmatprep.subr.bf16.mxu1 %v4906_v50 }
 0xb4b   :  { %4909 = vmatpush3.bf16.msra.mxu1 %v4906_v50 }
 0xc11   :  { %v4568_v44 = vpop.f32.mrb[10].mxu1 }
 0xc12   :  { %v1195_v11 = vadd.f32 %v4568_v44, %v5513_v10  ;;  %v1185_v45 = vpop.f32.mrb[11].mxu1 }
 0xc13   :  { %v1194_v8 = vadd.f32 %v1185_v45, %v5511_v9 }
 0xc14   :  { %v5678_v46 = vadd.f32 %v4200_v43, %v1195_v11 }
 0xc15   :  { %v5680_v47 = vadd.f32 %v4200_v43, %v1194_v8 }
 0xc16   :  { %v1205_v49 = vsel %vm138_vm1, %v5678_v46, 0.0 }
 0xc17   :  { %1206 = vadd.xlane.f32.xlu1 %v1205_v49  ;;  %v1202_v52 = vsel %vm138_vm1, %v5680_v47, 0.0 }
 0xc18   :  { %1203 = vadd.xlane.f32.xlu0 %v1202_v52 }
 0xca4   :  { %v1207_v53 = vpop.xlane.xlu1 %1206 }
 0xca5   :  { %v1209_v54 = vmul.f32 0.03125, %v1207_v53  ;;  %v1204_v55 = vpop.xlane.xlu0 %1203 }
 0xca6   :  { %v1208_v56 = vmul.f32 0.03125, %v1204_v55 }
 0xca7   :  { %v1211_v10 = vsub.f32 %v5678_v46, %v1209_v54 }
 0xca8   :  { %v1210_v9 = vsub.f32 %v5680_v47, %v1208_v56 }
 0xca9   :  { %v1213_v60 = vmul.f32 %v1211_v10, %v1211_v10 }
 0xcaa   :  { %v1212_v57 = vmul.f32 %v1210_v9, %v1210_v9 }
 0xcab   :  { %v1217_v61 = vsel %vm138_vm1, %v1213_v60, 0.0 }
 0xcac   :  { %v1214_v59 = vsel %vm138_vm1, %v1212_v57, 0.0 }
 0xcad   :  { %1215 = vadd.xlane.f32.xlu0 %v1214_v59 }
 0xcb1   :  { %1218 = vadd.xlane.f32.xlu0 %v1217_v61  ;;  %v5708_v61 = vld [vmem:[#allocation5 + $0x30] sm:$0xff] }
 0xcb2   :  { %v4910_v1 = vpack.c.bf16 %v5710_v62, %v5708_v61 }
 0xcb4   :  { %4911 = vmatprep.subr.bf16.mxu0 %v4910_v1 }
 0xd3a   :  { %v1216_v16 = vpop.xlane.xlu0 %1215 }
 0xd3b   :  { %v1220_v17 = vmul.f32 0.03125, %v1216_v16 }
 0xd3d   :  { %v1222_v18 = vadd.f32 1e-05, %v1220_v17  ;;  %v4210_v17 = vld [vmem:[#allocation5 + $0x1b9] ss:$0 sm:$0xff] }
 0xd3e   :  { %v1219_v19 = vpop.xlane.xlu0 %1218 }
 0xd3f   :  { %5283 = vrsqrt.f32 %v1222_v18  ;;  %v1221_v20 = vmul.f32 0.03125, %v1219_v19 }
 0xd41   :  { %v1223_v21 = vadd.f32 1e-05, %v1221_v20 }
 0xd43   :  { %5285 = vrsqrt.f32 %v1223_v21 }
 0xd49   :  { %v5284_v22 = vpop.eup %5283 }
 0xd4a   :  { %v1226_v29 = vmul.f32 %v5284_v22, %v1210_v9  ;;  %v4211_v22 = vld [vmem:[#allocation5 + $0x1bf] ss:$0 sm:$0xff] }
 0xd4c   :  { %v1232_v24 = vmul.f32 %v4201_v27, %v1226_v29 }
 0xd4d   :  { %v5286_v26 = vpop.eup %5285 }
 0xd4e   :  { %v1227_v30 = vmul.f32 %v5286_v26, %v1211_v10  ;;  %v1238_v31 = vadd.f32 %v4202_v23, %v1232_v24 }
 0xd50   :  { %v1233_v32 = vmul.f32 %v4201_v27, %v1227_v30  ;;  %4577 = vmatprep.mubr.msk.f32.mxu0 %vm138_vm1, %v1238_v31 }
 0xd52   :  { %v1239_v33 = vadd.f32 %v4202_v23, %v1233_v32 }
 0xd54   :  { %4578 = vmatmul.mubr.msk.f32.vlgmr.msra.gmra.mrb[10].mxu0 %vm138_vm1, %v1239_v33 }
 0xd55   :  { %4913 = vmatpush3.bf16.msra.mxu0 %v4910_v1 }
 0xd56   :  { %4915 = vmatprep.subr.bf16.mxu0 %v4914_v51 }
 0xd59   :  { %4917 = vmatpush3.bf16.msra.mxu0 %v4914_v51 }
 0xe27   :  { %v4579_v48 = vpop.f32.mrb[10].mxu0 }
 0xe28   :  { %v1334_v37 = vadd.f32 %v4579_v48, %v4203_v36  ;;  %v1328_v38 = vpop.f32.mrb[11].mxu0 }
 0xe29   :  { %v1329_v39 = vadd.f32 %v4203_v36, %v1328_v38 }
 0xe2a   :  { %v1338_v41 = vmax.f32 %v1334_v37, 0.0 }
 0xe2b   :  { %v1337_v40 = vmax.f32 %v1329_v39, 0.0 }
 0xe2d   :  { %4596 = vmatprep.mubr.msk.f32.mxu1 %vm1339_vm5, %v1337_v40 }
 0xe2e   :  { %4597 = vmatmul.mubr.msk.f32.vlgmr.msra.gmra.mrb[12].mxu1 %vm1339_vm5, %v1338_v41 }
 0xf01   :  { %v4598_v43 = vpop.f32.mrb[12].mxu1 }
 0xf02   :  { %v1422_v44 = vadd.f32 %v4598_v43, %v5678_v46  ;;  %v1412_v11 = vpop.f32.mrb[13].mxu1 }
 0xf03   :  { %v1421_v45 = vadd.f32 %v1412_v11, %v5680_v47 }
 0xf04   :  { %v5696_v8 = vadd.f32 %v4208_v42, %v1422_v44 }
 0xf05   :  { %v5698_v49 = vadd.f32 %v4208_v42, %v1421_v45 }
 0xf06   :  { %v1440_v52 = vsel %vm138_vm1, %v5696_v8, 0.0 }
 0xf07   :  { %1441 = vadd.xlane.f32.xlu1 %v1440_v52  ;;  %v1437_v53 = vsel %vm138_vm1, %v5698_v49, 0.0 }
 0xf08   :  { %1438 = vadd.xlane.f32.xlu0 %v1437_v53 }
 0xf94   :  { %v1442_v54 = vpop.xlane.xlu1 %1441 }
 0xf95   :  { %v1444_v55 = vmul.f32 0.03125, %v1442_v54  ;;  %v1439_v56 = vpop.xlane.xlu0 %1438 }
 0xf96   :  { %v1443_v10 = vmul.f32 0.03125, %v1439_v56 }
 0xf97   :  { %v1446_v46 = vsub.f32 %v5696_v8, %v1444_v55 }
 0xf98   :  { %v1445_v47 = vsub.f32 %v5698_v49, %v1443_v10 }
 0xf99   :  { %v1448_v9 = vmul.f32 %v1446_v46, %v1446_v46 }
 0xf9a   :  { %v1447_v57 = vmul.f32 %v1445_v47, %v1445_v47 }
 0xf9b   :  { %v1452_v59 = vsel %vm138_vm1, %v1448_v9, 0.0 }
 0xf9c   :  { %1453 = vadd.xlane.f32.xlu1 %v1452_v59  ;;  %v1449_v60 = vsel %vm138_vm1, %v1447_v57, 0.0 }
 0xf9d   :  { %1450 = vadd.xlane.f32.xlu0 %v1449_v60 }
0x1029   :  { %v1454_v4 = vpop.xlane.xlu1 %1453 }
0x102a   :  { %v1456_v5 = vmul.f32 0.03125, %v1454_v4  ;;  %v1451_v25 = vpop.xlane.xlu0 %1450 }
0x102b   :  { %v1455_v28 = vmul.f32 0.03125, %v1451_v25 }
0x102c   :  { %v1458_v6 = vadd.f32 1e-05, %v1456_v5 }
0x102d   :  { %v1457_v7 = vadd.f32 1e-05, %v1455_v28 }
0x102e   :  { %5287 = vrsqrt.f32 %v1458_v6 }
0x102f   :  { %5289 = vrsqrt.f32 %v1457_v7 }
0x1038   :  { %v5288_v12 = vpop.eup %5287 }
0x1039   :  { %v5290_v14 = vpop.eup %5289  ;;  %v1462_v15 = vmul.f32 %v5288_v12, %v1446_v46 }
0x103a   :  { %v1461_v16 = vmul.f32 %v5290_v14, %v1445_v47 }
0x103b   :  { %v1468_v18 = vmul.f32 %v4209_v13, %v1462_v15 }
0x103c   :  { %v1467_v19 = vmul.f32 %v4209_v13, %v1461_v16 }
0x103d   :  { %v1474_v21 = vadd.f32 %v4210_v17, %v1468_v18 }
0x103e   :  { %v1473_v20 = vadd.f32 %v4210_v17, %v1467_v19 }
0x1040   :  { %4607 = vmatprep.mubr.msk.f32.mxu0 %vm138_vm1, %v1473_v20 }
0x1041   :  { %4608 = vmatmul.mubr.msk.f32.vlgmr.msra.gmra.mrb[12].mxu0 %vm138_vm1, %v1474_v21 }
0x1114   :  { %v4609_v27 = vpop.f32.mrb[12].mxu0 }
0x1115   :  { %v5722_v29 = vadd.f32 %v4609_v27, %v4211_v22  ;;  %v1555_v23 = vpop.f32.mrb[13].mxu0 }
0x1116   :  { %v5724_v24 = vadd.f32 %v4211_v22, %v1555_v23 }
0x1118   :  { %4614 = vmatprep.mubr.msk.f32.mxu0 %vm273_vm2, %v5724_v24  ;;  %v5730_v26 = vpack.i.bf16 %v5722_v29, %v5724_v24 }
0x111a   :  { %5153 = vrot.lane.b32.xlu1 %v5730_v26, %s5449_s1  ;;  %5148 = vrot.lane.b32.xlu0 %v5730_v26, %s5450_s6 }
0x111e   :  { %1762 = vrot.lane.b32.xlu1 %v5724_v24, %s5451_s7 }
0x1122   :  { %1764 = vrot.lane.b32.xlu1 %v5722_v29, %s5451_s7 }
0x118c   :  { %v5154_v30 = vpop.permute.xlu1 %5153  ;;  %v5149_v31 = vpop.permute.xlu0 %5148 }
0x118d   :  { %v5156_v32 = vunpack.i.h.bf16 %v5154_v30  ;;  %v5155_v33 = vunpack.i.l.bf16 %v5154_v30  ;;  %v5151_v34 = vunpack.i.h.bf16 %v5149_v31  ;;  %v5150_v35 = vunpack.i.l.bf16 %v5149_v31 }
0x118f   :  { %v4918_v50 = vpack.c.bf16 %v5151_v34, %v5150_v35  ;;  %v4928_v36 = vpack.c.bf16 %v5156_v32, %v5155_v33 }
0x1190   :  { %v1763_v48 = vpop.permute.xlu1 %1762 }
0x1191   :  { %4920 = vmatprep.subr.msk.bf16.mxu0 %vm5559_vm3, %v4918_v50 }
0x1192   :  { %4923 = vmatpush3.bf16.xpose.msk.msra.mxu0 %vm5559_vm3, %v4918_v50 }
0x1193   :  { %4930 = vmatprep.subr.msk.bf16.mxu0 %vm5559_vm3, %v4928_v36 }
0x1194   :  { %v1765_v37 = vpop.permute.xlu1 %1764 }
0x1199   :  { %4615 = vmatmul.mubr.msk.f32.vlgmr.msra.gmra.mrb[14].mxu0 %vm273_vm2, %v5722_v29 }
0x119a   :  { %4933 = vmatpush3.bf16.xpose.msk.msra.mxu0 %vm5559_vm3, %v4928_v36  ;;  %4628 = vmatprep.mubr.msk.f32.mxu0 %vm273_vm2, %v1763_v48 }
0x11a1   :  { %4629 = vmatmul.mubr.msk.f32.vlgmr.msra.gmra.mrb[16].mxu0 %vm273_vm2, %v1765_v37 }
0x126c   :  { %v4616_v38 = vpop.f32.mrb[14].mxu0 }
0x126d   :  { %v1650_v39 = vadd.f32 %v4616_v38, %v5575_v63  ;;  %v1644_v40 = vpop.f32.mrb[15].mxu0 }
0x126e   :  { %v1645_v41 = vadd.f32 %v1644_v40, %v5577_v0 }
0x126f   :  { %v1656_v42 = vsel %vm48_vm0, %v1650_v39, -inf }
0x1270   :  { %1657 = vmax.xlane.f32.xlu1 %v1656_v42  ;;  %v1653_v43 = vsel %vm48_vm0, %v1645_v41, -inf }
0x1271   :  { %1654 = vmax.xlane.f32.xlu0 %v1653_v43 }
0x1274   :  { %v4630_v44 = vpop.f32.mrb[16].mxu0 }
0x1275   :  { %v1844_v11 = vpop.f32.mrb[17].mxu0  ;;  %v1850_v52 = vadd.f32 %v4630_v44, %v5575_v63 }
0x1276   :  { %v1845_v45 = vadd.f32 %v1844_v11, %v5577_v0 }
0x1277   :  { %v1856_v54 = vsel %vm48_vm0, %v1850_v52, -inf }
0x1278   :  { %v1853_v53 = vsel %vm48_vm0, %v1845_v45, -inf }
0x1279   :  { %1854 = vmax.xlane.f32.xlu0 %v1853_v53 }
0x127d   :  { %1857 = vmax.xlane.f32.xlu0 %v1856_v54 }
0x12fd   :  { %v1658_v55 = vpop.xlane.xlu1 %1657 }
0x12fe   :  { %v1660_v56 = vsub.f32 %v1650_v39, %v1658_v55  ;;  %v1655_v10 = vpop.xlane.xlu0 %1654 }
0x12ff   :  { %v1659_v46 = vsub.f32 %v1645_v41, %v1655_v10 }
0x1300   :  { %v1663_v47 = vmul.f32 1.442695, %v1660_v56 }
0x1301   :  { %v1661_v9 = vmul.f32 1.442695, %v1659_v46 }
0x1302   :  { %5291 = vpow2.f32 %v1663_v47 }
0x1303   :  { %5293 = vpow2.f32 %v1661_v9 }
0x1306   :  { %v1855_v57 = vpop.xlane.xlu0 %1854 }
0x1307   :  { %v1859_v59 = vsub.f32 %v1845_v45, %v1855_v57 }
0x1309   :  { %v1861_v60 = vmul.f32 1.442695, %v1859_v59 }
0x130a   :  { %v1858_v1 = vpop.xlane.xlu0 %1857 }
0x130b   :  { %5295 = vpow2.f32 %v1861_v60  ;;  %v1860_v51 = vsub.f32 %v1850_v52, %v1858_v1 }
0x130c   :  { %v5292_v4 = vpop.eup %5291 }
0x130d   :  { %v5294_v5 = vpop.eup %5293  ;;  %v1863_v25 = vmul.f32 1.442695, %v1860_v51  ;;  %v1668_v28 = vsel %vm48_vm0, %v5292_v4, 0.0 }
0x130e   :  { %1669 = vadd.xlane.f32.xlu1 %v1668_v28  ;;  %v1665_v6 = vsel %vm48_vm0, %v5294_v5, 0.0 }
0x130f   :  { %5297 = vpow2.f32 %v1863_v25  ;;  %1666 = vadd.xlane.f32.xlu0 %v1665_v6 }
0x1315   :  { %v5296_v7 = vpop.eup %5295 }
0x1316   :  { %v1865_v12 = vsel %vm48_vm0, %v5296_v7, 0.0 }
0x1317   :  { %1866 = vadd.xlane.f32.xlu0 %v1865_v12 }
0x1319   :  { %v5298_v13 = vpop.eup %5297 }
0x131a   :  { %v1868_v14 = vsel %vm48_vm0, %v5298_v13, 0.0 }
0x131b   :  { %1869 = vadd.xlane.f32.xlu1 %v1868_v14 }
0x132c   :  { %5163 = vrot.lane.b32.xlu1 %v5730_v26, %s5452_s8 }
0x132d   :  { %5158 = vrot.lane.b32.xlu0 %v5730_v26, %s5453_s9 }
0x1330   :  { %5168 = vrot.lane.b32.xlu1 %v5730_v26, %s5454_s10 }
0x1331   :  { %1964 = vrot.lane.b32.xlu0 %v5722_v29, %s5455_s11 }
0x1334   :  { %1962 = vrot.lane.b32.xlu1 %v5724_v24, %s5455_s11 }
0x139b   :  { %v1670_v16 = vpop.xlane.xlu1 %1669 }
0x139c   :  { %v1667_v15 = vpop.xlane.xlu0 %1666 }
0x139d   :  { %5299 = vrcp.f32 %v1667_v15 }
0x139e   :  { %5301 = vrcp.f32 %v1670_v16 }
0x13a4   :  { %v1867_v17 = vpop.xlane.xlu0 %1866 }
0x13a5   :  { %5303 = vrcp.f32 %v1867_v17 }
0x13a7   :  { %v5300_v18 = vpop.eup %5299 }
0x13a8   :  { %v1870_v19 = vpop.xlane.xlu1 %1869  ;;  %v5159_v20 = vpop.permute.xlu0 %5158  ;;  %v1673_v21 = vmul.f32 %v5300_v18, %v5294_v5 }
0x13a9   :  { %5305 = vrcp.f32 %v1870_v19  ;;  %v5161_v22 = vunpack.i.h.bf16 %v5159_v20  ;;  %v5160_v27 = vunpack.i.l.bf16 %v5159_v20  ;;  %v5302_v30 = vpop.eup %5301 }
0x13aa   :  { %4621 = vmatprep.mubr.msk.f32.mxu1 %vm48_vm0, %v1673_v21  ;;  %v1674_v35 = vmul.f32 %v5302_v30, %v5292_v4 }
0x13ab   :  { %v4924_v23 = vpack.c.bf16 %v5161_v22, %v5160_v27 }
0x13ac   :  { %v5164_v31 = vpop.permute.xlu1 %5163  ;;  %v1965_v43 = vpop.permute.xlu0 %1964 }
0x13ad   :  { %v5166_v32 = vunpack.i.h.bf16 %v5164_v31  ;;  %v5165_v33 = vunpack.i.l.bf16 %v5164_v31  ;;  %4925 = vmatprep.subr.bf16.mxu1 %v4924_v23 }
0x13ae   :  { %4927 = vmatpush3.bf16.msra.mxu1 %v4924_v23  ;;  %v5814_v23 = vld [vmem:[#allocation5 + $0x1d8] sm:$0xff] }
0x13af   :  { %v5304_v34 = vpop.eup %5303  ;;  %v4934_v50 = vpack.c.bf16 %v5166_v32, %v5165_v33  ;;  %v5817_v32 = vld [vmem:[#allocation5 + $0x1d0] sm:$0xff] }
0x13b0   :  { %v5169_v36 = vpop.permute.xlu1 %5168  ;;  %v1873_v48 = vmul.f32 %v5304_v34, %v5296_v7 }
0x13b1   :  { %v5171_v37 = vunpack.i.h.bf16 %v5169_v36  ;;  %v5170_v38 = vunpack.i.l.bf16 %v5169_v36  ;;  %4622 = vmatmul.mubr.msk.f32.vlgmr.msra.gmra.mrb[14].mxu1 %vm48_vm0, %v1674_v35  ;;  %4935 = vmatprep.subr.bf16.mxu1 %v4934_v50 }
0x13b2   :  { %4937 = vmatpush3.bf16.msra.mxu1 %v4934_v50  ;;  %4635 = vmatprep.mubr.msk.f32.mxu1 %vm48_vm0, %v1873_v48  ;;  %v5192_v50 = vpack.i.bf16 %v5716_v3, %v5714_v2 }
0x13b3   :  { %v5306_v39 = vpop.eup %5305  ;;  %v4938_v40 = vpack.c.bf16 %v5171_v37, %v5170_v38 }
0x13b4   :  { %v1874_v41 = vmul.f32 %v5306_v39, %v5298_v13  ;;  %v1963_v42 = vpop.permute.xlu1 %1962 }
0x13b5   :  { %4940 = vmatprep.subr.msk.bf16.mxu1 %vm5559_vm3, %v4938_v40 }
0x13b6   :  { %4636 = vmatmul.mubr.msk.f32.vlgmr.msra.gmra.mrb[16].mxu1 %vm48_vm0, %v1874_v41 }
0x13b7   :  { %4642 = vmatprep.mubr.msk.f32.mxu1 %vm273_vm2, %v1963_v42 }
0x13bb   :  { %4943 = vmatpush3.bf16.xpose.msk.msra.mxu1 %vm5559_vm3, %v4938_v40 }
0x13c2   :  { %4643 = vmatmul.mubr.msk.f32.vlgmr.msra.gmra.mrb[18].mxu1 %vm273_vm2, %v1965_v43 }
0x1484   :  { %v5784_v44 = vpop.f32.mrb[14].mxu1 }
0x1485   :  { %v5786_v11 = vpop.f32.mrb[15].mxu1 }
0x1489   :  { %v5788_v45 = vpop.f32.mrb[16].mxu1 }
0x148a   :  { %v5790_v52 = vpop.f32.mrb[17].mxu1 }
0x1495   :  { %v4644_v53 = vpop.f32.mrb[18].mxu1 }
0x1496   :  { %v2050_v54 = vadd.f32 %v4644_v53, %v5575_v63  ;;  %v2044_v55 = vpop.f32.mrb[19].mxu1  ;;  %v5187_v53 = vpack.i.bf16 %v5710_v62, %v5708_v61 }
0x1497   :  { %v2045_v56 = vadd.f32 %v2044_v55, %v5577_v0 }
0x1498   :  { %v2056_v10 = vsel %vm48_vm0, %v2050_v54, -inf }
0x1499   :  { %2057 = vmax.xlane.f32.xlu0 %v2056_v10  ;;  %v2053_v46 = vsel %vm48_vm0, %v2045_v56, -inf }
0x149a   :  { %2054 = vmax.xlane.f32.xlu1 %v2053_v46 }
0x14ab   :  { %5173 = vrot.lane.b32.xlu1 %v5730_v26, %s5456_s12 }
0x14af   :  { %2162 = vrot.lane.b32.xlu1 %v5724_v24, %s5457_s13 }
0x14b3   :  { %2164 = vrot.lane.b32.xlu1 %v5722_v29, %s5457_s13 }
0x1526   :  { %v2058_v47 = vpop.xlane.xlu0 %2057 }
0x1527   :  { %v2060_v63 = vsub.f32 %v2050_v54, %v2058_v47  ;;  %v2055_v9 = vpop.xlane.xlu1 %2054 }
0x1528   :  { %v2059_v57 = vsub.f32 %v2045_v56, %v2055_v9 }
0x1529   :  { %v2063_v0 = vmul.f32 1.442695, %v2060_v63 }
0x152a   :  { %v2061_v59 = vmul.f32 1.442695, %v2059_v57 }
0x152b   :  { %5307 = vpow2.f32 %v2063_v0  ;;  %v5174_v60 = vpop.permute.xlu1 %5173 }
0x152c   :  { %v5176_v1 = vunpack.i.h.bf16 %v5174_v60  ;;  %v5175_v51 = vunpack.i.l.bf16 %v5174_v60  ;;  %5309 = vpow2.f32 %v2061_v59 }
0x152e   :  { %v4944_v4 = vpack.c.bf16 %v5176_v1, %v5175_v51 }
0x152f   :  { %v2163_v19 = vpop.permute.xlu1 %2162 }
0x1530   :  { %4945 = vmatprep.subr.bf16.mxu0 %v4944_v4 }
0x1531   :  { %4947 = vmatpush3.bf16.msra.mxu0 %v4944_v4 }
0x1533   :  { %v2165_v20 = vpop.permute.xlu1 %2164 }
0x1535   :  { %v5308_v5 = vpop.eup %5307 }
0x1536   :  { %v2068_v24 = vsel %vm48_vm0, %v5308_v5, 0.0  ;;  %v5310_v25 = vpop.eup %5309 }
0x1537   :  { %2069 = vadd.xlane.f32.xlu0 %v2068_v24  ;;  %v2065_v29 = vsel %vm48_vm0, %v5310_v25, 0.0 }
0x153b   :  { %2066 = vadd.xlane.f32.xlu0 %v2065_v29 }
0x1551   :  { %5178 = vrot.lane.b32.xlu0 %v5730_v26, %s5458_s14 }
0x15c4   :  { %v2070_v28 = vpop.xlane.xlu0 %2069 }
0x15c5   :  { %5311 = vrcp.f32 %v2070_v28 }
0x15c8   :  { %v2067_v6 = vpop.xlane.xlu0 %2066 }
0x15c9   :  { %5313 = vrcp.f32 %v2067_v6 }
0x15cc   :  { %v5179_v7 = vpop.permute.xlu0 %5178 }
0x15cd   :  { %v5181_v12 = vunpack.i.h.bf16 %v5179_v7  ;;  %v5180_v13 = vunpack.i.l.bf16 %v5179_v7 }
0x15cf   :  { %v4948_v14 = vpack.c.bf16 %v5181_v12, %v5180_v13  ;;  %v5312_v15 = vpop.eup %5311 }
0x15d0   :  { %v2074_v18 = vmul.f32 %v5312_v15, %v5308_v5 }
0x15d1   :  { %4950 = vmatprep.subr.msk.bf16.mxu0 %vm5559_vm3, %v4948_v14 }
0x15d3   :  { %v5314_v16 = vpop.eup %5313 }
0x15d4   :  { %v2073_v17 = vmul.f32 %v5314_v16, %v5310_v25  ;;  %v4240_v16 = vld [vmem:[#allocation5 + $0x1be] ss:$0 sm:$0xff] }
0x15d6   :  { %4649 = vmatprep.mubr.msk.f32.mxu0 %vm48_vm0, %v2073_v17 }
0x15d7   :  { %4650 = vmatmul.mubr.msk.f32.vlgmr.msra.gmra.mrb[18].mxu0 %vm48_vm0, %v2074_v18 }
0x15d8   :  { %4953 = vmatpush3.bf16.xpose.msk.msra.mxu0 %vm5559_vm3, %v4948_v14  ;;  %4656 = vmatprep.mubr.msk.f32.mxu0 %vm273_vm2, %v2163_v19 }
0x15df   :  { %4657 = vmatmul.mubr.msk.f32.vlgmr.msra.gmra.mrb[20].mxu0 %vm273_vm2, %v2165_v20 }
0x16aa   :  { %v4651_v21 = vpop.f32.mrb[18].mxu0 }
0x16ab   :  { %v2153_v22 = vpop.f32.mrb[19].mxu0 }
0x16b2   :  { %v4658_v27 = vpop.f32.mrb[20].mxu0 }
0x16b3   :  { %v2250_v30 = vadd.f32 %v5814_v23, %v4658_v27  ;;  %v2244_v31 = vpop.f32.mrb[21].mxu0 }
0x16b4   :  { %v2245_v33 = vadd.f32 %v5817_v32, %v2244_v31 }
0x16b5   :  { %v2256_v34 = vsel %vm48_vm0, %v2250_v30, -inf }
0x16b6   :  { %2257 = vmax.xlane.f32.xlu0 %v2256_v34  ;;  %v2253_v35 = vsel %vm48_vm0, %v2245_v33, -inf }
0x16b7   :  { %2254 = vmax.xlane.f32.xlu1 %v2253_v35 }
0x16c8   :  { %5183 = vrot.lane.b32.xlu1 %v5730_v26, %s5459_s15 }
0x16cc   :  { %5193 = vrot.lane.b32.xlu1 %v5192_v50, %s5460_s16 }
0x16d0   :  { %2364 = vrot.lane.b32.xlu1 %v5790_v52, %s5447_s20 }
0x16d4   :  { %2366 = vrot.lane.b32.xlu1 %v5788_v45, %s5447_s20 }
0x16d8   :  { %2374 = vrot.lane.b32.xlu1 %v4651_v21, %s5461_s17 }
0x1743   :  { %v2258_v36 = vpop.xlane.xlu0 %2257 }
0x1744   :  { %v2260_v48 = vsub.f32 %v2250_v30, %v2258_v36  ;;  %v2255_v37 = vpop.xlane.xlu1 %2254 }
0x1745   :  { %v2259_v38 = vsub.f32 %v2245_v33, %v2255_v37  ;;  %v2536_v37 = vld [vmem:[#allocation5 + $0x98] sm:$0xff] }
0x1746   :  { %v2263_v39 = vmul.f32 1.442695, %v2260_v48  ;;  %v2535_v48 = vld [vmem:[#allocation5 + $0x90] sm:$0xff] }
0x1747   :  { %v2261_v40 = vmul.f32 1.442695, %v2259_v38  ;;  %v4966_v38 = vpack.c.bf16 %v2536_v37, %v2535_v48  ;;  %v5886_v48 = vld [vmem:[#allocation5 + $0x58] sm:$0xff] }
0x1748   :  { %v5184_v26 = vpop.permute.xlu1 %5183 }
0x1749   :  { %5315 = vpow2.f32 %v2261_v40  ;;  %v5186_v41 = vunpack.i.h.bf16 %v5184_v26  ;;  %v5185_v2 = vunpack.i.l.bf16 %v5184_v26  ;;  %4967 = vmatprep.subr.bf16.mxu0 %v4966_v38  ;;  %v2538_v40 = vld [vmem:[#allocation5 + $0xa8] sm:$0xff] }
0x174a   :  { %5317 = vpow2.f32 %v2263_v39  ;;  %4969 = vmatpush3.bf16.msra.mxu0 %v4966_v38  ;;  %v2537_v39 = vld [vmem:[#allocation5 + $0xa0] sm:$0xff] }
0x174b   :  { %v4954_v3 = vpack.c.bf16 %v5186_v41, %v5185_v2  ;;  %v4970_v26 = vpack.c.bf16 %v2538_v40, %v2537_v39  ;;  %v2539_v41 = vld [vmem:[#allocation5 + $0x110] sm:$0xff]  ;;  %v2540_v2 = vld [vmem:[#allocation5 + $0x118] sm:$0xff]  ;;  %v5892_v39 = vld [vmem:[#allocation5 + $0x60] sm:$0xff] }
0x174c   :  { %v5194_v63 = vpop.permute.xlu1 %5193  ;;  %v5894_v40 = vld [vmem:[#allocation5 + $0x68] sm:$0xff] }
0x174d   :  { %4955 = vmatprep.subr.bf16.mxu1 %v4954_v3  ;;  %v5196_v57 = vunpack.i.h.bf16 %v5194_v63  ;;  %v5195_v0 = vunpack.i.l.bf16 %v5194_v63  ;;  %4971 = vmatprep.subr.bf16.mxu0 %v4970_v26 }
0x174e   :  { %4957 = vmatpush3.bf16.msra.mxu1 %v4954_v3  ;;  %4973 = vmatpush3.bf16.msra.mxu0 %v4970_v26  ;;  %v2541_v3 = vld [vmem:[#allocation5 + $0x120] sm:$0xff]  ;;  %v5242_v26 = vpack.i.bf16 %v5894_v40, %v5892_v39 }
0x174f   :  { %v4962_v62 = vpack.c.bf16 %v5196_v57, %v5195_v0  ;;  %v4241_v57 = vld [vmem:[#allocation5 + $0x1ba] ss:$0 sm:$0xff] }
0x1750   :  { %v2365_v4 = vpop.permute.xlu1 %2364 }
0x1751   :  { %v2386_v29 = vsel %vm273_vm2, %v5786_v11, %v2365_v4 }
0x1753   :  { %v5316_v42 = vpop.eup %5315 }
0x1754   :  { %v2265_v43 = vsel %vm48_vm0, %v5316_v42, 0.0  ;;  %v5318_v45 = vpop.eup %5317  ;;  %v2367_v5 = vpop.permute.xlu1 %2366 }
0x1755   :  { %2266 = vadd.xlane.f32.xlu0 %v2265_v43  ;;  %v2268_v52 = vsel %vm48_vm0, %v5318_v45, 0.0  ;;  %v2387_v6 = vsel %vm273_vm2, %v5784_v44, %v2367_v5  ;;  %v2542_v43 = vld [vmem:[#allocation5 + $0x128] sm:$0xff]  ;;  %v2545_v5 = vld [vmem:[#allocation5 + $0x140] sm:$0xff] }
0x1758   :  { %v2375_v24 = vpop.permute.xlu1 %2374 }
0x1759   :  { %2269 = vadd.xlane.f32.xlu0 %v2268_v52  ;;  %v2389_v13 = vsel %vm48_vm0, %v2387_v6, %v2375_v24  ;;  %v2543_v52 = vld [vmem:[#allocation5 + $0x130] sm:$0xff]  ;;  %v2546_v24 = vld [vmem:[#allocation5 + $0x148] sm:$0xff] }
0x176f   :  { %5188 = vrot.lane.b32.xlu0 %v5187_v53, %s5460_s16  ;;  %v2544_v53 = vld [vmem:[#allocation5 + $0x138] sm:$0xff] }
0x1773   :  { %2372 = vrot.lane.b32.xlu0 %v2153_v22, %s5461_s17 }
0x17e2   :  { %v2267_v54 = vpop.xlane.xlu0 %2266 }
0x17e3   :  { %5319 = vrcp.f32 %v2267_v54  ;;  %v4982_v54 = vpack.c.bf16 %v2544_v53, %v2543_v52 }
0x17e6   :  { %v2270_v55 = vpop.xlane.xlu0 %2269 }
0x17e7   :  { %5321 = vrcp.f32 %v2270_v55 }
0x17ea   :  { %v5189_v56 = vpop.permute.xlu0 %5188 }
0x17eb   :  { %v5191_v10 = vunpack.i.h.bf16 %v5189_v56  ;;  %v5190_v46 = vunpack.i.l.bf16 %v5189_v56 }
0x17ed   :  { %v5320_v47 = vpop.eup %5319  ;;  %v4958_v9 = vpack.c.bf16 %v5191_v10, %v5190_v46 }
0x17ee   :  { %v2273_v59 = vmul.f32 %v5320_v47, %v5316_v42  ;;  %v2373_v25 = vpop.permute.xlu0 %2372  ;;  %v4974_v42 = vpack.c.bf16 %v2540_v2, %v2539_v41  ;;  %v4994_v41 = vpack.c.bf16 %v5894_v40, %v5892_v39 }
0x17ef   :  { %4959 = vmatprep.subr.bf16.mxu1 %v4958_v9  ;;  %v2388_v7 = vsel %vm48_vm0, %v2386_v29, %v2373_v25  ;;  %v4986_v25 = vpack.c.bf16 %v2546_v24, %v2545_v5  ;;  %v4243_v29 = vld [vmem:[#allocation5 + $0x1bc] ss:$0 sm:$0xff] }
0x17f0   :  { %4663 = vmatprep.mubr.msk.f32.mxu1 %vm48_vm0, %v2273_v59  ;;  %v4242_v59 = vld [vmem:[#allocation5 + $0x1bb] ss:$0 sm:$0xff] }
0x17f1   :  { %v5322_v61 = vpop.eup %5321 }
0x17f2   :  { %v2274_v60 = vmul.f32 %v5322_v61, %v5318_v45  ;;  %v4978_v45 = vpack.c.bf16 %v2542_v43, %v2541_v3 }
0x17f4   :  { %4664 = vmatmul.mubr.msk.f32.vlgmr.msra.gmra.mrb[20].mxu1 %vm48_vm0, %v2274_v60 }
0x17f5   :  { %4961 = vmatpush3.bf16.msra.mxu1 %v4958_v9 }
0x17f6   :  { %4963 = vmatprep.subr.bf16.mxu1 %v4962_v62 }
0x17f9   :  { %4965 = vmatpush3.bf16.msra.mxu1 %v4962_v62 }
0x17fa   :  { %4975 = vmatprep.subr.bf16.mxu1 %v4974_v42 }
0x18c7   :  { %v4665_v1 = vpop.f32.mrb[20].mxu1 }
0x18c8   :  { %2382 = vrot.lane.b32.xlu1 %v4665_v1, %s5462_s18  ;;  %v2353_v51 = vpop.f32.mrb[21].mxu1 }
0x18c9   :  { %2380 = vrot.lane.b32.xlu0 %v2353_v51, %s5462_s18 }
0x193a   :  { %v2383_v28 = vpop.permute.xlu1 %2382 }
0x193b   :  { %v2381_v12 = vpop.permute.xlu0 %2380  ;;  %v2391_v15 = vsel %vm1094_vm4, %v2389_v13, %v2383_v28 }
0x193c   :  { %v2390_v14 = vsel %vm1094_vm4, %v2388_v7, %v2381_v12 }
0x193d   :  { %4674 = vmatprep.mubr.msk.f32.mxu1 %vm138_vm1, %v2390_v14 }
0x193e   :  { %4675 = vmatmul.mubr.msk.f32.vlgmr.msra.gmra.mrb[22].mxu1 %vm138_vm1, %v2391_v15  ;;  %v4248_v15 = vld [vmem:[#allocation5 + $0x1bd] ss:$0 sm:$0xff] }
0x193f   :  { %4977 = vmatpush3.bf16.msra.mxu1 %v4974_v42 }
0x1940   :  { %4979 = vmatprep.subr.bf16.mxu1 %v4978_v45 }
0x1943   :  { %4981 = vmatpush3.bf16.msra.mxu1 %v4978_v45 }
0x1944   :  { %4983 = vmatprep.subr.bf16.mxu1 %v4982_v54 }
0x1947   :  { %4985 = vmatpush3.bf16.msra.mxu1 %v4982_v54  ;;  %v4249_v54 = vld [vmem:[#allocation5 + $0x1c0] ss:$0 sm:$0xff] }
0x1948   :  { %4987 = vmatprep.subr.bf16.mxu1 %v4986_v25 }
0x194b   :  { %4989 = vmatpush3.bf16.msra.mxu1 %v4986_v25 }
0x1a11   :  { %v4676_v17 = vpop.f32.mrb[22].mxu1 }
0x1a12   :  { %v2490_v11 = vadd.f32 %v4676_v17, %v5696_v8  ;;  %v2480_v18 = vpop.f32.mrb[23].mxu1 }
0x1a13   :  { %v2489_v44 = vadd.f32 %v2480_v18, %v5698_v49 }
0x1a14   :  { %v5854_v19 = vadd.f32 %v4240_v16, %v2490_v11 }
0x1a15   :  { %v5856_v20 = vadd.f32 %v4240_v16, %v2489_v44 }
0x1a16   :  { %v2500_v21 = vsel %vm138_vm1, %v5854_v19, 0.0 }
0x1a17   :  { %2501 = vadd.xlane.f32.xlu1 %v2500_v21  ;;  %v2497_v22 = vsel %vm138_vm1, %v5856_v20, 0.0 }
0x1a18   :  { %2498 = vadd.xlane.f32.xlu0 %v2497_v22 }
0x1aa4   :  { %v2502_v27 = vpop.xlane.xlu1 %2501 }
0x1aa5   :  { %v2504_v30 = vmul.f32 0.03125, %v2502_v27  ;;  %v2499_v31 = vpop.xlane.xlu0 %2498 }
0x1aa6   :  { %v2503_v33 = vmul.f32 0.03125, %v2499_v31 }
0x1aa7   :  { %v2506_v8 = vsub.f32 %v5854_v19, %v2504_v30 }
0x1aa8   :  { %v2505_v49 = vsub.f32 %v5856_v20, %v2503_v33 }
0x1aa9   :  { %v2508_v50 = vmul.f32 %v2506_v8, %v2506_v8 }
0x1aaa   :  { %v2507_v34 = vmul.f32 %v2505_v49, %v2505_v49 }
0x1aab   :  { %v2512_v36 = vsel %vm138_vm1, %v2508_v50, 0.0 }
0x1aac   :  { %v2509_v35 = vsel %vm138_vm1, %v2507_v34, 0.0 }
0x1aad   :  { %2510 = vadd.xlane.f32.xlu0 %v2509_v35 }
0x1ab1   :  { %2513 = vadd.xlane.f32.xlu0 %v2512_v36  ;;  %v5884_v36 = vld [vmem:[#allocation5 + $0x50] sm:$0xff] }
0x1ab2   :  { %v4990_v37 = vpack.c.bf16 %v5886_v48, %v5884_v36  ;;  %v5237_v38 = vpack.i.bf16 %v5886_v48, %v5884_v36 }
0x1ab4   :  { %4991 = vmatprep.subr.bf16.mxu0 %v4990_v37 }
0x1b3a   :  { %v2511_v55 = vpop.xlane.xlu0 %2510 }
0x1b3b   :  { %v2515_v56 = vmul.f32 0.03125, %v2511_v55 }
0x1b3d   :  { %v2517_v10 = vadd.f32 1e-05, %v2515_v56 }
0x1b3e   :  { %v2514_v46 = vpop.xlane.xlu0 %2513 }
0x1b3f   :  { %5323 = vrsqrt.f32 %v2517_v10  ;;  %v2516_v47 = vmul.f32 0.03125, %v2514_v46  ;;  %v4250_v46 = vld [vmem:[#allocation5 + $0x1c1] ss:$0 sm:$0xff] }
0x1b41   :  { %v2518_v63 = vadd.f32 1e-05, %v2516_v47 }
0x1b43   :  { %5325 = vrsqrt.f32 %v2518_v63 }
0x1b49   :  { %v5324_v9 = vpop.eup %5323 }
0x1b4a   :  { %v2521_v0 = vmul.f32 %v5324_v9, %v2505_v49 }
0x1b4c   :  { %v2527_v61 = vmul.f32 %v4241_v57, %v2521_v0  ;;  %v4251_v0 = vld [vmem:[#allocation5 + $0x1c7] ss:$0 sm:$0xff] }
0x1b4d   :  { %v5326_v62 = vpop.eup %5325 }
0x1b4e   :  { %v2522_v60 = vmul.f32 %v5326_v62, %v2506_v8  ;;  %v2533_v1 = vadd.f32 %v4242_v59, %v2527_v61 }
0x1b50   :  { %v2528_v51 = vmul.f32 %v4241_v57, %v2522_v60  ;;  %4685 = vmatprep.mubr.msk.f32.mxu0 %vm138_vm1, %v2533_v1 }
0x1b52   :  { %v2534_v4 = vadd.f32 %v4242_v59, %v2528_v51 }
0x1b54   :  { %4686 = vmatmul.mubr.msk.f32.vlgmr.msra.gmra.mrb[22].mxu0 %vm138_vm1, %v2534_v4 }
0x1b55   :  { %4993 = vmatpush3.bf16.msra.mxu0 %v4990_v37 }
0x1b56   :  { %4995 = vmatprep.subr.bf16.mxu0 %v4994_v41 }
0x1b59   :  { %4997 = vmatpush3.bf16.msra.mxu0 %v4994_v41 }
0x1c27   :  { %v4687_v28 = vpop.f32.mrb[22].mxu0 }
0x1c28   :  { %v2629_v6 = vadd.f32 %v4687_v28, %v4243_v29  ;;  %v2623_v7 = vpop.f32.mrb[23].mxu0 }
0x1c29   :  { %v2624_v12 = vadd.f32 %v4243_v29, %v2623_v7 }
0x1c2a   :  { %v2633_v14 = vmax.f32 %v2629_v6, 0.0 }
0x1c2b   :  { %v2632_v13 = vmax.f32 %v2624_v12, 0.0 }
0x1c2d   :  { %4704 = vmatprep.mubr.msk.f32.mxu1 %vm1339_vm5, %v2632_v13 }
0x1c2e   :  { %4705 = vmatmul.mubr.msk.f32.vlgmr.msra.gmra.mrb[24].mxu1 %vm1339_vm5, %v2633_v14 }
0x1d01   :  { %v4706_v16 = vpop.f32.mrb[24].mxu1 }
0x1d02   :  { %v2716_v17 = vadd.f32 %v4706_v16, %v5854_v19  ;;  %v2706_v11 = vpop.f32.mrb[25].mxu1 }
0x1d03   :  { %v2715_v18 = vadd.f32 %v2706_v11, %v5856_v20 }
0x1d04   :  { %v5872_v44 = vadd.f32 %v4248_v15, %v2716_v17 }
0x1d05   :  { %v5874_v21 = vadd.f32 %v4248_v15, %v2715_v18 }
0x1d06   :  { %v2734_v22 = vsel %vm138_vm1, %v5872_v44, 0.0 }
0x1d07   :  { %2735 = vadd.xlane.f32.xlu1 %v2734_v22  ;;  %v2731_v27 = vsel %vm138_vm1, %v5874_v21, 0.0 }
0x1d08   :  { %2732 = vadd.xlane.f32.xlu0 %v2731_v27 }
0x1d94   :  { %v2736_v30 = vpop.xlane.xlu1 %2735 }
0x1d95   :  { %v2738_v31 = vmul.f32 0.03125, %v2736_v30  ;;  %v2733_v33 = vpop.xlane.xlu0 %2732 }
0x1d96   :  { %v2737_v8 = vmul.f32 0.03125, %v2733_v33 }
0x1d97   :  { %v2740_v19 = vsub.f32 %v5872_v44, %v2738_v31 }
0x1d98   :  { %v2739_v20 = vsub.f32 %v5874_v21, %v2737_v8 }
0x1d99   :  { %v2742_v49 = vmul.f32 %v2740_v19, %v2740_v19 }
0x1d9a   :  { %v2741_v34 = vmul.f32 %v2739_v20, %v2739_v20 }
0x1d9b   :  { %v2746_v35 = vsel %vm138_vm1, %v2742_v49, 0.0 }
0x1d9c   :  { %2747 = vadd.xlane.f32.xlu1 %v2746_v35  ;;  %v2743_v50 = vsel %vm138_vm1, %v2741_v34, 0.0 }
0x1d9d   :  { %2744 = vadd.xlane.f32.xlu0 %v2743_v50 }
0x1e29   :  { %v2748_v2 = vpop.xlane.xlu1 %2747 }
0x1e2a   :  { %v2750_v3 = vmul.f32 0.03125, %v2748_v2  ;;  %v2745_v42 = vpop.xlane.xlu0 %2744 }
0x1e2b   :  { %v2749_v43 = vmul.f32 0.03125, %v2745_v42 }
0x1e2c   :  { %v2752_v45 = vadd.f32 1e-05, %v2750_v3 }
0x1e2d   :  { %v2751_v52 = vadd.f32 1e-05, %v2749_v43 }
0x1e2e   :  { %5327 = vrsqrt.f32 %v2752_v45 }
0x1e2f   :  { %5329 = vrsqrt.f32 %v2751_v52 }
0x1e38   :  { %v5328_v53 = vpop.eup %5327 }
0x1e39   :  { %v5330_v55 = vpop.eup %5329  ;;  %v2756_v56 = vmul.f32 %v5328_v53, %v2740_v19 }
0x1e3a   :  { %v2755_v10 = vmul.f32 %v5330_v55, %v2739_v20 }
0x1e3b   :  { %v2762_v47 = vmul.f32 %v4249_v54, %v2756_v56 }
0x1e3c   :  { %v2761_v63 = vmul.f32 %v4249_v54, %v2755_v10 }
0x1e3d   :  { %v2768_v57 = vadd.f32 %v4250_v46, %v2762_v47 }
0x1e3e   :  { %v2767_v9 = vadd.f32 %v4250_v46, %v2761_v63 }
0x1e40   :  { %4715 = vmatprep.mubr.msk.f32.mxu0 %vm138_vm1, %v2767_v9 }
0x1e41   :  { %4716 = vmatmul.mubr.msk.f32.vlgmr.msra.gmra.mrb[24].mxu0 %vm138_vm1, %v2768_v57 }
0x1f14   :  { %v4717_v59 = vpop.f32.mrb[24].mxu0 }
0x1f15   :  { %v5902_v61 = vadd.f32 %v4717_v59, %v4251_v0  ;;  %v2849_v62 = vpop.f32.mrb[25].mxu0 }
0x1f16   :  { %v5904_v60 = vadd.f32 %v4251_v0, %v2849_v62 }
0x1f18   :  { %4722 = vmatprep.mubr.msk.f32.mxu0 %vm273_vm2, %v5904_v60  ;;  %v5910_v1 = vpack.i.bf16 %v5902_v61, %v5904_v60 }
0x1f1a   :  { %5203 = vrot.lane.b32.xlu1 %v5910_v1, %s5449_s1  ;;  %5198 = vrot.lane.b32.xlu0 %v5910_v1, %s5450_s6 }
0x1f1e   :  { %3056 = vrot.lane.b32.xlu1 %v5904_v60, %s5451_s7 }
0x1f22   :  { %3058 = vrot.lane.b32.xlu1 %v5902_v61, %s5451_s7 }
0x1f8c   :  { %v5204_v51 = vpop.permute.xlu1 %5203  ;;  %v5199_v4 = vpop.permute.xlu0 %5198 }
0x1f8d   :  { %v5206_v5 = vunpack.i.h.bf16 %v5204_v51  ;;  %v5205_v24 = vunpack.i.l.bf16 %v5204_v51  ;;  %v5201_v25 = vunpack.i.h.bf16 %v5199_v4  ;;  %v5200_v29 = vunpack.i.l.bf16 %v5199_v4 }
0x1f8f   :  { %v4998_v28 = vpack.c.bf16 %v5201_v25, %v5200_v29  ;;  %v5008_v6 = vpack.c.bf16 %v5206_v5, %v5205_v24 }
0x1f90   :  { %v3057_v7 = vpop.permute.xlu1 %3056 }
0x1f91   :  { %5000 = vmatprep.subr.msk.bf16.mxu0 %vm5559_vm3, %v4998_v28 }
0x1f92   :  { %5003 = vmatpush3.bf16.xpose.msk.msra.mxu0 %vm5559_vm3, %v4998_v28 }
0x1f93   :  { %5010 = vmatprep.subr.msk.bf16.mxu0 %vm5559_vm3, %v5008_v6 }
0x1f94   :  { %v3059_v12 = vpop.permute.xlu1 %3058 }
0x1f99   :  { %4723 = vmatmul.mubr.msk.f32.vlgmr.msra.gmra.mrb[26].mxu0 %vm273_vm2, %v5902_v61 }
0x1f9a   :  { %5013 = vmatpush3.bf16.xpose.msk.msra.mxu0 %vm5559_vm3, %v5008_v6  ;;  %4736 = vmatprep.mubr.msk.f32.mxu0 %vm273_vm2, %v3057_v7 }
0x1fa1   :  { %4737 = vmatmul.mubr.msk.f32.vlgmr.msra.gmra.mrb[28].mxu0 %vm273_vm2, %v3059_v12 }
0x206c   :  { %v4724_v13 = vpop.f32.mrb[26].mxu0 }
0x206d   :  { %v2944_v14 = vadd.f32 %v5814_v23, %v4724_v13  ;;  %v2938_v15 = vpop.f32.mrb[27].mxu0 }
0x206e   :  { %v2939_v16 = vadd.f32 %v5817_v32, %v2938_v15 }
0x206f   :  { %v2950_v17 = vsel %vm48_vm0, %v2944_v14, -inf }
0x2070   :  { %2951 = vmax.xlane.f32.xlu1 %v2950_v17  ;;  %v2947_v11 = vsel %vm48_vm0, %v2939_v16, -inf }
0x2071   :  { %2948 = vmax.xlane.f32.xlu0 %v2947_v11 }
0x2074   :  { %v4738_v18 = vpop.f32.mrb[28].mxu0 }
0x2075   :  { %v3138_v22 = vpop.f32.mrb[29].mxu0  ;;  %v3144_v30 = vadd.f32 %v5814_v23, %v4738_v18 }
0x2076   :  { %v3139_v27 = vadd.f32 %v5817_v32, %v3138_v22 }
0x2077   :  { %v3150_v33 = vsel %vm48_vm0, %v3144_v30, -inf }
0x2078   :  { %v3147_v31 = vsel %vm48_vm0, %v3139_v27, -inf }
0x2079   :  { %3148 = vmax.xlane.f32.xlu0 %v3147_v31 }
0x207d   :  { %3151 = vmax.xlane.f32.xlu0 %v3150_v33 }
0x20fd   :  { %v2952_v8 = vpop.xlane.xlu1 %2951 }
0x20fe   :  { %v2954_v19 = vsub.f32 %v2944_v14, %v2952_v8  ;;  %v2949_v20 = vpop.xlane.xlu0 %2948 }
0x20ff   :  { %v2953_v49 = vsub.f32 %v2939_v16, %v2949_v20 }
0x2100   :  { %v2957_v34 = vmul.f32 1.442695, %v2954_v19 }
0x2101   :  { %v2955_v35 = vmul.f32 1.442695, %v2953_v49 }
0x2102   :  { %5331 = vpow2.f32 %v2957_v34 }
0x2103   :  { %5333 = vpow2.f32 %v2955_v35 }
0x2106   :  { %v3149_v50 = vpop.xlane.xlu0 %3148 }
0x2107   :  { %v3153_v37 = vsub.f32 %v3139_v27, %v3149_v50 }
0x2109   :  { %v3155_v41 = vmul.f32 1.442695, %v3153_v37 }
0x210a   :  { %v3152_v2 = vpop.xlane.xlu0 %3151 }
0x210b   :  { %5335 = vpow2.f32 %v3155_v41  ;;  %v3154_v3 = vsub.f32 %v3144_v30, %v3152_v2 }
0x210c   :  { %v5332_v42 = vpop.eup %5331 }
0x210d   :  { %v5334_v43 = vpop.eup %5333  ;;  %v3157_v45 = vmul.f32 1.442695, %v3154_v3  ;;  %v2962_v52 = vsel %vm48_vm0, %v5332_v42, 0.0 }
0x210e   :  { %2963 = vadd.xlane.f32.xlu1 %v2962_v52  ;;  %v2959_v53 = vsel %vm48_vm0, %v5334_v43, 0.0 }
0x210f   :  { %5337 = vpow2.f32 %v3157_v45  ;;  %2960 = vadd.xlane.f32.xlu0 %v2959_v53 }
0x2115   :  { %v5336_v54 = vpop.eup %5335 }
0x2116   :  { %v3159_v55 = vsel %vm48_vm0, %v5336_v54, 0.0 }
0x2117   :  { %3160 = vadd.xlane.f32.xlu0 %v3159_v55 }
0x2119   :  { %v5338_v56 = vpop.eup %5337 }
0x211a   :  { %v3162_v10 = vsel %vm48_vm0, %v5338_v56, 0.0 }
0x211b   :  { %3163 = vadd.xlane.f32.xlu1 %v3162_v10 }
0x212c   :  { %5213 = vrot.lane.b32.xlu1 %v5910_v1, %s5452_s8 }
0x212d   :  { %5208 = vrot.lane.b32.xlu0 %v5910_v1, %s5453_s9 }
0x2130   :  { %5218 = vrot.lane.b32.xlu1 %v5910_v1, %s5454_s10 }
0x2131   :  { %3258 = vrot.lane.b32.xlu0 %v5902_v61, %s5455_s11 }
0x2134   :  { %3256 = vrot.lane.b32.xlu1 %v5904_v60, %s5455_s11 }
0x219b   :  { %v2964_v47 = vpop.xlane.xlu1 %2963 }
0x219c   :  { %v2961_v46 = vpop.xlane.xlu0 %2960 }
0x219d   :  { %5339 = vrcp.f32 %v2961_v46 }
0x219e   :  { %5341 = vrcp.f32 %v2964_v47 }
0x21a4   :  { %v3161_v63 = vpop.xlane.xlu0 %3160 }
0x21a5   :  { %5343 = vrcp.f32 %v3161_v63 }
0x21a7   :  { %v5340_v9 = vpop.eup %5339 }
0x21a8   :  { %v3164_v57 = vpop.xlane.xlu1 %3163  ;;  %v5209_v0 = vpop.permute.xlu0 %5208  ;;  %v2967_v59 = vmul.f32 %v5340_v9, %v5334_v43 }
0x21a9   :  { %5345 = vrcp.f32 %v3164_v57  ;;  %v5211_v62 = vunpack.i.h.bf16 %v5209_v0  ;;  %v5210_v51 = vunpack.i.l.bf16 %v5209_v0  ;;  %v5342_v5 = vpop.eup %5341 }
0x21aa   :  { %4729 = vmatprep.mubr.msk.f32.mxu1 %vm48_vm0, %v2967_v59  ;;  %v2968_v6 = vmul.f32 %v5342_v5, %v5332_v42 }
0x21ab   :  { %v5004_v4 = vpack.c.bf16 %v5211_v62, %v5210_v51 }
0x21ac   :  { %v5214_v24 = vpop.permute.xlu1 %5213  ;;  %v3259_v22 = vpop.permute.xlu0 %3258 }
0x21ad   :  { %v5216_v25 = vunpack.i.h.bf16 %v5214_v24  ;;  %v5215_v29 = vunpack.i.l.bf16 %v5214_v24  ;;  %5005 = vmatprep.subr.bf16.mxu1 %v5004_v4 }
0x21ae   :  { %5007 = vmatpush3.bf16.msra.mxu1 %v5004_v4 }
0x21af   :  { %v5344_v28 = vpop.eup %5343  ;;  %v5014_v7 = vpack.c.bf16 %v5216_v25, %v5215_v29 }
0x21b0   :  { %v5219_v12 = vpop.permute.xlu1 %5218  ;;  %v3167_v13 = vmul.f32 %v5344_v28, %v5336_v54 }
0x21b1   :  { %v5221_v14 = vunpack.i.h.bf16 %v5219_v12  ;;  %v5220_v15 = vunpack.i.l.bf16 %v5219_v12  ;;  %4730 = vmatmul.mubr.msk.f32.vlgmr.msra.gmra.mrb[26].mxu1 %vm48_vm0, %v2968_v6  ;;  %5015 = vmatprep.subr.bf16.mxu1 %v5014_v7 }
0x21b2   :  { %5017 = vmatpush3.bf16.msra.mxu1 %v5014_v7  ;;  %4743 = vmatprep.mubr.msk.f32.mxu1 %vm48_vm0, %v3167_v13 }
0x21b3   :  { %v5346_v16 = vpop.eup %5345  ;;  %v5018_v17 = vpack.c.bf16 %v5221_v14, %v5220_v15 }
0x21b4   :  { %v3168_v11 = vmul.f32 %v5346_v16, %v5338_v56  ;;  %v3257_v18 = vpop.permute.xlu1 %3256 }
0x21b5   :  { %5020 = vmatprep.subr.msk.bf16.mxu1 %vm5559_vm3, %v5018_v17 }
0x21b6   :  { %4744 = vmatmul.mubr.msk.f32.vlgmr.msra.gmra.mrb[28].mxu1 %vm48_vm0, %v3168_v11 }
0x21b7   :  { %4750 = vmatprep.mubr.msk.f32.mxu1 %vm273_vm2, %v3257_v18 }
0x21bb   :  { %5023 = vmatpush3.bf16.xpose.msk.msra.mxu1 %vm5559_vm3, %v5018_v17 }
0x21c2   :  { %4751 = vmatmul.mubr.msk.f32.vlgmr.msra.gmra.mrb[30].mxu1 %vm273_vm2, %v3259_v22 }
0x2284   :  { %v5964_v27 = vpop.f32.mrb[26].mxu1 }
0x2285   :  { %v5966_v30 = vpop.f32.mrb[27].mxu1 }
0x2289   :  { %v5968_v31 = vpop.f32.mrb[28].mxu1 }
0x228a   :  { %v5970_v33 = vpop.f32.mrb[29].mxu1 }
0x2295   :  { %v4752_v8 = vpop.f32.mrb[30].mxu1 }
0x2296   :  { %v3344_v19 = vadd.f32 %v5814_v23, %v4752_v8  ;;  %v3338_v20 = vpop.f32.mrb[31].mxu1 }
0x2297   :  { %v3339_v49 = vadd.f32 %v5817_v32, %v3338_v20 }
0x2298   :  { %v3350_v34 = vsel %vm48_vm0, %v3344_v19, -inf }
0x2299   :  { %3351 = vmax.xlane.f32.xlu0 %v3350_v34  ;;  %v3347_v35 = vsel %vm48_vm0, %v3339_v49, -inf }
0x229a   :  { %3348 = vmax.xlane.f32.xlu1 %v3347_v35 }
0x22ab   :  { %5223 = vrot.lane.b32.xlu1 %v5910_v1, %s5456_s12 }
0x22af   :  { %3456 = vrot.lane.b32.xlu1 %v5904_v60, %s5457_s13 }
0x22b3   :  { %3458 = vrot.lane.b32.xlu1 %v5902_v61, %s5457_s13 }
0x2326   :  { %v3352_v50 = vpop.xlane.xlu0 %3351 }
0x2327   :  { %v3354_v37 = vsub.f32 %v3344_v19, %v3352_v50  ;;  %v3349_v41 = vpop.xlane.xlu1 %3348 }
0x2328   :  { %v3353_v2 = vsub.f32 %v3339_v49, %v3349_v41 }
0x2329   :  { %v3357_v3 = vmul.f32 1.442695, %v3354_v37 }
0x232a   :  { %v3355_v42 = vmul.f32 1.442695, %v3353_v2 }
0x232b   :  { %5347 = vpow2.f32 %v3357_v3  ;;  %v5224_v43 = vpop.permute.xlu1 %5223 }
0x232c   :  { %v5226_v45 = vunpack.i.h.bf16 %v5224_v43  ;;  %v5225_v52 = vunpack.i.l.bf16 %v5224_v43  ;;  %5349 = vpow2.f32 %v3355_v42 }
0x232e   :  { %v5024_v53 = vpack.c.bf16 %v5226_v45, %v5225_v52 }
0x232f   :  { %v3457_v51 = vpop.permute.xlu1 %3456 }
0x2330   :  { %5025 = vmatprep.subr.bf16.mxu0 %v5024_v53 }
0x2331   :  { %5027 = vmatpush3.bf16.msra.mxu0 %v5024_v53 }
0x2333   :  { %v3459_v4 = vpop.permute.xlu1 %3458 }
0x2335   :  { %v5348_v54 = vpop.eup %5347 }
0x2336   :  { %v3362_v60 = vsel %vm48_vm0, %v5348_v54, 0.0  ;;  %v5350_v55 = vpop.eup %5349 }
0x2337   :  { %3363 = vadd.xlane.f32.xlu0 %v3362_v60  ;;  %v3359_v61 = vsel %vm48_vm0, %v5350_v55, 0.0 }
0x233b   :  { %3360 = vadd.xlane.f32.xlu0 %v3359_v61 }
0x2351   :  { %5228 = vrot.lane.b32.xlu0 %v5910_v1, %s5458_s14 }
0x23c4   :  { %v3364_v56 = vpop.xlane.xlu0 %3363 }
0x23c5   :  { %5351 = vrcp.f32 %v3364_v56 }
0x23c8   :  { %v3361_v10 = vpop.xlane.xlu0 %3360 }
0x23c9   :  { %5353 = vrcp.f32 %v3361_v10 }
0x23cc   :  { %v5229_v46 = vpop.permute.xlu0 %5228 }
0x23cd   :  { %v5231_v47 = vunpack.i.h.bf16 %v5229_v46  ;;  %v5230_v63 = vunpack.i.l.bf16 %v5229_v46  ;;  %v4280_v46 = vld [vmem:[#allocation5 + $0x1c6] ss:$0 sm:$0xff] }
0x23cf   :  { %v5028_v9 = vpack.c.bf16 %v5231_v47, %v5230_v63  ;;  %v5352_v57 = vpop.eup %5351 }
0x23d0   :  { %v3368_v62 = vmul.f32 %v5352_v57, %v5348_v54 }
0x23d1   :  { %5030 = vmatprep.subr.msk.bf16.mxu0 %vm5559_vm3, %v5028_v9 }
0x23d3   :  { %v5354_v0 = vpop.eup %5353 }
0x23d4   :  { %v3367_v59 = vmul.f32 %v5354_v0, %v5350_v55 }
0x23d6   :  { %4757 = vmatprep.mubr.msk.f32.mxu0 %vm48_vm0, %v3367_v59 }
0x23d7   :  { %4758 = vmatmul.mubr.msk.f32.vlgmr.msra.gmra.mrb[30].mxu0 %vm48_vm0, %v3368_v62 }
0x23d8   :  { %5033 = vmatpush3.bf16.xpose.msk.msra.mxu0 %vm5559_vm3, %v5028_v9  ;;  %4764 = vmatprep.mubr.msk.f32.mxu0 %vm273_vm2, %v3457_v51 }
0x23df   :  { %4765 = vmatmul.mubr.msk.f32.vlgmr.msra.gmra.mrb[32].mxu0 %vm273_vm2, %v3459_v4 }
0x24aa   :  { %v4759_v5 = vpop.f32.mrb[30].mxu0 }
0x24ab   :  { %v3447_v24 = vpop.f32.mrb[31].mxu0 }
0x24b2   :  { %v4766_v25 = vpop.f32.mrb[32].mxu0 }
0x24b3   :  { %v3544_v29 = vadd.f32 %v5814_v23, %v4766_v25  ;;  %v3538_v28 = vpop.f32.mrb[33].mxu0 }
0x24b4   :  { %v3539_v6 = vadd.f32 %v5817_v32, %v3538_v28 }
0x24b5   :  { %v3550_v7 = vsel %vm48_vm0, %v3544_v29, -inf }
0x24b6   :  { %3551 = vmax.xlane.f32.xlu0 %v3550_v7  ;;  %v3547_v12 = vsel %vm48_vm0, %v3539_v6, -inf  ;;  %v3830_v7 = vld [vmem:[#allocation5 + $0xb8] sm:$0xff] }
0x24b7   :  { %3548 = vmax.xlane.f32.xlu1 %v3547_v12 }
0x24c8   :  { %5233 = vrot.lane.b32.xlu1 %v5910_v1, %s5459_s15 }
0x24cc   :  { %5243 = vrot.lane.b32.xlu1 %v5242_v26, %s5460_s16 }
0x24d0   :  { %3658 = vrot.lane.b32.xlu1 %v5970_v33, %s5447_s20 }
0x24d4   :  { %3660 = vrot.lane.b32.xlu1 %v5968_v31, %s5447_s20 }
0x24d8   :  { %3668 = vrot.lane.b32.xlu1 %v4759_v5, %s5461_s17 }
0x2543   :  { %v3552_v58 = vpop.xlane.xlu0 %3551 }
0x2544   :  { %v3554_v23 = vsub.f32 %v3544_v29, %v3552_v58  ;;  %v3549_v32 = vpop.xlane.xlu1 %3548  ;;  %v3831_v58 = vld [vmem:[#allocation5 + $0xc0] sm:$0xff] }
0x2545   :  { %v3553_v13 = vsub.f32 %v3539_v6, %v3549_v32  ;;  %v3829_v6 = vld [vmem:[#allocation5 + $0xb0] sm:$0xff] }
0x2546   :  { %v3557_v14 = vmul.f32 1.442695, %v3554_v23  ;;  %v5046_v12 = vpack.c.bf16 %v3830_v7, %v3829_v6  ;;  %v3832_v23 = vld [vmem:[#allocation5 + $0xc8] sm:$0xff] }
0x2547   :  { %v3555_v15 = vmul.f32 1.442695, %v3553_v13  ;;  %v5050_v32 = vpack.c.bf16 %v3832_v23, %v3831_v58  ;;  %v3833_v13 = vld [vmem:[#allocation5 + $0x150] sm:$0xff]  ;;  %v4060_v6 = vld [vmem:[#allocation5 + $0x1a8] sm:$0xff] }
0x2548   :  { %v5234_v1 = vpop.permute.xlu1 %5233  ;;  %5047 = vmatprep.subr.bf16.mxu0 %v5046_v12 }
0x2549   :  { %5355 = vpow2.f32 %v3555_v15  ;;  %v5236_v16 = vunpack.i.h.bf16 %v5234_v1  ;;  %v5235_v17 = vunpack.i.l.bf16 %v5234_v1  ;;  %5049 = vmatpush3.bf16.msra.mxu0 %v5046_v12  ;;  %v3835_v15 = vld [vmem:[#allocation5 + $0x160] sm:$0xff] }
0x254a   :  { %5357 = vpow2.f32 %v3557_v14  ;;  %5051 = vmatprep.subr.bf16.mxu0 %v5050_v32  ;;  %v3834_v14 = vld [vmem:[#allocation5 + $0x158] sm:$0xff] }
0x254b   :  { %v5034_v39 = vpack.c.bf16 %v5236_v16, %v5235_v17  ;;  %v5054_v1 = vpack.c.bf16 %v3834_v14, %v3833_v13  ;;  %v3836_v16 = vld [vmem:[#allocation5 + $0x168] sm:$0xff] }
0x254c   :  { %v5244_v49 = vpop.permute.xlu1 %5243  ;;  %v5058_v17 = vpack.c.bf16 %v3836_v16, %v3835_v15 }
0x254d   :  { %5035 = vmatprep.subr.bf16.mxu1 %v5034_v39  ;;  %v5246_v35 = vunpack.i.h.bf16 %v5244_v49  ;;  %v5245_v50 = vunpack.i.l.bf16 %v5244_v49  ;;  %5053 = vmatpush3.bf16.msra.mxu0 %v5050_v32 }
0x254e   :  { %5037 = vmatpush3.bf16.msra.mxu1 %v5034_v39  ;;  %v3837_v39 = vld [vmem:[#allocation5 + $0x170] sm:$0xff] }
0x254f   :  { %v5042_v48 = vpack.c.bf16 %v5246_v35, %v5245_v50 }
0x2550   :  { %v3659_v3 = vpop.permute.xlu1 %3658 }
0x2551   :  { %v3680_v52 = vsel %vm273_vm2, %v5966_v30, %v3659_v3 }
0x2553   :  { %v5356_v40 = vpop.eup %5355 }
0x2554   :  { %v3559_v26 = vsel %vm48_vm0, %v5356_v40, 0.0  ;;  %v5358_v11 = vpop.eup %5357  ;;  %v3661_v42 = vpop.permute.xlu1 %3660 }
0x2555   :  { %3560 = vadd.xlane.f32.xlu0 %v3559_v26  ;;  %v3562_v18 = vsel %vm48_vm0, %v5358_v11, 0.0  ;;  %v3681_v54 = vsel %vm273_vm2, %v5964_v27, %v3661_v42  ;;  %v4283_v42 = vld [vmem:[#allocation5 + $0x1c4] ss:$0 sm:$0xff] }
0x2558   :  { %v3669_v43 = vpop.permute.xlu1 %3668 }
0x2559   :  { %3563 = vadd.xlane.f32.xlu0 %v3562_v18  ;;  %v3683_v61 = vsel %vm48_vm0, %v3681_v54, %v3669_v43 }
0x256f   :  { %5238 = vrot.lane.b32.xlu0 %v5237_v38, %s5460_s16 }
0x2573   :  { %3666 = vrot.lane.b32.xlu0 %v3447_v24, %s5461_s17 }
0x25e2   :  { %v3561_v22 = vpop.xlane.xlu0 %3560 }
0x25e3   :  { %5359 = vrcp.f32 %v3561_v22 }
0x25e6   :  { %v3564_v31 = vpop.xlane.xlu0 %3563 }
0x25e7   :  { %5361 = vrcp.f32 %v3564_v31 }
0x25ea   :  { %v5239_v33 = vpop.permute.xlu0 %5238 }
0x25eb   :  { %v5241_v8 = vunpack.i.h.bf16 %v5239_v33  ;;  %v5240_v19 = vunpack.i.l.bf16 %v5239_v33 }
0x25ed   :  { %v5360_v20 = vpop.eup %5359  ;;  %v5038_v34 = vpack.c.bf16 %v5241_v8, %v5240_v19 }
0x25ee   :  { %v3567_v37 = vmul.f32 %v5360_v20, %v5356_v40  ;;  %v3667_v45 = vpop.permute.xlu0 %3666  ;;  %v3838_v40 = vld [vmem:[#allocation5 + $0x178] sm:$0xff]  ;;  %v4281_v20 = vld [vmem:[#allocation5 + $0x1c2] ss:$0 sm:$0xff] }
0x25ef   :  { %5039 = vmatprep.subr.bf16.mxu1 %v5038_v34  ;;  %v3682_v60 = vsel %vm48_vm0, %v3680_v52, %v3667_v45  ;;  %v5062_v26 = vpack.c.bf16 %v3838_v40, %v3837_v39  ;;  %v4290_v40 = vld [vmem:[#allocation5 + $0x1c9] ss:$0 sm:$0xff] }
0x25f0   :  { %4771 = vmatprep.mubr.msk.f32.mxu1 %vm48_vm0, %v3567_v37 }
0x25f1   :  { %v5362_v36 = vpop.eup %5361 }
0x25f2   :  { %v3568_v38 = vmul.f32 %v5362_v36, %v5358_v11 }
0x25f4   :  { %4772 = vmatmul.mubr.msk.f32.vlgmr.msra.gmra.mrb[32].mxu1 %vm48_vm0, %v3568_v38 }
0x25f5   :  { %5041 = vmatpush3.bf16.msra.mxu1 %v5038_v34  ;;  %v4282_v34 = vld [vmem:[#allocation5 + $0x1c3] ss:$0 sm:$0xff] }
0x25f6   :  { %5043 = vmatprep.subr.bf16.mxu1 %v5042_v48 }
0x25f9   :  { %5045 = vmatpush3.bf16.msra.mxu1 %v5042_v48 }
0x25fa   :  { %5055 = vmatprep.subr.bf16.mxu1 %v5054_v1 }
0x26c7   :  { %v4773_v41 = vpop.f32.mrb[32].mxu1 }
0x26c8   :  { %3676 = vrot.lane.b32.xlu1 %v4773_v41, %s5462_s18  ;;  %v3647_v2 = vpop.f32.mrb[33].mxu1  ;;  %v3839_v41 = vld [vmem:[#allocation5 + $0x180] sm:$0xff] }
0x26c9   :  { %3674 = vrot.lane.b32.xlu0 %v3647_v2, %s5462_s18  ;;  %v3840_v2 = vld [vmem:[#allocation5 + $0x188] sm:$0xff] }
0x26ca   :  { %v5066_v3 = vpack.c.bf16 %v3840_v2, %v3839_v41 }
0x273a   :  { %v3677_v53 = vpop.permute.xlu1 %3676 }
0x273b   :  { %v3675_v55 = vpop.permute.xlu0 %3674  ;;  %v3685_v10 = vsel %vm1094_vm4, %v3683_v61, %v3677_v53 }
0x273c   :  { %v3684_v56 = vsel %vm1094_vm4, %v3682_v60, %v3675_v55  ;;  %v4288_v55 = vld [vmem:[#allocation5 + $0x1c5] ss:$0 sm:$0xff] }
0x273d   :  { %4782 = vmatprep.mubr.msk.f32.mxu1 %vm138_vm1, %v3684_v56 }
0x273e   :  { %4783 = vmatmul.mubr.msk.f32.vlgmr.msra.gmra.mrb[34].mxu1 %vm138_vm1, %v3685_v10 }
0x273f   :  { %5057 = vmatpush3.bf16.msra.mxu1 %v5054_v1  ;;  %v4289_v1 = vld [vmem:[#allocation5 + $0x1c8] ss:$0 sm:$0xff] }
0x2740   :  { %5059 = vmatprep.subr.bf16.mxu1 %v5058_v17 }
0x2743   :  { %5061 = vmatpush3.bf16.msra.mxu1 %v5058_v17 }
0x2744   :  { %5063 = vmatprep.subr.bf16.mxu1 %v5062_v26 }
0x2747   :  { %5065 = vmatpush3.bf16.msra.mxu1 %v5062_v26 }
0x2748   :  { %5067 = vmatprep.subr.bf16.mxu1 %v5066_v3 }
0x274b   :  { %5069 = vmatpush3.bf16.msra.mxu1 %v5066_v3 }
0x2811   :  { %v4784_v47 = vpop.f32.mrb[34].mxu1 }
0x2812   :  { %v3784_v30 = vadd.f32 %v4784_v47, %v5872_v44  ;;  %v3774_v63 = vpop.f32.mrb[35].mxu1 }
0x2813   :  { %v3783_v27 = vadd.f32 %v3774_v63, %v5874_v21 }
0x2814   :  { %v6032_v9 = vadd.f32 %v4280_v46, %v3784_v30 }
0x2815   :  { %v6034_v57 = vadd.f32 %v4280_v46, %v3783_v27 }
0x2816   :  { %v3794_v0 = vsel %vm138_vm1, %v6032_v9, 0.0 }
0x2817   :  { %3795 = vadd.xlane.f32.xlu1 %v3794_v0  ;;  %v3791_v59 = vsel %vm138_vm1, %v6034_v57, 0.0 }
0x2818   :  { %3792 = vadd.xlane.f32.xlu0 %v3791_v59 }
0x28a4   :  { %v3796_v62 = vpop.xlane.xlu1 %3795 }
0x28a5   :  { %v3798_v51 = vmul.f32 0.03125, %v3796_v62  ;;  %v3793_v4 = vpop.xlane.xlu0 %3792 }
0x28a6   :  { %v3797_v5 = vmul.f32 0.03125, %v3793_v4 }
0x28a7   :  { %v3800_v44 = vsub.f32 %v6032_v9, %v3798_v51 }
0x28a8   :  { %v3799_v21 = vsub.f32 %v6034_v57, %v3797_v5 }
0x28a9   :  { %v3802_v29 = vmul.f32 %v3800_v44, %v3800_v44 }
0x28aa   :  { %v3801_v24 = vmul.f32 %v3799_v21, %v3799_v21 }
0x28ab   :  { %v3806_v28 = vsel %vm138_vm1, %v3802_v29, 0.0 }
0x28ac   :  { %v3803_v25 = vsel %vm138_vm1, %v3801_v24, 0.0  ;;  %v4057_v24 = vld [vmem:[#allocation5 + $0x190] sm:$0xff] }
0x28ad   :  { %3804 = vadd.xlane.f32.xlu0 %v3803_v25  ;;  %v4058_v25 = vld [vmem:[#allocation5 + $0x198] sm:$0xff] }
0x28ae   :  { %v5070_v29 = vpack.c.bf16 %v4058_v25, %v4057_v24 }
0x28b0   :  { %5071 = vmatprep.subr.bf16.mxu0 %v5070_v29 }
0x28b1   :  { %3807 = vadd.xlane.f32.xlu0 %v3806_v28  ;;  %v4059_v28 = vld [vmem:[#allocation5 + $0x1a0] sm:$0xff] }
0x28b2   :  { %v5074_v7 = vpack.c.bf16 %v4060_v6, %v4059_v28 }
0x293a   :  { %v3805_v11 = vpop.xlane.xlu0 %3804 }
0x293b   :  { %v3809_v18 = vmul.f32 0.03125, %v3805_v11 }
0x293d   :  { %v3811_v22 = vadd.f32 1e-05, %v3809_v18 }
0x293e   :  { %v3808_v31 = vpop.xlane.xlu0 %3807 }
0x293f   :  { %5363 = vrsqrt.f32 %v3811_v22  ;;  %v3810_v33 = vmul.f32 0.03125, %v3808_v31  ;;  %v4291_v31 = vld [vmem:[#allocation5 + $0x1ca] ss:$0 sm:$0xff] }
0x2941   :  { %v3812_v8 = vadd.f32 1e-05, %v3810_v33 }
0x2943   :  { %5365 = vrsqrt.f32 %v3812_v8 }
0x2949   :  { %v5364_v19 = vpop.eup %5363 }
0x294a   :  { %v3815_v49 = vmul.f32 %v5364_v19, %v3799_v21 }
0x294c   :  { %v3821_v35 = vmul.f32 %v4281_v20, %v3815_v49 }
0x294d   :  { %v5366_v50 = vpop.eup %5365 }
0x294e   :  { %v3816_v37 = vmul.f32 %v5366_v50, %v3800_v44  ;;  %v3827_v36 = vadd.f32 %v4282_v34, %v3821_v35 }
0x2950   :  { %v3822_v48 = vmul.f32 %v4281_v20, %v3816_v37  ;;  %4793 = vmatprep.mubr.msk.f32.mxu0 %vm138_vm1, %v3827_v36 }
0x2952   :  { %v3828_v38 = vadd.f32 %v4282_v34, %v3822_v48 }
0x2954   :  { %4794 = vmatmul.mubr.msk.f32.vlgmr.msra.gmra.mrb[34].mxu0 %vm138_vm1, %v3828_v38 }
0x2955   :  { %5073 = vmatpush3.bf16.msra.mxu0 %v5070_v29 }
0x2956   :  { %5075 = vmatprep.subr.bf16.mxu0 %v5074_v7 }
0x2959   :  { %5077 = vmatpush3.bf16.msra.mxu0 %v5074_v7 }
0x2a27   :  { %v4795_v43 = vpop.f32.mrb[34].mxu0 }
0x2a28   :  { %v3923_v45 = vadd.f32 %v4795_v43, %v4283_v42  ;;  %v3917_v52 = vpop.f32.mrb[35].mxu0 }
0x2a29   :  { %v3918_v53 = vadd.f32 %v4283_v42, %v3917_v52 }
0x2a2a   :  { %v3927_v60 = vmax.f32 %v3923_v45, 0.0 }
0x2a2b   :  { %v3926_v54 = vmax.f32 %v3918_v53, 0.0 }
0x2a2d   :  { %4812 = vmatprep.mubr.msk.f32.mxu1 %vm1339_vm5, %v3926_v54 }
0x2a2e   :  { %4813 = vmatmul.mubr.msk.f32.vlgmr.msra.gmra.mrb[36].mxu1 %vm1339_vm5, %v3927_v60 }
0x2b01   :  { %v4814_v61 = vpop.f32.mrb[36].mxu1 }
0x2b02   :  { %v4010_v56 = vadd.f32 %v4814_v61, %v6032_v9  ;;  %v4000_v10 = vpop.f32.mrb[37].mxu1 }
0x2b03   :  { %v4009_v46 = vadd.f32 %v4000_v10, %v6034_v57 }
0x2b04   :  { %v4016_v47 = vadd.f32 %v4288_v55, %v4010_v56 }
0x2b05   :  { %v4015_v30 = vadd.f32 %v4288_v55, %v4009_v46 }
0x2b06   :  { %v4022_v63 = vsel %vm138_vm1, %v4016_v47, 0.0 }
0x2b07   :  { %4023 = vadd.xlane.f32.xlu1 %v4022_v63  ;;  %v4019_v27 = vsel %vm138_vm1, %v4015_v30, 0.0 }
0x2b08   :  { %4020 = vadd.xlane.f32.xlu0 %v4019_v27 }
0x2b94   :  { %v4024_v0 = vpop.xlane.xlu1 %4023 }
0x2b95   :  { %v4026_v59 = vmul.f32 0.03125, %v4024_v0  ;;  %v4021_v62 = vpop.xlane.xlu0 %4020 }
0x2b96   :  { %v4025_v51 = vmul.f32 0.03125, %v4021_v62 }
0x2b97   :  { %v4028_v4 = vsub.f32 %v4016_v47, %v4026_v59 }
0x2b98   :  { %v4027_v5 = vsub.f32 %v4015_v30, %v4025_v51 }
0x2b99   :  { %v4030_v44 = vmul.f32 %v4028_v4, %v4028_v4 }
0x2b9a   :  { %v4029_v21 = vmul.f32 %v4027_v5, %v4027_v5 }
0x2b9b   :  { %v4034_v9 = vsel %vm138_vm1, %v4030_v44, 0.0 }
0x2b9c   :  { %4035 = vadd.xlane.f32.xlu1 %v4034_v9  ;;  %v4031_v57 = vsel %vm138_vm1, %v4029_v21, 0.0 }
0x2b9d   :  { %4032 = vadd.xlane.f32.xlu0 %v4031_v57 }
0x2c29   :  { %v4036_v12 = vpop.xlane.xlu1 %4035 }
0x2c2a   :  { %v4038_v58 = vmul.f32 0.03125, %v4036_v12  ;;  %v4033_v23 = vpop.xlane.xlu0 %4032 }
0x2c2b   :  { %v4037_v32 = vmul.f32 0.03125, %v4033_v23 }
0x2c2c   :  { %v4040_v13 = vadd.f32 1e-05, %v4038_v58 }
0x2c2d   :  { %v4039_v14 = vadd.f32 1e-05, %v4037_v32 }
0x2c2e   :  { %5367 = vrsqrt.f32 %v4040_v13 }
0x2c2f   :  { %5369 = vrsqrt.f32 %v4039_v14 }
0x2c38   :  { %v5368_v15 = vpop.eup %5367 }
0x2c39   :  { %v5370_v16 = vpop.eup %5369  ;;  %v4044_v17 = vmul.f32 %v5368_v15, %v4028_v4 }
0x2c3a   :  { %v4043_v39 = vmul.f32 %v5370_v16, %v4027_v5 }
0x2c3b   :  { %v4050_v26 = vmul.f32 %v4289_v1, %v4044_v17 }
0x2c3c   :  { %v4049_v11 = vmul.f32 %v4289_v1, %v4043_v39 }
0x2c3d   :  { %v4056_v22 = vadd.f32 %v4290_v40, %v4050_v26 }
0x2c3e   :  { %v4055_v18 = vadd.f32 %v4290_v40, %v4049_v11 }
0x2c40   :  { %4823 = vmatprep.mubr.msk.f32.mxu0 %vm138_vm1, %v4055_v18 }
0x2c41   :  { %4824 = vmatmul.mubr.msk.f32.vlgmr.msra.gmra.mrb[36].mxu0 %vm138_vm1, %v4056_v22 }
0x2d14   :  { %v4825_v33 = vpop.f32.mrb[36].mxu0 }
0x2d15   :  { %v4144_v8 = vadd.f32 %v4825_v33, %v4291_v31  ;;  %v4138_v19 = vpop.f32.mrb[37].mxu0 }
0x2d16   :  { %v4139_v20 = vadd.f32 %v4291_v31, %v4138_v19 }
0x2d17   :  { %4148 = vst [vmem:[#allocation7 + $0x8] sm:$0xff] %v4144_v8 }
0x2d18   :  { %4147 = vst [vmem:[#allocation7] sm:$0xff] %v4139_v20 }
0x2d19   :  { %5428 = shalt.err (!%p5425_p6)
}
0x2d1a   :  { %s5429_s26 = scalar_lea.hbm %s6073_s2, 256 }
0x2d1b   :  { %p5430_p7 = scmp.ne.s32.totalorder %s6073_s2, %s5429_s26  ;;  %p5433_p8 = scmp.lt.u32.totalorder %s5429_s26, %s6073_s2 }
0x2d1d   :  { %p5435_p9 = pnand %p5433_p8, %p5430_p7 }
0x2d1f   :  { %5438 = shalt.err (!%p5435_p9)
}
0x2d20   :  { %4160 = dma.vmem_to_hbm [thread:$0]  %s4155_s22, 256, %s6073_s2, [#allocation4], %s5446_s19, %s5446_s19, %s5447_s20  }
0x2d21   :  { %5443 = dma.done.wait [#allocation4], 256  }
0x2d22   :  { %5444 = vsyncadd [#allocation4], 4294967040 }
0x2d23   :  { %4164 = vsyncpa [#allocation3], 1 }
0x2d24   :  { %4165 = vsyncpa [#allocation6], 1 }
0x2d25   :  { %4166 = vsyncpa [#allocation4], 1 }

</bundles_post_ra>
